<compile_context>
chip_gen: v7x
topology: tpu7x:2x2x1
jax: 0.10.0
libtpu: 0.0.40
codegen_flags: <defaults>
</compile_context>

<pallas_src>
import functools

import jax
import jax.numpy as jnp
from jax.experimental import pallas as pl
from jax.experimental.pallas import tpu as pltpu


# ---------------------------------------------------------------------------
# Small helpers
# ---------------------------------------------------------------------------
@functools.lru_cache(maxsize=None)
def _vmem_limit_bytes():
    """Per-generation VMEM budget: ~3/4 of physical, capped at 96 MiB.

    v5e/v6e (128 MiB physical) -> 96 MiB; v7x (64 MiB) -> 48 MiB, leaving
    double-buffering headroom (review: don't use one flat 32 MiB number).
    """
    try:
        cap = int(pltpu.get_tpu_info().vmem_capacity_bytes)
    except Exception:
        cap = 64 * 1024 * 1024
    return min((cap * 3) // 4, 96 * 1024 * 1024)


def _pick_row_tile(ho, wo):
    """Largest divisor of `ho` giving >= ~4 grid steps, with (th*wo) % 8 == 0
    so the output block stays sublane-aligned."""
    target = max(4, ho // 4)
    for d in range(min(target, ho), 0, -1):
        if ho % d == 0 and (d * wo) % 8 == 0:
            return d
    return ho


def _pick_hw_tile(hw, cap=2048):
    """HW tile for the BN/transpose pass: full if small, else a multiple of 128."""
    if hw <= cap:
        return hw
    d = cap - (cap % 128)
    while d >= 128:
        if hw % d == 0:
            return d
        d -= 128
    return hw


# ---------------------------------------------------------------------------
# Pallas kernels
# ---------------------------------------------------------------------------
def sepconv_block_kernel(x_ref, scale_ref, shift_ref, dw_ref, pw_ref,
                         y_ref, sum_ref, ssq_ref,
                         pad_ref, dacc_ref, acc_ref, *opt_scratch,
                         k, stride, padding, th, wo, wl):
    """Fused [prev-BN affine] -> ReLU -> zero-pad -> depthwise -> 1x1 conv tile.

    Grid: (batch, Ho row tiles).  The padded activation for the whole image is
    built once per batch (at row-tile 0) into a persistent VMEM scratch; each
    grid step then produces `th` output rows:
        k*k depthwise taps on the VPU (f32 accumulate in dacc_ref)
        -> one (th*wo, C) x (C, Cout) MXU matmul into acc_ref
        -> bf16 writeout + per-tile BN partial sums.
    """
    h, w, c = x_ref.shape[1], x_ref.shape[2], x_ref.shape[3]
    cout = pw_ref.shape[1]
    j = pl.program_id(1)

    # ---- build the zero-padded, activated image once per batch -------------
    @pl.when(j == 0)
    def _fill():
        if stride == 1:
            ws = pad_ref.shape[1]
            # zero ONLY the border strips (review: no full-scratch memset)
            zrow = jnp.zeros((padding, ws, c), pad_ref.dtype)
            pad_ref[pl.ds(0, padding), :, :] = zrow                        # top
            pad_ref[pl.ds(padding + h, padding), :, :] = zrow              # bottom
            zcol = jnp.zeros((h, padding, c), pad_ref.dtype)
            pad_ref[pl.ds(padding, h), pl.ds(wl - padding, padding), :] = zcol
            pad_ref[pl.ds(padding, h), pl.ds(wl + w, padding), :] = zcol
            # affine + ReLU in f32, interior store sublane-aligned at col `wl`
            act = x_ref[0].astype(jnp.float32) * scale_ref[...] + shift_ref[...]
            act = jnp.maximum(act, 0.0)
            pad_ref[pl.ds(padding, h), pl.ds(wl, w), :] = act.astype(pad_ref.dtype)
        else:
            # stride == 2: polyphase (even/odd H x W) planes -> taps contiguous
            hph, wph = pad_ref.shape[2], pad_ref.shape[3]
            h2, w2 = h // 2, w // 2
            stage_ref = opt_scratch[0]
            # affine + ReLU once, staged in f32 (v5e has no bf16 VALU)
            act = x_ref[0].astype(jnp.float32) * scale_ref[...] + shift_ref[...]
            stage_ref[...] = jnp.maximum(act, 0.0)
            for rh in (0, 1):
                q0 = (padding - rh + 1) // 2     # first interior plane row
                a0 = 2 * q0 + rh - padding       # matching input row
                for rw in (0, 1):
                    p0 = (padding - rw + 1) // 2
                    b0 = 2 * p0 + rw - padding
                    # zero only the border strips of this phase plane
                    if q0 > 0:
                        pad_ref[rh, rw, pl.ds(0, q0), :, :] = jnp.zeros(
                            (q0, wph, c), pad_ref.dtype)
                    nb = hph - (q0 + h2)
                    if nb > 0:
                        pad_ref[rh, rw, pl.ds(q0 + h2, nb), :, :] = jnp.zeros(
                            (nb, wph, c), pad_ref.dtype)
                    if p0 > 0:
                        pad_ref[rh, rw, pl.ds(q0, h2), pl.ds(0, p0), :] = (
                            jnp.zeros((h2, p0, c), pad_ref.dtype))
                    nb = wph - (p0 + w2)
                    if nb > 0:
                        pad_ref[rh, rw, pl.ds(q0, h2), pl.ds(p0 + w2, nb), :] = (
                            jnp.zeros((h2, nb, c), pad_ref.dtype))
                    # de-interleave once at fill time; the k*k tap reads in the
                    # hot loop below are then fully contiguous.
                    v = stage_ref[pl.ds(a0, h2, 2), pl.ds(b0, w2, 2), :]
                    pad_ref[rh, rw, pl.ds(q0, h2), pl.ds(p0, w2), :] = (
                        v.astype(pad_ref.dtype))

    # ---- depthwise conv for this row tile: k*k VPU multiply-adds -----------
    r0 = pl.multiple_of(j * th, th)              # first output row of the tile
    for t in range(k * k):                       # static unroll; k*k is small
        kh, kw = divmod(t, k)
        if stride == 1:
            v = pad_ref[pl.ds(r0 + kh, th), pl.ds(wl - padding + kw, wo), :]
        else:
            v = pad_ref[kh % 2, kw % 2,
                        pl.ds(r0 + kh // 2, th), pl.ds(kw // 2, wo), :]
        term = v.astype(jnp.float32) * dw_ref[t]          # (th, wo, C) * (1, C)
        if t == 0:
            dacc_ref[...] = term
        else:
            dacc_ref[...] += term

    # ---- pointwise 1x1 conv: single MXU matmul per tile ---------------------
    # NOTE: the (th, wo, C) -> (th*wo, C) fold is layout-free when wo % 8 == 0
    # (deployment shapes); only one reshape per tile (not one per tap).
    lhs = dacc_ref[...].reshape(th * wo, c).astype(pw_ref.dtype)
    acc_ref[...] = jnp.dot(lhs, pw_ref[...], preferred_element_type=jnp.float32)

    y_ref[0] = acc_ref[...].astype(y_ref.dtype)
    # per-tile BN partial statistics (finished outside; avoids a 2nd HBM pass)
    sum_ref[0, 0, 0] = jnp.sum(acc_ref[...], axis=0)
    ssq_ref[0, 0, 0] = jnp.sum(acc_ref[...] * acc_ref[...], axis=0)


def bn_apply_kernel(y_ref, scale_ref, shift_ref, o_ref):
    """Final BN affine fused with the NHWC->NCHW transpose (lane-dense HW out)."""
    v = y_ref[0].astype(jnp.float32) * scale_ref[0] + shift_ref[0]
    o_ref[0] = jnp.transpose(v, (1, 0)).astype(o_ref.dtype)


# ---------------------------------------------------------------------------
# pallas_call wrappers
# ---------------------------------------------------------------------------
def sepconv_block(x_nhwc, scale, shift, dw, pw, *, k, stride, padding,
                  compute_dtype=jnp.bfloat16):
    n, h, w, c = x_nhwc.shape
    cout = pw.shape[1]
    assert stride in (1, 2), "SepConv uses stride 1 or 2"
    if stride == 2:
        assert h % 2 == 0 and w % 2 == 0, "stride-2 polyphase path assumes even H/W"

    ho = (h + 2 * padding - k) // stride + 1
    wo = (w + 2 * padding - k) // stride + 1
    th = _pick_row_tile(ho, wo)
    n_tiles = ho // th

    # sublane-aligned left margin for the interior pad-scratch store
    wl = 16 if compute_dtype == jnp.bfloat16 else 8
    if stride == 1:
        pad_shape = (h + 2 * padding, wl + w + padding, c)
    else:
        pad_shape = (2, 2, (k - 1) // 2 + ho, (k - 1) // 2 + wo, c)

    scratch_shapes = [
        pltpu.VMEM(pad_shape, compute_dtype),        # padded activation (per batch)
        pltpu.VMEM((th, wo, c), jnp.float32),        # depthwise accumulator
        pltpu.VMEM((th * wo, cout), jnp.float32),    # conv-output accumulator
    ]
    if stride == 2:
        scratch_shapes.append(pltpu.VMEM((h, w, c), jnp.float32))  # fill staging

    kernel = functools.partial(sepconv_block_kernel, k=k, stride=stride,
                               padding=padding, th=th, wo=wo, wl=wl)

    # TODO(synk): for very large feature maps, stream row windows with manual
    # DMA instead of keeping the whole image VMEM-resident per batch.
    y, s, ss = pl.pallas_call(
        kernel,
        out_shape=(
            jax.ShapeDtypeStruct((n, ho * wo, cout), compute_dtype),
            jax.ShapeDtypeStruct((n, n_tiles, 1, cout), jnp.float32),
            jax.ShapeDtypeStruct((n, n_tiles, 1, cout), jnp.float32),
        ),
        grid=(n, n_tiles),
        in_specs=[
            pl.BlockSpec((1, h, w, c), lambda i, j: (i, 0, 0, 0)),  # resident
            pl.BlockSpec((1, 1, c), lambda i, j: (0, 0, 0)),
            pl.BlockSpec((1, 1, c), lambda i, j: (0, 0, 0)),
            pl.BlockSpec((k * k, 1, c), lambda i, j: (0, 0, 0)),
            pl.BlockSpec((c, cout), lambda i, j: (0, 0)),
        ],
        out_specs=(
            pl.BlockSpec((1, th * wo, cout), lambda i, j: (i, j, 0)),
            pl.BlockSpec((1, 1, 1, cout), lambda i, j: (i, j, 0, 0)),
            pl.BlockSpec((1, 1, 1, cout), lambda i, j: (i, j, 0, 0)),
        ),
        scratch_shapes=scratch_shapes,
        compiler_params=pltpu.CompilerParams(
            # Row-tile axis reuses the per-batch padded scratch (filled at
            # j == 0), so it stays "arbitrary"; batch axis feeds megacore.
            # TODO(synk): per-tile halo fill would let the row axis be
            # "parallel" too (better v7x 2-core balance at tiny batch).
            dimension_semantics=("parallel", "arbitrary"),
            vmem_limit_bytes=_vmem_limit_bytes()),
    )(x_nhwc.astype(compute_dtype),
      scale.reshape(1, 1, c).astype(jnp.float32),
      shift.reshape(1, 1, c).astype(jnp.float32),
      dw.reshape(k * k, 1, c).astype(jnp.float32),
      pw.astype(compute_dtype))
    return y, s, ss, ho, wo


def bn_apply_nchw(y, scale, shift, *, out_dtype=jnp.float32):
    """Final BatchNorm apply fused with the NHWC->NCHW layout change."""
    n, hw, c = y.shape
    thw = _pick_hw_tile(hw)
    # TODO(synk): emit bf16 here if the downstream consumer accepts it.
    return pl.pallas_call(
        bn_apply_kernel,
        out_shape=jax.ShapeDtypeStruct((n, c, hw), out_dtype),
        grid=(n, hw // thw),
        in_specs=[
            pl.BlockSpec((1, thw, c), lambda i, j: (i, j, 0)),
            pl.BlockSpec((1, 1, c), lambda i, j: (0, 0, 0)),
            pl.BlockSpec((1, 1, c), lambda i, j: (0, 0, 0)),
        ],
        out_specs=pl.BlockSpec((1, c, thw), lambda i, j: (i, 0, j)),
        compiler_params=pltpu.CompilerParams(
            dimension_semantics=("parallel", "parallel"),
            vmem_limit_bytes=_vmem_limit_bytes()),
    )(y, scale.reshape(1, 1, c).astype(jnp.float32),
      shift.reshape(1, 1, c).astype(jnp.float32))


# ---------------------------------------------------------------------------
# SepConv forward (glue + kernels)
# ---------------------------------------------------------------------------
def bn_coeffs(sums, ssqs, count, gamma, beta, eps):
    """Finish the BN reduction from per-tile partial sums (training-mode stats)."""
    # TODO(synk): E[x^2]-E[x]^2 in f32 can lose precision at very large
    # N*Ho*Wo; switch to a shifted / Welford-style finish for that regime.
    total = jnp.sum(sums, axis=(0, 1, 2))
    total_sq = jnp.sum(ssqs, axis=(0, 1, 2))
    mean = total / count
    var = jnp.maximum(total_sq / count - mean * mean, 0.0)  # biased, as in PyTorch fwd
    scale = gamma * jax.lax.rsqrt(var + eps)
    shift = beta - mean * scale
    return scale, shift


def sepconv_forward(x_nchw, params, *, kernel_size, stride, padding, eps=1e-5,
                    compute_dtype=jnp.bfloat16):
    # TODO(synk): BN running_mean/running_var buffer updates are not modeled
    # (forward-only; normalization uses batch statistics, training mode).
    # TODO(synk): fuse this NCHW->NHWC input transpose into block 1's fill.
    # TODO(synk): optional v6e variant: deep-K (k*k*C) im2col single matmul.
    dw1, pw1, g1, b1, dw2, pw2, g2, b2 = params
    n, c_in = x_nchw.shape[0], x_nchw.shape[1]
    k = kernel_size
    x = jnp.transpose(x_nchw, (0, 2, 3, 1))                 # NHWC

    one = jnp.ones((c_in,), jnp.float32)
    zero = jnp.zeros((c_in,), jnp.float32)

    # block 1: ReLU -> dwconv(stride) -> 1x1   (BN1 partial stats fused)
    y1, s1, ss1, ho1, wo1 = sepconv_block(
        x, one, zero, dw1, pw1, k=k, stride=stride, padding=padding,
        compute_dtype=compute_dtype)
    scale1, shift1 = bn_coeffs(s1, ss1, n * ho1 * wo1, g1, b1, eps)

    # block 2: BN1 affine + ReLU fused in-kernel -> dwconv(1) -> 1x1
    y1_nhwc = y1.reshape(n, ho1, wo1, c_in)
    y2, s2, ss2, ho2, wo2 = sepconv_block(
        y1_nhwc, scale1, shift1, dw2, pw2, k=k, stride=1, padding=padding,
        compute_dtype=compute_dtype)
    scale2, shift2 = bn_coeffs(s2, ss2, n * ho2 * wo2, g2, b2, eps)

    c_out = pw2.shape[1]
    z = bn_apply_nchw(y2, scale2, shift2)                   # (N, C_out, Ho2*Wo2)
    return z.reshape(n, c_out, ho2, wo2)                    # NCHW (reshape is free)


# ---------------------------------------------------------------------------
# Pure-JAX (lax.conv) reference for verification
# ---------------------------------------------------------------------------
def sepconv_reference(x_nchw, params, *, kernel_size, stride, padding, eps=1e-5):
    dw1, pw1, g1, b1, dw2, pw2, g2, b2 = params
    k, p = kernel_size, padding

    def relu(v):
        return jnp.maximum(v, 0.0)

    def dwconv(v, w_kkc, s):
        c = v.shape[1]
        w = jnp.transpose(w_kkc, (2, 0, 1))[:, None, :, :]  # (C,1,k,k) OIHW
        return jax.lax.conv_general_dilated(
            v, w, (s, s), [(p, p), (p, p)],
            dimension_numbers=("NCHW", "OIHW", "NCHW"),
            feature_group_count=c, precision=jax.lax.Precision.HIGHEST)

    def pwconv(v, wmat):
        w = jnp.transpose(wmat)[:, :, None, None]            # (Cout,Cin,1,1)
        return jax.lax.conv_general_dilated(
            v, w, (1, 1), [(0, 0), (0, 0)],
            dimension_numbers=("NCHW", "OIHW", "NCHW"),
            precision=jax.lax.Precision.HIGHEST)

    def bn(v, gamma, beta):
        mean = jnp.mean(v, axis=(0, 2, 3), keepdims=True)
        var = jnp.var(v, axis=(0, 2, 3), keepdims=True)
        vn = (v - mean) * jax.lax.rsqrt(var + eps)
        return vn * gamma[None, :, None, None] + beta[None, :, None, None]

    v = relu(x_nchw.astype(jnp.float32))
    v = dwconv(v, dw1, stride)
    v = pwconv(v, pw1)
    v = bn(v, g1, b1)
    v = relu(v)
    v = dwconv(v, dw2, 1)
    v = pwconv(v, pw2)
    v = bn(v, g2, b2)
    return v


# ---------------------------------------------------------------------------
if __name__ == "__main__":
    N, C_IN, C_OUT, H, W = 2, 4, 8, 16, 16
    K, STRIDE, PADDING = 3, 2, 1

    key = jax.random.PRNGKey(0)
    ks = jax.random.split(key, 9)
    x = jax.random.normal(ks[0], (N, C_IN, H, W), jnp.float32)

    # Deterministic synthetic parameters (shapes follow the module's __init__).
    dw1 = 0.2 * jax.random.normal(ks[1], (K, K, C_IN), jnp.float32)      # depthwise #1
    pw1 = 0.2 * jax.random.normal(ks[2], (C_IN, C_IN), jnp.float32)      # 1x1 conv #1
    g1 = 1.0 + 0.1 * jax.random.normal(ks[3], (C_IN,), jnp.float32)      # BN1 gamma
    b1 = 0.1 * jax.random.normal(ks[4], (C_IN,), jnp.float32)            # BN1 beta
    dw2 = 0.2 * jax.random.normal(ks[5], (K, K, C_IN), jnp.float32)      # depthwise #2
    pw2 = 0.2 * jax.random.normal(ks[6], (C_IN, C_OUT), jnp.float32)     # 1x1 conv #2
    g2 = 1.0 + 0.1 * jax.random.normal(ks[7], (C_OUT,), jnp.float32)     # BN2 gamma
    b2 = 0.1 * jax.random.normal(ks[8], (C_OUT,), jnp.float32)           # BN2 beta
    params = (dw1, pw1, g1, b1, dw2, pw2, g2, b2)

    fwd = jax.jit(functools.partial(
        sepconv_forward, kernel_size=K, stride=STRIDE, padding=PADDING))
    out = jax.block_until_ready(fwd(x, params))

    ref = jax.block_until_ready(sepconv_reference(
        x, params, kernel_size=K, stride=STRIDE, padding=PADDING))

    assert out.shape == ref.shape == (N, C_OUT, 8, 8), (out.shape, ref.shape)
    assert bool(jnp.all(jnp.isfinite(out)))
    max_err = float(jnp.max(jnp.abs(out - ref)))
    # bf16 activations/weights (f32 accumulation) -> a few-percent tolerance.
    assert bool(jnp.allclose(out, ref, atol=5e-2, rtol=5e-2)), max_err

    print("KERNEL_OK")
</pallas_src>

<mosaic_0001>
module attributes {stable_mosaic.version = 11 : i64} {
  func.func @sepconv_block_kernel(%arg0: i32, %arg1: i32, %arg2: memref<1x16x16x4xbf16, #tpu.memory_space<vmem>>, %arg3: memref<1x1x4xf32, #tpu.memory_space<vmem>>, %arg4: memref<1x1x4xf32, #tpu.memory_space<vmem>>, %arg5: memref<9x1x4xf32, #tpu.memory_space<vmem>>, %arg6: memref<4x4xbf16, #tpu.memory_space<vmem>>, %arg7: memref<1x32x4xbf16, #tpu.memory_space<vmem>>, %arg8: memref<1x1x1x4xf32, #tpu.memory_space<vmem>>, %arg9: memref<1x1x1x4xf32, #tpu.memory_space<vmem>>, %arg10: memref<2x2x9x9x4xbf16, #tpu.memory_space<vmem>>, %arg11: memref<4x8x4xf32, #tpu.memory_space<vmem>>, %arg12: memref<32x4xf32, #tpu.memory_space<vmem>>, %arg13: memref<16x16x4xf32, #tpu.memory_space<vmem>>) attributes {dimension_semantics = [#tpu.dimension_semantics<parallel>, #tpu.dimension_semantics<arbitrary>], iteration_bounds = array<i64: 2, 2>, scalar_prefetch = 0 : i64, scratch_operands = 4 : i64, tpu.core_type = #tpu.core_type<tc>, window_params = [{transform_indices = @transform_0, window_bounds = array<i64: 1, 16, 16, 4>}, {pipeline_mode = #tpu.pipeline_mode<synchronous>, transform_indices = @transform_1, window_bounds = array<i64: 1, 1, 4>}, {pipeline_mode = #tpu.pipeline_mode<synchronous>, transform_indices = @transform_2, window_bounds = array<i64: 1, 1, 4>}, {pipeline_mode = #tpu.pipeline_mode<synchronous>, transform_indices = @transform_3, window_bounds = array<i64: 9, 1, 4>}, {pipeline_mode = #tpu.pipeline_mode<synchronous>, transform_indices = @transform_4, window_bounds = array<i64: 4, 4>}, {transform_indices = @transform_5, window_bounds = array<i64: 1, 32, 4>}, {transform_indices = @transform_6, window_bounds = array<i64: 1, 1, 1, 4>}, {transform_indices = @transform_7, window_bounds = array<i64: 1, 1, 1, 4>}]} {
    %c0_i32 = arith.constant 0 : i32
    %0 = arith.cmpi eq, %arg1, %c0_i32 : i32
    %1 = arith.extui %0 : i1 to i32
    %c0_i32_0 = arith.constant 0 : i32
    %2 = arith.cmpi ne, %1, %c0_i32_0 : i32
    scf.if %2 {
      %c0_142 = arith.constant 0 : index
      %c0_143 = arith.constant 0 : index
      %c0_144 = arith.constant 0 : index
      %c0_145 = arith.constant 0 : index
      %143 = vector.load %arg2[%c0_142, %c0_143, %c0_144, %c0_145] : memref<1x16x16x4xbf16, #tpu.memory_space<vmem>>, vector<1x16x16x4xbf16>
      %144 = vector.shape_cast %143 : vector<1x16x16x4xbf16> to vector<16x16x4xbf16>
      %145 = arith.extf %144 : vector<16x16x4xbf16> to vector<16x16x4xf32>
      %c0_146 = arith.constant 0 : index
      %c0_147 = arith.constant 0 : index
      %c0_148 = arith.constant 0 : index
      %146 = vector.load %arg3[%c0_146, %c0_147, %c0_148] : memref<1x1x4xf32, #tpu.memory_space<vmem>>, vector<1x1x4xf32>
      %147 = vector.broadcast %146 : vector<1x1x4xf32> to vector<16x16x4xf32>
      %148 = arith.mulf %145, %147 : vector<16x16x4xf32>
      %c0_149 = arith.constant 0 : index
      %c0_150 = arith.constant 0 : index
      %c0_151 = arith.constant 0 : index
      %149 = vector.load %arg4[%c0_149, %c0_150, %c0_151] : memref<1x1x4xf32, #tpu.memory_space<vmem>>, vector<1x1x4xf32>
      %150 = vector.broadcast %149 : vector<1x1x4xf32> to vector<16x16x4xf32>
      %151 = arith.addf %148, %150 : vector<16x16x4xf32>
      %cst_152 = arith.constant 0.000000e+00 : f32
      %152 = vector.broadcast %cst_152 : f32 to vector<16x16x4xf32>
      %153 = arith.maximumf %151, %152 : vector<16x16x4xf32>
      %c0_153 = arith.constant 0 : index
      %c0_154 = arith.constant 0 : index
      %c0_155 = arith.constant 0 : index
      %154 = vector.load %arg13[%c0_153, %c0_154, %c0_155] : memref<16x16x4xf32, #tpu.memory_space<vmem>>, vector<16x16x4xf32>
      tpu.vector_store %arg13[%c0_153, %c0_154, %c0_155], %153 {strides = array<i32>} : memref<16x16x4xf32, #tpu.memory_space<vmem>>, vector<16x16x4xf32>,
      %cst_156 = arith.constant 0.000000e+00 : bf16
      %155 = vector.broadcast %cst_156 : bf16 to vector<1x9x4xbf16>
      %c0_157 = arith.constant 0 : index
      %c0_158 = arith.constant 0 : index
      %c0_159 = arith.constant 0 : index
      %c0_160 = arith.constant 0 : index
      %c0_161 = arith.constant 0 : index
      %156 = vector.load %arg10[%c0_157, %c0_158, %c0_159, %c0_160, %c0_161] : memref<2x2x9x9x4xbf16, #tpu.memory_space<vmem>>, vector<1x1x1x9x4xbf16>
      %157 = vector.shape_cast %156 : vector<1x1x1x9x4xbf16> to vector<1x9x4xbf16>
      %158 = vector.shape_cast %155 : vector<1x9x4xbf16> to vector<1x1x1x9x4xbf16>
      tpu.vector_store %arg10[%c0_157, %c0_158, %c0_159, %c0_160, %c0_161], %158 {strides = array<i32>} : memref<2x2x9x9x4xbf16, #tpu.memory_space<vmem>>, vector<1x1x1x9x4xbf16>,
      %cst_162 = arith.constant 0.000000e+00 : bf16
      %159 = vector.broadcast %cst_162 : bf16 to vector<8x1x4xbf16>
      %c0_163 = arith.constant 0 : index
      %c0_164 = arith.constant 0 : index
      %c1_165 = arith.constant 1 : index
      %c0_166 = arith.constant 0 : index
      %c0_167 = arith.constant 0 : index
      %160 = vector.load %arg10[%c0_163, %c0_164, %c1_165, %c0_166, %c0_167] : memref<2x2x9x9x4xbf16, #tpu.memory_space<vmem>>, vector<1x1x8x1x4xbf16>
      %161 = vector.shape_cast %160 : vector<1x1x8x1x4xbf16> to vector<8x1x4xbf16>
      %162 = vector.shape_cast %159 : vector<8x1x4xbf16> to vector<1x1x8x1x4xbf16>
      tpu.vector_store %arg10[%c0_163, %c0_164, %c1_165, %c0_166, %c0_167], %162 {strides = array<i32>} : memref<2x2x9x9x4xbf16, #tpu.memory_space<vmem>>, vector<1x1x8x1x4xbf16>,
      %c1_168 = arith.constant 1 : index
      %c1_169 = arith.constant 1 : index
      %c0_170 = arith.constant 0 : index
      %163 = tpu.strided_load %arg13[%c1_168, %c1_169, %c0_170] {strides = array<i32: 2, 2, 1>} : memref<16x16x4xf32, #tpu.memory_space<vmem>>, vector<8x8x4xf32>
      %164 = arith.truncf %163 : vector<8x8x4xf32> to vector<8x8x4xbf16>
      %c0_171 = arith.constant 0 : index
      %c0_172 = arith.constant 0 : index
      %c1_173 = arith.constant 1 : index
      %c1_174 = arith.constant 1 : index
      %c0_175 = arith.constant 0 : index
      %165 = vector.load %arg10[%c0_171, %c0_172, %c1_173, %c1_174, %c0_175] : memref<2x2x9x9x4xbf16, #tpu.memory_space<vmem>>, vector<1x1x8x8x4xbf16>
      %166 = vector.shape_cast %165 : vector<1x1x8x8x4xbf16> to vector<8x8x4xbf16>
      %167 = vector.shape_cast %164 : vector<8x8x4xbf16> to vector<1x1x8x8x4xbf16>
      tpu.vector_store %arg10[%c0_171, %c0_172, %c1_173, %c1_174, %c0_175], %167 {strides = array<i32>} : memref<2x2x9x9x4xbf16, #tpu.memory_space<vmem>>, vector<1x1x8x8x4xbf16>,
      %cst_176 = arith.constant 0.000000e+00 : bf16
      %168 = vector.broadcast %cst_176 : bf16 to vector<1x9x4xbf16>
      %c0_177 = arith.constant 0 : index
      %c1_178 = arith.constant 1 : index
      %c0_179 = arith.constant 0 : index
      %c0_180 = arith.constant 0 : index
      %c0_181 = arith.constant 0 : index
      %169 = vector.load %arg10[%c0_177, %c1_178, %c0_179, %c0_180, %c0_181] : memref<2x2x9x9x4xbf16, #tpu.memory_space<vmem>>, vector<1x1x1x9x4xbf16>
      %170 = vector.shape_cast %169 : vector<1x1x1x9x4xbf16> to vector<1x9x4xbf16>
      %171 = vector.shape_cast %168 : vector<1x9x4xbf16> to vector<1x1x1x9x4xbf16>
      tpu.vector_store %arg10[%c0_177, %c1_178, %c0_179, %c0_180, %c0_181], %171 {strides = array<i32>} : memref<2x2x9x9x4xbf16, #tpu.memory_space<vmem>>, vector<1x1x1x9x4xbf16>,
      %cst_182 = arith.constant 0.000000e+00 : bf16
      %172 = vector.broadcast %cst_182 : bf16 to vector<8x1x4xbf16>
      %c0_183 = arith.constant 0 : index
      %c1_184 = arith.constant 1 : index
      %c1_185 = arith.constant 1 : index
      %c8_186 = arith.constant 8 : index
      %c0_187 = arith.constant 0 : index
      %173 = vector.load %arg10[%c0_183, %c1_184, %c1_185, %c8_186, %c0_187] : memref<2x2x9x9x4xbf16, #tpu.memory_space<vmem>>, vector<1x1x8x1x4xbf16>
      %174 = vector.shape_cast %173 : vector<1x1x8x1x4xbf16> to vector<8x1x4xbf16>
      %175 = vector.shape_cast %172 : vector<8x1x4xbf16> to vector<1x1x8x1x4xbf16>
      tpu.vector_store %arg10[%c0_183, %c1_184, %c1_185, %c8_186, %c0_187], %175 {strides = array<i32>} : memref<2x2x9x9x4xbf16, #tpu.memory_space<vmem>>, vector<1x1x8x1x4xbf16>,
      %c1_188 = arith.constant 1 : index
      %c0_189 = arith.constant 0 : index
      %c0_190 = arith.constant 0 : index
      %176 = tpu.strided_load %arg13[%c1_188, %c0_189, %c0_190] {strides = array<i32: 2, 2, 1>} : memref<16x16x4xf32, #tpu.memory_space<vmem>>, vector<8x8x4xf32>
      %177 = arith.truncf %176 : vector<8x8x4xf32> to vector<8x8x4xbf16>
      %c0_191 = arith.constant 0 : index
      %c1_192 = arith.constant 1 : index
      %c1_193 = arith.constant 1 : index
      %c0_194 = arith.constant 0 : index
      %c0_195 = arith.constant 0 : index
      %178 = vector.load %arg10[%c0_191, %c1_192, %c1_193, %c0_194, %c0_195] : memref<2x2x9x9x4xbf16, #tpu.memory_space<vmem>>, vector<1x1x8x8x4xbf16>
      %179 = vector.shape_cast %178 : vector<1x1x8x8x4xbf16> to vector<8x8x4xbf16>
      %180 = vector.shape_cast %177 : vector<8x8x4xbf16> to vector<1x1x8x8x4xbf16>
      tpu.vector_store %arg10[%c0_191, %c1_192, %c1_193, %c0_194, %c0_195], %180 {strides = array<i32>} : memref<2x2x9x9x4xbf16, #tpu.memory_space<vmem>>, vector<1x1x8x8x4xbf16>,
      %cst_196 = arith.constant 0.000000e+00 : bf16
      %181 = vector.broadcast %cst_196 : bf16 to vector<1x9x4xbf16>
      %c1_197 = arith.constant 1 : index
      %c0_198 = arith.constant 0 : index
      %c8_199 = arith.constant 8 : index
      %c0_200 = arith.constant 0 : index
      %c0_201 = arith.constant 0 : index
      %182 = vector.load %arg10[%c1_197, %c0_198, %c8_199, %c0_200, %c0_201] : memref<2x2x9x9x4xbf16, #tpu.memory_space<vmem>>, vector<1x1x1x9x4xbf16>
      %183 = vector.shape_cast %182 : vector<1x1x1x9x4xbf16> to vector<1x9x4xbf16>
      %184 = vector.shape_cast %181 : vector<1x9x4xbf16> to vector<1x1x1x9x4xbf16>
      tpu.vector_store %arg10[%c1_197, %c0_198, %c8_199, %c0_200, %c0_201], %184 {strides = array<i32>} : memref<2x2x9x9x4xbf16, #tpu.memory_space<vmem>>, vector<1x1x1x9x4xbf16>,
      %cst_202 = arith.constant 0.000000e+00 : bf16
      %185 = vector.broadcast %cst_202 : bf16 to vector<8x1x4xbf16>
      %c1_203 = arith.constant 1 : index
      %c0_204 = arith.constant 0 : index
      %c0_205 = arith.constant 0 : index
      %c0_206 = arith.constant 0 : index
      %c0_207 = arith.constant 0 : index
      %186 = vector.load %arg10[%c1_203, %c0_204, %c0_205, %c0_206, %c0_207] : memref<2x2x9x9x4xbf16, #tpu.memory_space<vmem>>, vector<1x1x8x1x4xbf16>
      %187 = vector.shape_cast %186 : vector<1x1x8x1x4xbf16> to vector<8x1x4xbf16>
      %188 = vector.shape_cast %185 : vector<8x1x4xbf16> to vector<1x1x8x1x4xbf16>
      tpu.vector_store %arg10[%c1_203, %c0_204, %c0_205, %c0_206, %c0_207], %188 {strides = array<i32>} : memref<2x2x9x9x4xbf16, #tpu.memory_space<vmem>>, vector<1x1x8x1x4xbf16>,
      %c0_208 = arith.constant 0 : index
      %c1_209 = arith.constant 1 : index
      %c0_210 = arith.constant 0 : index
      %189 = tpu.strided_load %arg13[%c0_208, %c1_209, %c0_210] {strides = array<i32: 2, 2, 1>} : memref<16x16x4xf32, #tpu.memory_space<vmem>>, vector<8x8x4xf32>
      %190 = arith.truncf %189 : vector<8x8x4xf32> to vector<8x8x4xbf16>
      %c1_211 = arith.constant 1 : index
      %c0_212 = arith.constant 0 : index
      %c0_213 = arith.constant 0 : index
      %c1_214 = arith.constant 1 : index
      %c0_215 = arith.constant 0 : index
      %191 = vector.load %arg10[%c1_211, %c0_212, %c0_213, %c1_214, %c0_215] : memref<2x2x9x9x4xbf16, #tpu.memory_space<vmem>>, vector<1x1x8x8x4xbf16>
      %192 = vector.shape_cast %191 : vector<1x1x8x8x4xbf16> to vector<8x8x4xbf16>
      %193 = vector.shape_cast %190 : vector<8x8x4xbf16> to vector<1x1x8x8x4xbf16>
      tpu.vector_store %arg10[%c1_211, %c0_212, %c0_213, %c1_214, %c0_215], %193 {strides = array<i32>} : memref<2x2x9x9x4xbf16, #tpu.memory_space<vmem>>, vector<1x1x8x8x4xbf16>,
      %cst_216 = arith.constant 0.000000e+00 : bf16
      %194 = vector.broadcast %cst_216 : bf16 to vector<1x9x4xbf16>
      %c1_217 = arith.constant 1 : index
      %c1_218 = arith.constant 1 : index
      %c8_219 = arith.constant 8 : index
      %c0_220 = arith.constant 0 : index
      %c0_221 = arith.constant 0 : index
      %195 = vector.load %arg10[%c1_217, %c1_218, %c8_219, %c0_220, %c0_221] : memref<2x2x9x9x4xbf16, #tpu.memory_space<vmem>>, vector<1x1x1x9x4xbf16>
      %196 = vector.shape_cast %195 : vector<1x1x1x9x4xbf16> to vector<1x9x4xbf16>
      %197 = vector.shape_cast %194 : vector<1x9x4xbf16> to vector<1x1x1x9x4xbf16>
      tpu.vector_store %arg10[%c1_217, %c1_218, %c8_219, %c0_220, %c0_221], %197 {strides = array<i32>} : memref<2x2x9x9x4xbf16, #tpu.memory_space<vmem>>, vector<1x1x1x9x4xbf16>,
      %cst_222 = arith.constant 0.000000e+00 : bf16
      %198 = vector.broadcast %cst_222 : bf16 to vector<8x1x4xbf16>
      %c1_223 = arith.constant 1 : index
      %c1_224 = arith.constant 1 : index
      %c0_225 = arith.constant 0 : index
      %c8_226 = arith.constant 8 : index
      %c0_227 = arith.constant 0 : index
      %199 = vector.load %arg10[%c1_223, %c1_224, %c0_225, %c8_226, %c0_227] : memref<2x2x9x9x4xbf16, #tpu.memory_space<vmem>>, vector<1x1x8x1x4xbf16>
      %200 = vector.shape_cast %199 : vector<1x1x8x1x4xbf16> to vector<8x1x4xbf16>
      %201 = vector.shape_cast %198 : vector<8x1x4xbf16> to vector<1x1x8x1x4xbf16>
      tpu.vector_store %arg10[%c1_223, %c1_224, %c0_225, %c8_226, %c0_227], %201 {strides = array<i32>} : memref<2x2x9x9x4xbf16, #tpu.memory_space<vmem>>, vector<1x1x8x1x4xbf16>,
      %c0_228 = arith.constant 0 : index
      %c0_229 = arith.constant 0 : index
      %c0_230 = arith.constant 0 : index
      %202 = tpu.strided_load %arg13[%c0_228, %c0_229, %c0_230] {strides = array<i32: 2, 2, 1>} : memref<16x16x4xf32, #tpu.memory_space<vmem>>, vector<8x8x4xf32>
      %203 = arith.truncf %202 : vector<8x8x4xf32> to vector<8x8x4xbf16>
      %c1_231 = arith.constant 1 : index
      %c1_232 = arith.constant 1 : index
      %c0_233 = arith.constant 0 : index
      %c0_234 = arith.constant 0 : index
      %c0_235 = arith.constant 0 : index
      %204 = vector.load %arg10[%c1_231, %c1_232, %c0_233, %c0_234, %c0_235] : memref<2x2x9x9x4xbf16, #tpu.memory_space<vmem>>, vector<1x1x8x8x4xbf16>
      %205 = vector.shape_cast %204 : vector<1x1x8x8x4xbf16> to vector<8x8x4xbf16>
      %206 = vector.shape_cast %203 : vector<8x8x4xbf16> to vector<1x1x8x8x4xbf16>
      tpu.vector_store %arg10[%c1_231, %c1_232, %c0_233, %c0_234, %c0_235], %206 {strides = array<i32>} : memref<2x2x9x9x4xbf16, #tpu.memory_space<vmem>>, vector<1x1x8x8x4xbf16>,
    } else {
    }
    %c4_i32 = arith.constant 4 : i32
    %3 = arith.muli %arg1, %c4_i32 : i32
    %4 = tpu.assume_multiple %3, 4 : i32
    %c0_i32_1 = arith.constant 0 : i32
    %5 = arith.addi %4, %c0_i32_1 : i32
    %c0 = arith.constant 0 : index
    %c0_2 = arith.constant 0 : index
    %6 = arith.index_cast %5 : i32 to index
    %c0_3 = arith.constant 0 : index
    %c0_4 = arith.constant 0 : index
    %7 = vector.load %arg10[%c0, %c0_2, %6, %c0_3, %c0_4] : memref<2x2x9x9x4xbf16, #tpu.memory_space<vmem>>, vector<1x1x4x8x4xbf16>
    %8 = vector.shape_cast %7 : vector<1x1x4x8x4xbf16> to vector<4x8x4xbf16>
    %9 = arith.extf %8 : vector<4x8x4xbf16> to vector<4x8x4xf32>
    %c0_5 = arith.constant 0 : index
    %c0_6 = arith.constant 0 : index
    %c0_7 = arith.constant 0 : index
    %10 = vector.load %arg5[%c0_5, %c0_6, %c0_7] : memref<9x1x4xf32, #tpu.memory_space<vmem>>, vector<1x1x4xf32>
    %11 = vector.shape_cast %10 : vector<1x1x4xf32> to vector<1x4xf32>
    %12 = vector.shape_cast %11 : vector<1x4xf32> to vector<1x1x4xf32>
    %13 = vector.broadcast %12 : vector<1x1x4xf32> to vector<4x8x4xf32>
    %14 = arith.mulf %9, %13 : vector<4x8x4xf32>
    %c0_8 = arith.constant 0 : index
    %c0_9 = arith.constant 0 : index
    %c0_10 = arith.constant 0 : index
    %15 = vector.load %arg11[%c0_8, %c0_9, %c0_10] : memref<4x8x4xf32, #tpu.memory_space<vmem>>, vector<4x8x4xf32>
    tpu.vector_store %arg11[%c0_8, %c0_9, %c0_10], %14 {strides = array<i32>} : memref<4x8x4xf32, #tpu.memory_space<vmem>>, vector<4x8x4xf32>,
    %c0_i32_11 = arith.constant 0 : i32
    %16 = arith.addi %4, %c0_i32_11 : i32
    %c0_12 = arith.constant 0 : index
    %c1 = arith.constant 1 : index
    %17 = arith.index_cast %16 : i32 to index
    %c0_13 = arith.constant 0 : index
    %c0_14 = arith.constant 0 : index
    %18 = vector.load %arg10[%c0_12, %c1, %17, %c0_13, %c0_14] : memref<2x2x9x9x4xbf16, #tpu.memory_space<vmem>>, vector<1x1x4x8x4xbf16>
    %19 = vector.shape_cast %18 : vector<1x1x4x8x4xbf16> to vector<4x8x4xbf16>
    %20 = arith.extf %19 : vector<4x8x4xbf16> to vector<4x8x4xf32>
    %c1_15 = arith.constant 1 : index
    %c0_16 = arith.constant 0 : index
    %c0_17 = arith.constant 0 : index
    %21 = vector.load %arg5[%c1_15, %c0_16, %c0_17] : memref<9x1x4xf32, #tpu.memory_space<vmem>>, vector<1x1x4xf32>
    %22 = vector.shape_cast %21 : vector<1x1x4xf32> to vector<1x4xf32>
    %23 = vector.shape_cast %22 : vector<1x4xf32> to vector<1x1x4xf32>
    %24 = vector.broadcast %23 : vector<1x1x4xf32> to vector<4x8x4xf32>
    %25 = arith.mulf %20, %24 : vector<4x8x4xf32>
    %c0_18 = arith.constant 0 : index
    %c0_19 = arith.constant 0 : index
    %c0_20 = arith.constant 0 : index
    %26 = vector.load %arg11[%c0_18, %c0_19, %c0_20] : memref<4x8x4xf32, #tpu.memory_space<vmem>>, vector<4x8x4xf32>
    %27 = arith.addf %26, %25 : vector<4x8x4xf32>
    %c0_21 = arith.constant 0 : index
    %c0_22 = arith.constant 0 : index
    %c0_23 = arith.constant 0 : index
    %28 = vector.load %arg11[%c0_21, %c0_22, %c0_23] : memref<4x8x4xf32, #tpu.memory_space<vmem>>, vector<4x8x4xf32>
    tpu.vector_store %arg11[%c0_21, %c0_22, %c0_23], %27 {strides = array<i32>} : memref<4x8x4xf32, #tpu.memory_space<vmem>>, vector<4x8x4xf32>,
    %c0_i32_24 = arith.constant 0 : i32
    %29 = arith.addi %4, %c0_i32_24 : i32
    %c0_25 = arith.constant 0 : index
    %c0_26 = arith.constant 0 : index
    %30 = arith.index_cast %29 : i32 to index
    %c1_27 = arith.constant 1 : index
    %c0_28 = arith.constant 0 : index
    %31 = vector.load %arg10[%c0_25, %c0_26, %30, %c1_27, %c0_28] : memref<2x2x9x9x4xbf16, #tpu.memory_space<vmem>>, vector<1x1x4x8x4xbf16>
    %32 = vector.shape_cast %31 : vector<1x1x4x8x4xbf16> to vector<4x8x4xbf16>
    %33 = arith.extf %32 : vector<4x8x4xbf16> to vector<4x8x4xf32>
    %c2 = arith.constant 2 : index
    %c0_29 = arith.constant 0 : index
    %c0_30 = arith.constant 0 : index
    %34 = vector.load %arg5[%c2, %c0_29, %c0_30] : memref<9x1x4xf32, #tpu.memory_space<vmem>>, vector<1x1x4xf32>
    %35 = vector.shape_cast %34 : vector<1x1x4xf32> to vector<1x4xf32>
    %36 = vector.shape_cast %35 : vector<1x4xf32> to vector<1x1x4xf32>
    %37 = vector.broadcast %36 : vector<1x1x4xf32> to vector<4x8x4xf32>
    %38 = arith.mulf %33, %37 : vector<4x8x4xf32>
    %c0_31 = arith.constant 0 : index
    %c0_32 = arith.constant 0 : index
    %c0_33 = arith.constant 0 : index
    %39 = vector.load %arg11[%c0_31, %c0_32, %c0_33] : memref<4x8x4xf32, #tpu.memory_space<vmem>>, vector<4x8x4xf32>
    %40 = arith.addf %39, %38 : vector<4x8x4xf32>
    %c0_34 = arith.constant 0 : index
    %c0_35 = arith.constant 0 : index
    %c0_36 = arith.constant 0 : index
    %41 = vector.load %arg11[%c0_34, %c0_35, %c0_36] : memref<4x8x4xf32, #tpu.memory_space<vmem>>, vector<4x8x4xf32>
    tpu.vector_store %arg11[%c0_34, %c0_35, %c0_36], %40 {strides = array<i32>} : memref<4x8x4xf32, #tpu.memory_space<vmem>>, vector<4x8x4xf32>,
    %c0_i32_37 = arith.constant 0 : i32
    %42 = arith.addi %4, %c0_i32_37 : i32
    %c1_38 = arith.constant 1 : index
    %c0_39 = arith.constant 0 : index
    %43 = arith.index_cast %42 : i32 to index
    %c0_40 = arith.constant 0 : index
    %c0_41 = arith.constant 0 : index
    %44 = vector.load %arg10[%c1_38, %c0_39, %43, %c0_40, %c0_41] : memref<2x2x9x9x4xbf16, #tpu.memory_space<vmem>>, vector<1x1x4x8x4xbf16>
    %45 = vector.shape_cast %44 : vector<1x1x4x8x4xbf16> to vector<4x8x4xbf16>
    %46 = arith.extf %45 : vector<4x8x4xbf16> to vector<4x8x4xf32>
    %c3 = arith.constant 3 : index
    %c0_42 = arith.constant 0 : index
    %c0_43 = arith.constant 0 : index
    %47 = vector.load %arg5[%c3, %c0_42, %c0_43] : memref<9x1x4xf32, #tpu.memory_space<vmem>>, vector<1x1x4xf32>
    %48 = vector.shape_cast %47 : vector<1x1x4xf32> to vector<1x4xf32>
    %49 = vector.shape_cast %48 : vector<1x4xf32> to vector<1x1x4xf32>
    %50 = vector.broadcast %49 : vector<1x1x4xf32> to vector<4x8x4xf32>
    %51 = arith.mulf %46, %50 : vector<4x8x4xf32>
    %c0_44 = arith.constant 0 : index
    %c0_45 = arith.constant 0 : index
    %c0_46 = arith.constant 0 : index
    %52 = vector.load %arg11[%c0_44, %c0_45, %c0_46] : memref<4x8x4xf32, #tpu.memory_space<vmem>>, vector<4x8x4xf32>
    %53 = arith.addf %52, %51 : vector<4x8x4xf32>
    %c0_47 = arith.constant 0 : index
    %c0_48 = arith.constant 0 : index
    %c0_49 = arith.constant 0 : index
    %54 = vector.load %arg11[%c0_47, %c0_48, %c0_49] : memref<4x8x4xf32, #tpu.memory_space<vmem>>, vector<4x8x4xf32>
    tpu.vector_store %arg11[%c0_47, %c0_48, %c0_49], %53 {strides = array<i32>} : memref<4x8x4xf32, #tpu.memory_space<vmem>>, vector<4x8x4xf32>,
    %c0_i32_50 = arith.constant 0 : i32
    %55 = arith.addi %4, %c0_i32_50 : i32
    %c1_51 = arith.constant 1 : index
    %c1_52 = arith.constant 1 : index
    %56 = arith.index_cast %55 : i32 to index
    %c0_53 = arith.constant 0 : index
    %c0_54 = arith.constant 0 : index
    %57 = vector.load %arg10[%c1_51, %c1_52, %56, %c0_53, %c0_54] : memref<2x2x9x9x4xbf16, #tpu.memory_space<vmem>>, vector<1x1x4x8x4xbf16>
    %58 = vector.shape_cast %57 : vector<1x1x4x8x4xbf16> to vector<4x8x4xbf16>
    %59 = arith.extf %58 : vector<4x8x4xbf16> to vector<4x8x4xf32>
    %c4 = arith.constant 4 : index
    %c0_55 = arith.constant 0 : index
    %c0_56 = arith.constant 0 : index
    %60 = vector.load %arg5[%c4, %c0_55, %c0_56] : memref<9x1x4xf32, #tpu.memory_space<vmem>>, vector<1x1x4xf32>
    %61 = vector.shape_cast %60 : vector<1x1x4xf32> to vector<1x4xf32>
    %62 = vector.shape_cast %61 : vector<1x4xf32> to vector<1x1x4xf32>
    %63 = vector.broadcast %62 : vector<1x1x4xf32> to vector<4x8x4xf32>
    %64 = arith.mulf %59, %63 : vector<4x8x4xf32>
    %c0_57 = arith.constant 0 : index
    %c0_58 = arith.constant 0 : index
    %c0_59 = arith.constant 0 : index
    %65 = vector.load %arg11[%c0_57, %c0_58, %c0_59] : memref<4x8x4xf32, #tpu.memory_space<vmem>>, vector<4x8x4xf32>
    %66 = arith.addf %65, %64 : vector<4x8x4xf32>
    %c0_60 = arith.constant 0 : index
    %c0_61 = arith.constant 0 : index
    %c0_62 = arith.constant 0 : index
    %67 = vector.load %arg11[%c0_60, %c0_61, %c0_62] : memref<4x8x4xf32, #tpu.memory_space<vmem>>, vector<4x8x4xf32>
    tpu.vector_store %arg11[%c0_60, %c0_61, %c0_62], %66 {strides = array<i32>} : memref<4x8x4xf32, #tpu.memory_space<vmem>>, vector<4x8x4xf32>,
    %c0_i32_63 = arith.constant 0 : i32
    %68 = arith.addi %4, %c0_i32_63 : i32
    %c1_64 = arith.constant 1 : index
    %c0_65 = arith.constant 0 : index
    %69 = arith.index_cast %68 : i32 to index
    %c1_66 = arith.constant 1 : index
    %c0_67 = arith.constant 0 : index
    %70 = vector.load %arg10[%c1_64, %c0_65, %69, %c1_66, %c0_67] : memref<2x2x9x9x4xbf16, #tpu.memory_space<vmem>>, vector<1x1x4x8x4xbf16>
    %71 = vector.shape_cast %70 : vector<1x1x4x8x4xbf16> to vector<4x8x4xbf16>
    %72 = arith.extf %71 : vector<4x8x4xbf16> to vector<4x8x4xf32>
    %c5 = arith.constant 5 : index
    %c0_68 = arith.constant 0 : index
    %c0_69 = arith.constant 0 : index
    %73 = vector.load %arg5[%c5, %c0_68, %c0_69] : memref<9x1x4xf32, #tpu.memory_space<vmem>>, vector<1x1x4xf32>
    %74 = vector.shape_cast %73 : vector<1x1x4xf32> to vector<1x4xf32>
    %75 = vector.shape_cast %74 : vector<1x4xf32> to vector<1x1x4xf32>
    %76 = vector.broadcast %75 : vector<1x1x4xf32> to vector<4x8x4xf32>
    %77 = arith.mulf %72, %76 : vector<4x8x4xf32>
    %c0_70 = arith.constant 0 : index
    %c0_71 = arith.constant 0 : index
    %c0_72 = arith.constant 0 : index
    %78 = vector.load %arg11[%c0_70, %c0_71, %c0_72] : memref<4x8x4xf32, #tpu.memory_space<vmem>>, vector<4x8x4xf32>
    %79 = arith.addf %78, %77 : vector<4x8x4xf32>
    %c0_73 = arith.constant 0 : index
    %c0_74 = arith.constant 0 : index
    %c0_75 = arith.constant 0 : index
    %80 = vector.load %arg11[%c0_73, %c0_74, %c0_75] : memref<4x8x4xf32, #tpu.memory_space<vmem>>, vector<4x8x4xf32>
    tpu.vector_store %arg11[%c0_73, %c0_74, %c0_75], %79 {strides = array<i32>} : memref<4x8x4xf32, #tpu.memory_space<vmem>>, vector<4x8x4xf32>,
    %c1_i32 = arith.constant 1 : i32
    %81 = arith.addi %4, %c1_i32 : i32
    %c0_76 = arith.constant 0 : index
    %c0_77 = arith.constant 0 : index
    %82 = arith.index_cast %81 : i32 to index
    %c0_78 = arith.constant 0 : index
    %c0_79 = arith.constant 0 : index
    %83 = vector.load %arg10[%c0_76, %c0_77, %82, %c0_78, %c0_79] : memref<2x2x9x9x4xbf16, #tpu.memory_space<vmem>>, vector<1x1x4x8x4xbf16>
    %84 = vector.shape_cast %83 : vector<1x1x4x8x4xbf16> to vector<4x8x4xbf16>
    %85 = arith.extf %84 : vector<4x8x4xbf16> to vector<4x8x4xf32>
    %c6 = arith.constant 6 : index
    %c0_80 = arith.constant 0 : index
    %c0_81 = arith.constant 0 : index
    %86 = vector.load %arg5[%c6, %c0_80, %c0_81] : memref<9x1x4xf32, #tpu.memory_space<vmem>>, vector<1x1x4xf32>
    %87 = vector.shape_cast %86 : vector<1x1x4xf32> to vector<1x4xf32>
    %88 = vector.shape_cast %87 : vector<1x4xf32> to vector<1x1x4xf32>
    %89 = vector.broadcast %88 : vector<1x1x4xf32> to vector<4x8x4xf32>
    %90 = arith.mulf %85, %89 : vector<4x8x4xf32>
    %c0_82 = arith.constant 0 : index
    %c0_83 = arith.constant 0 : index
    %c0_84 = arith.constant 0 : index
    %91 = vector.load %arg11[%c0_82, %c0_83, %c0_84] : memref<4x8x4xf32, #tpu.memory_space<vmem>>, vector<4x8x4xf32>
    %92 = arith.addf %91, %90 : vector<4x8x4xf32>
    %c0_85 = arith.constant 0 : index
    %c0_86 = arith.constant 0 : index
    %c0_87 = arith.constant 0 : index
    %93 = vector.load %arg11[%c0_85, %c0_86, %c0_87] : memref<4x8x4xf32, #tpu.memory_space<vmem>>, vector<4x8x4xf32>
    tpu.vector_store %arg11[%c0_85, %c0_86, %c0_87], %92 {strides = array<i32>} : memref<4x8x4xf32, #tpu.memory_space<vmem>>, vector<4x8x4xf32>,
    %c1_i32_88 = arith.constant 1 : i32
    %94 = arith.addi %4, %c1_i32_88 : i32
    %c0_89 = arith.constant 0 : index
    %c1_90 = arith.constant 1 : index
    %95 = arith.index_cast %94 : i32 to index
    %c0_91 = arith.constant 0 : index
    %c0_92 = arith.constant 0 : index
    %96 = vector.load %arg10[%c0_89, %c1_90, %95, %c0_91, %c0_92] : memref<2x2x9x9x4xbf16, #tpu.memory_space<vmem>>, vector<1x1x4x8x4xbf16>
    %97 = vector.shape_cast %96 : vector<1x1x4x8x4xbf16> to vector<4x8x4xbf16>
    %98 = arith.extf %97 : vector<4x8x4xbf16> to vector<4x8x4xf32>
    %c7 = arith.constant 7 : index
    %c0_93 = arith.constant 0 : index
    %c0_94 = arith.constant 0 : index
    %99 = vector.load %arg5[%c7, %c0_93, %c0_94] : memref<9x1x4xf32, #tpu.memory_space<vmem>>, vector<1x1x4xf32>
    %100 = vector.shape_cast %99 : vector<1x1x4xf32> to vector<1x4xf32>
    %101 = vector.shape_cast %100 : vector<1x4xf32> to vector<1x1x4xf32>
    %102 = vector.broadcast %101 : vector<1x1x4xf32> to vector<4x8x4xf32>
    %103 = arith.mulf %98, %102 : vector<4x8x4xf32>
    %c0_95 = arith.constant 0 : index
    %c0_96 = arith.constant 0 : index
    %c0_97 = arith.constant 0 : index
    %104 = vector.load %arg11[%c0_95, %c0_96, %c0_97] : memref<4x8x4xf32, #tpu.memory_space<vmem>>, vector<4x8x4xf32>
    %105 = arith.addf %104, %103 : vector<4x8x4xf32>
    %c0_98 = arith.constant 0 : index
    %c0_99 = arith.constant 0 : index
    %c0_100 = arith.constant 0 : index
    %106 = vector.load %arg11[%c0_98, %c0_99, %c0_100] : memref<4x8x4xf32, #tpu.memory_space<vmem>>, vector<4x8x4xf32>
    tpu.vector_store %arg11[%c0_98, %c0_99, %c0_100], %105 {strides = array<i32>} : memref<4x8x4xf32, #tpu.memory_space<vmem>>, vector<4x8x4xf32>,
    %c1_i32_101 = arith.constant 1 : i32
    %107 = arith.addi %4, %c1_i32_101 : i32
    %c0_102 = arith.constant 0 : index
    %c0_103 = arith.constant 0 : index
    %108 = arith.index_cast %107 : i32 to index
    %c1_104 = arith.constant 1 : index
    %c0_105 = arith.constant 0 : index
    %109 = vector.load %arg10[%c0_102, %c0_103, %108, %c1_104, %c0_105] : memref<2x2x9x9x4xbf16, #tpu.memory_space<vmem>>, vector<1x1x4x8x4xbf16>
    %110 = vector.shape_cast %109 : vector<1x1x4x8x4xbf16> to vector<4x8x4xbf16>
    %111 = arith.extf %110 : vector<4x8x4xbf16> to vector<4x8x4xf32>
    %c8 = arith.constant 8 : index
    %c0_106 = arith.constant 0 : index
    %c0_107 = arith.constant 0 : index
    %112 = vector.load %arg5[%c8, %c0_106, %c0_107] : memref<9x1x4xf32, #tpu.memory_space<vmem>>, vector<1x1x4xf32>
    %113 = vector.shape_cast %112 : vector<1x1x4xf32> to vector<1x4xf32>
    %114 = vector.shape_cast %113 : vector<1x4xf32> to vector<1x1x4xf32>
    %115 = vector.broadcast %114 : vector<1x1x4xf32> to vector<4x8x4xf32>
    %116 = arith.mulf %111, %115 : vector<4x8x4xf32>
    %c0_108 = arith.constant 0 : index
    %c0_109 = arith.constant 0 : index
    %c0_110 = arith.constant 0 : index
    %117 = vector.load %arg11[%c0_108, %c0_109, %c0_110] : memref<4x8x4xf32, #tpu.memory_space<vmem>>, vector<4x8x4xf32>
    %118 = arith.addf %117, %116 : vector<4x8x4xf32>
    %c0_111 = arith.constant 0 : index
    %c0_112 = arith.constant 0 : index
    %c0_113 = arith.constant 0 : index
    %119 = vector.load %arg11[%c0_111, %c0_112, %c0_113] : memref<4x8x4xf32, #tpu.memory_space<vmem>>, vector<4x8x4xf32>
    tpu.vector_store %arg11[%c0_111, %c0_112, %c0_113], %118 {strides = array<i32>} : memref<4x8x4xf32, #tpu.memory_space<vmem>>, vector<4x8x4xf32>,
    %c0_114 = arith.constant 0 : index
    %c0_115 = arith.constant 0 : index
    %c0_116 = arith.constant 0 : index
    %120 = vector.load %arg11[%c0_114, %c0_115, %c0_116] : memref<4x8x4xf32, #tpu.memory_space<vmem>>, vector<4x8x4xf32>
    %121 = vector.shape_cast %120 : vector<4x8x4xf32> to vector<32x4xf32>
    %122 = arith.truncf %121 : vector<32x4xf32> to vector<32x4xbf16>
    %c0_117 = arith.constant 0 : index
    %c0_118 = arith.constant 0 : index
    %123 = vector.load %arg6[%c0_117, %c0_118] : memref<4x4xbf16, #tpu.memory_space<vmem>>, vector<4x4xbf16>
    %cst = arith.constant dense<0.000000e+00> : vector<32x4xf32>
    %124 = tpu.matmul %122, %123, %cst {dimension_numbers = #tpu.dot_dimension_numbers<[1], [0], [0], [1], [0, 0, 1, 1], [], []>} : vector<32x4xbf16>, vector<4x4xbf16>, vector<32x4xf32> -> vector<32x4xf32>
    %c0_119 = arith.constant 0 : index
    %c0_120 = arith.constant 0 : index
    %125 = vector.load %arg12[%c0_119, %c0_120] : memref<32x4xf32, #tpu.memory_space<vmem>>, vector<32x4xf32>
    tpu.vector_store %arg12[%c0_119, %c0_120], %124 {strides = array<i32>} : memref<32x4xf32, #tpu.memory_space<vmem>>, vector<32x4xf32>,
    %c0_121 = arith.constant 0 : index
    %c0_122 = arith.constant 0 : index
    %126 = vector.load %arg12[%c0_121, %c0_122] : memref<32x4xf32, #tpu.memory_space<vmem>>, vector<32x4xf32>
    %127 = arith.truncf %126 : vector<32x4xf32> to vector<32x4xbf16>
    %c0_123 = arith.constant 0 : index
    %c0_124 = arith.constant 0 : index
    %c0_125 = arith.constant 0 : index
    %128 = vector.load %arg7[%c0_123, %c0_124, %c0_125] : memref<1x32x4xbf16, #tpu.memory_space<vmem>>, vector<1x32x4xbf16>
    %129 = vector.shape_cast %128 : vector<1x32x4xbf16> to vector<32x4xbf16>
    %130 = vector.shape_cast %127 : vector<32x4xbf16> to vector<1x32x4xbf16>
    tpu.vector_store %arg7[%c0_123, %c0_124, %c0_125], %130 {strides = array<i32>} : memref<1x32x4xbf16, #tpu.memory_space<vmem>>, vector<1x32x4xbf16>,
    %c0_126 = arith.constant 0 : index
    %c0_127 = arith.constant 0 : index
    %131 = vector.load %arg12[%c0_126, %c0_127] : memref<32x4xf32, #tpu.memory_space<vmem>>, vector<32x4xf32>
    %cst_128 = arith.constant dense<0.000000e+00> : vector<4xf32>
    %132 = vector.multi_reduction <add>, %131, %cst_128 [0] : vector<32x4xf32> to vector<4xf32>
    %c0_129 = arith.constant 0 : index
    %c0_130 = arith.constant 0 : index
    %c0_131 = arith.constant 0 : index
    %c0_132 = arith.constant 0 : index
    %133 = vector.load %arg8[%c0_129, %c0_130, %c0_131, %c0_132] : memref<1x1x1x4xf32, #tpu.memory_space<vmem>>, vector<1x1x1x4xf32>
    %134 = vector.shape_cast %133 : vector<1x1x1x4xf32> to vector<4xf32>
    %135 = vector.shape_cast %132 : vector<4xf32> to vector<1x1x1x4xf32>
    tpu.vector_store %arg8[%c0_129, %c0_130, %c0_131, %c0_132], %135 {strides = array<i32>} : memref<1x1x1x4xf32, #tpu.memory_space<vmem>>, vector<1x1x1x4xf32>,
    %c0_133 = arith.constant 0 : index
    %c0_134 = arith.constant 0 : index
    %136 = vector.load %arg12[%c0_133, %c0_134] : memref<32x4xf32, #tpu.memory_space<vmem>>, vector<32x4xf32>
    %c0_135 = arith.constant 0 : index
    %c0_136 = arith.constant 0 : index
    %137 = vector.load %arg12[%c0_135, %c0_136] : memref<32x4xf32, #tpu.memory_space<vmem>>, vector<32x4xf32>
    %138 = arith.mulf %136, %137 : vector<32x4xf32>
    %cst_137 = arith.constant dense<0.000000e+00> : vector<4xf32>
    %139 = vector.multi_reduction <add>, %138, %cst_137 [0] : vector<32x4xf32> to vector<4xf32>
    %c0_138 = arith.constant 0 : index
    %c0_139 = arith.constant 0 : index
    %c0_140 = arith.constant 0 : index
    %c0_141 = arith.constant 0 : index
    %140 = vector.load %arg9[%c0_138, %c0_139, %c0_140, %c0_141] : memref<1x1x1x4xf32, #tpu.memory_space<vmem>>, vector<1x1x1x4xf32>
    %141 = vector.shape_cast %140 : vector<1x1x1x4xf32> to vector<4xf32>
    %142 = vector.shape_cast %139 : vector<4xf32> to vector<1x1x1x4xf32>
    tpu.vector_store %arg9[%c0_138, %c0_139, %c0_140, %c0_141], %142 {strides = array<i32>} : memref<1x1x1x4xf32, #tpu.memory_space<vmem>>, vector<1x1x1x4xf32>,
    return
  }
  func.func @transform_0(%arg0: i32, %arg1: i32) -> (i32, i32, i32, i32) {
    %c0_i32 = arith.constant 0 : i32
    %c0_i32_0 = arith.constant 0 : i32
    %c0_i32_1 = arith.constant 0 : i32
    %c0_i32_2 = arith.constant 0 : i32
    return %arg0, %c0_i32, %c0_i32_0, %c0_i32_1 : i32, i32, i32, i32
  }
  func.func @transform_1(%arg0: i32, %arg1: i32) -> (i32, i32, i32) {
    %c0_i32 = arith.constant 0 : i32
    %c0_i32_0 = arith.constant 0 : i32
    %c0_i32_1 = arith.constant 0 : i32
    %c0_i32_2 = arith.constant 0 : i32
    return %c0_i32, %c0_i32_0, %c0_i32_1 : i32, i32, i32
  }
  func.func @transform_2(%arg0: i32, %arg1: i32) -> (i32, i32, i32) {
    %c0_i32 = arith.constant 0 : i32
    %c0_i32_0 = arith.constant 0 : i32
    %c0_i32_1 = arith.constant 0 : i32
    %c0_i32_2 = arith.constant 0 : i32
    return %c0_i32, %c0_i32_0, %c0_i32_1 : i32, i32, i32
  }
  func.func @transform_3(%arg0: i32, %arg1: i32) -> (i32, i32, i32) {
    %c0_i32 = arith.constant 0 : i32
    %c0_i32_0 = arith.constant 0 : i32
    %c0_i32_1 = arith.constant 0 : i32
    %c0_i32_2 = arith.constant 0 : i32
    return %c0_i32, %c0_i32_0, %c0_i32_1 : i32, i32, i32
  }
  func.func @transform_4(%arg0: i32, %arg1: i32) -> (i32, i32) {
    %c0_i32 = arith.constant 0 : i32
    %c0_i32_0 = arith.constant 0 : i32
    %c0_i32_1 = arith.constant 0 : i32
    return %c0_i32, %c0_i32_0 : i32, i32
  }
  func.func @transform_5(%arg0: i32, %arg1: i32) -> (i32, i32, i32) {
    %c0_i32 = arith.constant 0 : i32
    %c0_i32_0 = arith.constant 0 : i32
    return %arg0, %arg1, %c0_i32 : i32, i32, i32
  }
  func.func @transform_6(%arg0: i32, %arg1: i32) -> (i32, i32, i32, i32) {
    %c0_i32 = arith.constant 0 : i32
    %c0_i32_0 = arith.constant 0 : i32
    %c0_i32_1 = arith.constant 0 : i32
    return %arg0, %arg1, %c0_i32, %c0_i32_0 : i32, i32, i32, i32
  }
  func.func @transform_7(%arg0: i32, %arg1: i32) -> (i32, i32, i32, i32) {
    %c0_i32 = arith.constant 0 : i32
    %c0_i32_0 = arith.constant 0 : i32
    %c0_i32_1 = arith.constant 0 : i32
    return %arg0, %arg1, %c0_i32, %c0_i32_0 : i32, i32, i32, i32
  }
}

module attributes {stable_mosaic.version = 11 : i64} {
  func.func @sepconv_block_kernel(%arg0: i32, %arg1: i32, %arg2: memref<1x8x8x4xbf16, #tpu.memory_space<vmem>>, %arg3: memref<1x1x4xf32, #tpu.memory_space<vmem>>, %arg4: memref<1x1x4xf32, #tpu.memory_space<vmem>>, %arg5: memref<9x1x4xf32, #tpu.memory_space<vmem>>, %arg6: memref<4x8xbf16, #tpu.memory_space<vmem>>, %arg7: memref<1x32x8xbf16, #tpu.memory_space<vmem>>, %arg8: memref<1x1x1x8xf32, #tpu.memory_space<vmem>>, %arg9: memref<1x1x1x8xf32, #tpu.memory_space<vmem>>, %arg10: memref<10x25x4xbf16, #tpu.memory_space<vmem>>, %arg11: memref<4x8x4xf32, #tpu.memory_space<vmem>>, %arg12: memref<32x8xf32, #tpu.memory_space<vmem>>) attributes {dimension_semantics = [#tpu.dimension_semantics<parallel>, #tpu.dimension_semantics<arbitrary>], iteration_bounds = array<i64: 2, 2>, scalar_prefetch = 0 : i64, scratch_operands = 3 : i64, tpu.core_type = #tpu.core_type<tc>, window_params = [{transform_indices = @transform_0, window_bounds = array<i64: 1, 8, 8, 4>}, {pipeline_mode = #tpu.pipeline_mode<synchronous>, transform_indices = @transform_1, window_bounds = array<i64: 1, 1, 4>}, {pipeline_mode = #tpu.pipeline_mode<synchronous>, transform_indices = @transform_2, window_bounds = array<i64: 1, 1, 4>}, {pipeline_mode = #tpu.pipeline_mode<synchronous>, transform_indices = @transform_3, window_bounds = array<i64: 9, 1, 4>}, {pipeline_mode = #tpu.pipeline_mode<synchronous>, transform_indices = @transform_4, window_bounds = array<i64: 4, 8>}, {transform_indices = @transform_5, window_bounds = array<i64: 1, 32, 8>}, {transform_indices = @transform_6, window_bounds = array<i64: 1, 1, 1, 8>}, {transform_indices = @transform_7, window_bounds = array<i64: 1, 1, 1, 8>}]} {
    %c0_i32 = arith.constant 0 : i32
    %0 = arith.cmpi eq, %arg1, %c0_i32 : i32
    %1 = arith.extui %0 : i1 to i32
    %c0_i32_0 = arith.constant 0 : i32
    %2 = arith.cmpi ne, %1, %c0_i32_0 : i32
    scf.if %2 {
      %cst_120 = arith.constant 0.000000e+00 : bf16
      %134 = vector.broadcast %cst_120 : bf16 to vector<1x25x4xbf16>
      %c0_121 = arith.constant 0 : index
      %c0_122 = arith.constant 0 : index
      %c0_123 = arith.constant 0 : index
      %135 = vector.load %arg10[%c0_121, %c0_122, %c0_123] : memref<10x25x4xbf16, #tpu.memory_space<vmem>>, vector<1x25x4xbf16>
      tpu.vector_store %arg10[%c0_121, %c0_122, %c0_123], %134 {strides = array<i32>} : memref<10x25x4xbf16, #tpu.memory_space<vmem>>, vector<1x25x4xbf16>,
      %c9 = arith.constant 9 : index
      %c0_124 = arith.constant 0 : index
      %c0_125 = arith.constant 0 : index
      %136 = vector.load %arg10[%c9, %c0_124, %c0_125] : memref<10x25x4xbf16, #tpu.memory_space<vmem>>, vector<1x25x4xbf16>
      tpu.vector_store %arg10[%c9, %c0_124, %c0_125], %134 {strides = array<i32>} : memref<10x25x4xbf16, #tpu.memory_space<vmem>>, vector<1x25x4xbf16>,
      %cst_126 = arith.constant 0.000000e+00 : bf16
      %137 = vector.broadcast %cst_126 : bf16 to vector<8x1x4xbf16>
      %c1_127 = arith.constant 1 : index
      %c15_128 = arith.constant 15 : index
      %c0_129 = arith.constant 0 : index
      %138 = vector.load %arg10[%c1_127, %c15_128, %c0_129] : memref<10x25x4xbf16, #tpu.memory_space<vmem>>, vector<8x1x4xbf16>
      tpu.vector_store %arg10[%c1_127, %c15_128, %c0_129], %137 {strides = array<i32>} : memref<10x25x4xbf16, #tpu.memory_space<vmem>>, vector<8x1x4xbf16>,
      %c1_130 = arith.constant 1 : index
      %c24 = arith.constant 24 : index
      %c0_131 = arith.constant 0 : index
      %139 = vector.load %arg10[%c1_130, %c24, %c0_131] : memref<10x25x4xbf16, #tpu.memory_space<vmem>>, vector<8x1x4xbf16>
      tpu.vector_store %arg10[%c1_130, %c24, %c0_131], %137 {strides = array<i32>} : memref<10x25x4xbf16, #tpu.memory_space<vmem>>, vector<8x1x4xbf16>,
      %c0_132 = arith.constant 0 : index
      %c0_133 = arith.constant 0 : index
      %c0_134 = arith.constant 0 : index
      %c0_135 = arith.constant 0 : index
      %140 = vector.load %arg2[%c0_132, %c0_133, %c0_134, %c0_135] : memref<1x8x8x4xbf16, #tpu.memory_space<vmem>>, vector<1x8x8x4xbf16>
      %141 = vector.shape_cast %140 : vector<1x8x8x4xbf16> to vector<8x8x4xbf16>
      %142 = arith.extf %141 : vector<8x8x4xbf16> to vector<8x8x4xf32>
      %c0_136 = arith.constant 0 : index
      %c0_137 = arith.constant 0 : index
      %c0_138 = arith.constant 0 : index
      %143 = vector.load %arg3[%c0_136, %c0_137, %c0_138] : memref<1x1x4xf32, #tpu.memory_space<vmem>>, vector<1x1x4xf32>
      %144 = vector.broadcast %143 : vector<1x1x4xf32> to vector<8x8x4xf32>
      %145 = arith.mulf %142, %144 : vector<8x8x4xf32>
      %c0_139 = arith.constant 0 : index
      %c0_140 = arith.constant 0 : index
      %c0_141 = arith.constant 0 : index
      %146 = vector.load %arg4[%c0_139, %c0_140, %c0_141] : memref<1x1x4xf32, #tpu.memory_space<vmem>>, vector<1x1x4xf32>
      %147 = vector.broadcast %146 : vector<1x1x4xf32> to vector<8x8x4xf32>
      %148 = arith.addf %145, %147 : vector<8x8x4xf32>
      %cst_142 = arith.constant 0.000000e+00 : f32
      %149 = vector.broadcast %cst_142 : f32 to vector<8x8x4xf32>
      %150 = arith.maximumf %148, %149 : vector<8x8x4xf32>
      %151 = arith.truncf %150 : vector<8x8x4xf32> to vector<8x8x4xbf16>
      %c1_143 = arith.constant 1 : index
      %c16_144 = arith.constant 16 : index
      %c0_145 = arith.constant 0 : index
      %152 = vector.load %arg10[%c1_143, %c16_144, %c0_145] : memref<10x25x4xbf16, #tpu.memory_space<vmem>>, vector<8x8x4xbf16>
      tpu.vector_store %arg10[%c1_143, %c16_144, %c0_145], %151 {strides = array<i32>} : memref<10x25x4xbf16, #tpu.memory_space<vmem>>, vector<8x8x4xbf16>,
    } else {
    }
    %c4_i32 = arith.constant 4 : i32
    %3 = arith.muli %arg1, %c4_i32 : i32
    %4 = tpu.assume_multiple %3, 4 : i32
    %c0_i32_1 = arith.constant 0 : i32
    %5 = arith.addi %4, %c0_i32_1 : i32
    %6 = arith.index_cast %5 : i32 to index
    %c15 = arith.constant 15 : index
    %c0 = arith.constant 0 : index
    %7 = vector.load %arg10[%6, %c15, %c0] : memref<10x25x4xbf16, #tpu.memory_space<vmem>>, vector<4x8x4xbf16>
    %8 = arith.extf %7 : vector<4x8x4xbf16> to vector<4x8x4xf32>
    %c0_2 = arith.constant 0 : index
    %c0_3 = arith.constant 0 : index
    %c0_4 = arith.constant 0 : index
    %9 = vector.load %arg5[%c0_2, %c0_3, %c0_4] : memref<9x1x4xf32, #tpu.memory_space<vmem>>, vector<1x1x4xf32>
    %10 = vector.shape_cast %9 : vector<1x1x4xf32> to vector<1x4xf32>
    %11 = vector.shape_cast %10 : vector<1x4xf32> to vector<1x1x4xf32>
    %12 = vector.broadcast %11 : vector<1x1x4xf32> to vector<4x8x4xf32>
    %13 = arith.mulf %8, %12 : vector<4x8x4xf32>
    %c0_5 = arith.constant 0 : index
    %c0_6 = arith.constant 0 : index
    %c0_7 = arith.constant 0 : index
    %14 = vector.load %arg11[%c0_5, %c0_6, %c0_7] : memref<4x8x4xf32, #tpu.memory_space<vmem>>, vector<4x8x4xf32>
    tpu.vector_store %arg11[%c0_5, %c0_6, %c0_7], %13 {strides = array<i32>} : memref<4x8x4xf32, #tpu.memory_space<vmem>>, vector<4x8x4xf32>,
    %c0_i32_8 = arith.constant 0 : i32
    %15 = arith.addi %4, %c0_i32_8 : i32
    %16 = arith.index_cast %15 : i32 to index
    %c16 = arith.constant 16 : index
    %c0_9 = arith.constant 0 : index
    %17 = vector.load %arg10[%16, %c16, %c0_9] : memref<10x25x4xbf16, #tpu.memory_space<vmem>>, vector<4x8x4xbf16>
    %18 = arith.extf %17 : vector<4x8x4xbf16> to vector<4x8x4xf32>
    %c1 = arith.constant 1 : index
    %c0_10 = arith.constant 0 : index
    %c0_11 = arith.constant 0 : index
    %19 = vector.load %arg5[%c1, %c0_10, %c0_11] : memref<9x1x4xf32, #tpu.memory_space<vmem>>, vector<1x1x4xf32>
    %20 = vector.shape_cast %19 : vector<1x1x4xf32> to vector<1x4xf32>
    %21 = vector.shape_cast %20 : vector<1x4xf32> to vector<1x1x4xf32>
    %22 = vector.broadcast %21 : vector<1x1x4xf32> to vector<4x8x4xf32>
    %23 = arith.mulf %18, %22 : vector<4x8x4xf32>
    %c0_12 = arith.constant 0 : index
    %c0_13 = arith.constant 0 : index
    %c0_14 = arith.constant 0 : index
    %24 = vector.load %arg11[%c0_12, %c0_13, %c0_14] : memref<4x8x4xf32, #tpu.memory_space<vmem>>, vector<4x8x4xf32>
    %25 = arith.addf %24, %23 : vector<4x8x4xf32>
    %c0_15 = arith.constant 0 : index
    %c0_16 = arith.constant 0 : index
    %c0_17 = arith.constant 0 : index
    %26 = vector.load %arg11[%c0_15, %c0_16, %c0_17] : memref<4x8x4xf32, #tpu.memory_space<vmem>>, vector<4x8x4xf32>
    tpu.vector_store %arg11[%c0_15, %c0_16, %c0_17], %25 {strides = array<i32>} : memref<4x8x4xf32, #tpu.memory_space<vmem>>, vector<4x8x4xf32>,
    %c0_i32_18 = arith.constant 0 : i32
    %27 = arith.addi %4, %c0_i32_18 : i32
    %28 = arith.index_cast %27 : i32 to index
    %c17 = arith.constant 17 : index
    %c0_19 = arith.constant 0 : index
    %29 = vector.load %arg10[%28, %c17, %c0_19] : memref<10x25x4xbf16, #tpu.memory_space<vmem>>, vector<4x8x4xbf16>
    %30 = arith.extf %29 : vector<4x8x4xbf16> to vector<4x8x4xf32>
    %c2 = arith.constant 2 : index
    %c0_20 = arith.constant 0 : index
    %c0_21 = arith.constant 0 : index
    %31 = vector.load %arg5[%c2, %c0_20, %c0_21] : memref<9x1x4xf32, #tpu.memory_space<vmem>>, vector<1x1x4xf32>
    %32 = vector.shape_cast %31 : vector<1x1x4xf32> to vector<1x4xf32>
    %33 = vector.shape_cast %32 : vector<1x4xf32> to vector<1x1x4xf32>
    %34 = vector.broadcast %33 : vector<1x1x4xf32> to vector<4x8x4xf32>
    %35 = arith.mulf %30, %34 : vector<4x8x4xf32>
    %c0_22 = arith.constant 0 : index
    %c0_23 = arith.constant 0 : index
    %c0_24 = arith.constant 0 : index
    %36 = vector.load %arg11[%c0_22, %c0_23, %c0_24] : memref<4x8x4xf32, #tpu.memory_space<vmem>>, vector<4x8x4xf32>
    %37 = arith.addf %36, %35 : vector<4x8x4xf32>
    %c0_25 = arith.constant 0 : index
    %c0_26 = arith.constant 0 : index
    %c0_27 = arith.constant 0 : index
    %38 = vector.load %arg11[%c0_25, %c0_26, %c0_27] : memref<4x8x4xf32, #tpu.memory_space<vmem>>, vector<4x8x4xf32>
    tpu.vector_store %arg11[%c0_25, %c0_26, %c0_27], %37 {strides = array<i32>} : memref<4x8x4xf32, #tpu.memory_space<vmem>>, vector<4x8x4xf32>,
    %c1_i32 = arith.constant 1 : i32
    %39 = arith.addi %4, %c1_i32 : i32
    %40 = arith.index_cast %39 : i32 to index
    %c15_28 = arith.constant 15 : index
    %c0_29 = arith.constant 0 : index
    %41 = vector.load %arg10[%40, %c15_28, %c0_29] : memref<10x25x4xbf16, #tpu.memory_space<vmem>>, vector<4x8x4xbf16>
    %42 = arith.extf %41 : vector<4x8x4xbf16> to vector<4x8x4xf32>
    %c3 = arith.constant 3 : index
    %c0_30 = arith.constant 0 : index
    %c0_31 = arith.constant 0 : index
    %43 = vector.load %arg5[%c3, %c0_30, %c0_31] : memref<9x1x4xf32, #tpu.memory_space<vmem>>, vector<1x1x4xf32>
    %44 = vector.shape_cast %43 : vector<1x1x4xf32> to vector<1x4xf32>
    %45 = vector.shape_cast %44 : vector<1x4xf32> to vector<1x1x4xf32>
    %46 = vector.broadcast %45 : vector<1x1x4xf32> to vector<4x8x4xf32>
    %47 = arith.mulf %42, %46 : vector<4x8x4xf32>
    %c0_32 = arith.constant 0 : index
    %c0_33 = arith.constant 0 : index
    %c0_34 = arith.constant 0 : index
    %48 = vector.load %arg11[%c0_32, %c0_33, %c0_34] : memref<4x8x4xf32, #tpu.memory_space<vmem>>, vector<4x8x4xf32>
    %49 = arith.addf %48, %47 : vector<4x8x4xf32>
    %c0_35 = arith.constant 0 : index
    %c0_36 = arith.constant 0 : index
    %c0_37 = arith.constant 0 : index
    %50 = vector.load %arg11[%c0_35, %c0_36, %c0_37] : memref<4x8x4xf32, #tpu.memory_space<vmem>>, vector<4x8x4xf32>
    tpu.vector_store %arg11[%c0_35, %c0_36, %c0_37], %49 {strides = array<i32>} : memref<4x8x4xf32, #tpu.memory_space<vmem>>, vector<4x8x4xf32>,
    %c1_i32_38 = arith.constant 1 : i32
    %51 = arith.addi %4, %c1_i32_38 : i32
    %52 = arith.index_cast %51 : i32 to index
    %c16_39 = arith.constant 16 : index
    %c0_40 = arith.constant 0 : index
    %53 = vector.load %arg10[%52, %c16_39, %c0_40] : memref<10x25x4xbf16, #tpu.memory_space<vmem>>, vector<4x8x4xbf16>
    %54 = arith.extf %53 : vector<4x8x4xbf16> to vector<4x8x4xf32>
    %c4 = arith.constant 4 : index
    %c0_41 = arith.constant 0 : index
    %c0_42 = arith.constant 0 : index
    %55 = vector.load %arg5[%c4, %c0_41, %c0_42] : memref<9x1x4xf32, #tpu.memory_space<vmem>>, vector<1x1x4xf32>
    %56 = vector.shape_cast %55 : vector<1x1x4xf32> to vector<1x4xf32>
    %57 = vector.shape_cast %56 : vector<1x4xf32> to vector<1x1x4xf32>
    %58 = vector.broadcast %57 : vector<1x1x4xf32> to vector<4x8x4xf32>
    %59 = arith.mulf %54, %58 : vector<4x8x4xf32>
    %c0_43 = arith.constant 0 : index
    %c0_44 = arith.constant 0 : index
    %c0_45 = arith.constant 0 : index
    %60 = vector.load %arg11[%c0_43, %c0_44, %c0_45] : memref<4x8x4xf32, #tpu.memory_space<vmem>>, vector<4x8x4xf32>
    %61 = arith.addf %60, %59 : vector<4x8x4xf32>
    %c0_46 = arith.constant 0 : index
    %c0_47 = arith.constant 0 : index
    %c0_48 = arith.constant 0 : index
    %62 = vector.load %arg11[%c0_46, %c0_47, %c0_48] : memref<4x8x4xf32, #tpu.memory_space<vmem>>, vector<4x8x4xf32>
    tpu.vector_store %arg11[%c0_46, %c0_47, %c0_48], %61 {strides = array<i32>} : memref<4x8x4xf32, #tpu.memory_space<vmem>>, vector<4x8x4xf32>,
    %c1_i32_49 = arith.constant 1 : i32
    %63 = arith.addi %4, %c1_i32_49 : i32
    %64 = arith.index_cast %63 : i32 to index
    %c17_50 = arith.constant 17 : index
    %c0_51 = arith.constant 0 : index
    %65 = vector.load %arg10[%64, %c17_50, %c0_51] : memref<10x25x4xbf16, #tpu.memory_space<vmem>>, vector<4x8x4xbf16>
    %66 = arith.extf %65 : vector<4x8x4xbf16> to vector<4x8x4xf32>
    %c5 = arith.constant 5 : index
    %c0_52 = arith.constant 0 : index
    %c0_53 = arith.constant 0 : index
    %67 = vector.load %arg5[%c5, %c0_52, %c0_53] : memref<9x1x4xf32, #tpu.memory_space<vmem>>, vector<1x1x4xf32>
    %68 = vector.shape_cast %67 : vector<1x1x4xf32> to vector<1x4xf32>
    %69 = vector.shape_cast %68 : vector<1x4xf32> to vector<1x1x4xf32>
    %70 = vector.broadcast %69 : vector<1x1x4xf32> to vector<4x8x4xf32>
    %71 = arith.mulf %66, %70 : vector<4x8x4xf32>
    %c0_54 = arith.constant 0 : index
    %c0_55 = arith.constant 0 : index
    %c0_56 = arith.constant 0 : index
    %72 = vector.load %arg11[%c0_54, %c0_55, %c0_56] : memref<4x8x4xf32, #tpu.memory_space<vmem>>, vector<4x8x4xf32>
    %73 = arith.addf %72, %71 : vector<4x8x4xf32>
    %c0_57 = arith.constant 0 : index
    %c0_58 = arith.constant 0 : index
    %c0_59 = arith.constant 0 : index
    %74 = vector.load %arg11[%c0_57, %c0_58, %c0_59] : memref<4x8x4xf32, #tpu.memory_space<vmem>>, vector<4x8x4xf32>
    tpu.vector_store %arg11[%c0_57, %c0_58, %c0_59], %73 {strides = array<i32>} : memref<4x8x4xf32, #tpu.memory_space<vmem>>, vector<4x8x4xf32>,
    %c2_i32 = arith.constant 2 : i32
    %75 = arith.addi %4, %c2_i32 : i32
    %76 = arith.index_cast %75 : i32 to index
    %c15_60 = arith.constant 15 : index
    %c0_61 = arith.constant 0 : index
    %77 = vector.load %arg10[%76, %c15_60, %c0_61] : memref<10x25x4xbf16, #tpu.memory_space<vmem>>, vector<4x8x4xbf16>
    %78 = arith.extf %77 : vector<4x8x4xbf16> to vector<4x8x4xf32>
    %c6 = arith.constant 6 : index
    %c0_62 = arith.constant 0 : index
    %c0_63 = arith.constant 0 : index
    %79 = vector.load %arg5[%c6, %c0_62, %c0_63] : memref<9x1x4xf32, #tpu.memory_space<vmem>>, vector<1x1x4xf32>
    %80 = vector.shape_cast %79 : vector<1x1x4xf32> to vector<1x4xf32>
    %81 = vector.shape_cast %80 : vector<1x4xf32> to vector<1x1x4xf32>
    %82 = vector.broadcast %81 : vector<1x1x4xf32> to vector<4x8x4xf32>
    %83 = arith.mulf %78, %82 : vector<4x8x4xf32>
    %c0_64 = arith.constant 0 : index
    %c0_65 = arith.constant 0 : index
    %c0_66 = arith.constant 0 : index
    %84 = vector.load %arg11[%c0_64, %c0_65, %c0_66] : memref<4x8x4xf32, #tpu.memory_space<vmem>>, vector<4x8x4xf32>
    %85 = arith.addf %84, %83 : vector<4x8x4xf32>
    %c0_67 = arith.constant 0 : index
    %c0_68 = arith.constant 0 : index
    %c0_69 = arith.constant 0 : index
    %86 = vector.load %arg11[%c0_67, %c0_68, %c0_69] : memref<4x8x4xf32, #tpu.memory_space<vmem>>, vector<4x8x4xf32>
    tpu.vector_store %arg11[%c0_67, %c0_68, %c0_69], %85 {strides = array<i32>} : memref<4x8x4xf32, #tpu.memory_space<vmem>>, vector<4x8x4xf32>,
    %c2_i32_70 = arith.constant 2 : i32
    %87 = arith.addi %4, %c2_i32_70 : i32
    %88 = arith.index_cast %87 : i32 to index
    %c16_71 = arith.constant 16 : index
    %c0_72 = arith.constant 0 : index
    %89 = vector.load %arg10[%88, %c16_71, %c0_72] : memref<10x25x4xbf16, #tpu.memory_space<vmem>>, vector<4x8x4xbf16>
    %90 = arith.extf %89 : vector<4x8x4xbf16> to vector<4x8x4xf32>
    %c7 = arith.constant 7 : index
    %c0_73 = arith.constant 0 : index
    %c0_74 = arith.constant 0 : index
    %91 = vector.load %arg5[%c7, %c0_73, %c0_74] : memref<9x1x4xf32, #tpu.memory_space<vmem>>, vector<1x1x4xf32>
    %92 = vector.shape_cast %91 : vector<1x1x4xf32> to vector<1x4xf32>
    %93 = vector.shape_cast %92 : vector<1x4xf32> to vector<1x1x4xf32>
    %94 = vector.broadcast %93 : vector<1x1x4xf32> to vector<4x8x4xf32>
    %95 = arith.mulf %90, %94 : vector<4x8x4xf32>
    %c0_75 = arith.constant 0 : index
    %c0_76 = arith.constant 0 : index
    %c0_77 = arith.constant 0 : index
    %96 = vector.load %arg11[%c0_75, %c0_76, %c0_77] : memref<4x8x4xf32, #tpu.memory_space<vmem>>, vector<4x8x4xf32>
    %97 = arith.addf %96, %95 : vector<4x8x4xf32>
    %c0_78 = arith.constant 0 : index
    %c0_79 = arith.constant 0 : index
    %c0_80 = arith.constant 0 : index
    %98 = vector.load %arg11[%c0_78, %c0_79, %c0_80] : memref<4x8x4xf32, #tpu.memory_space<vmem>>, vector<4x8x4xf32>
    tpu.vector_store %arg11[%c0_78, %c0_79, %c0_80], %97 {strides = array<i32>} : memref<4x8x4xf32, #tpu.memory_space<vmem>>, vector<4x8x4xf32>,
    %c2_i32_81 = arith.constant 2 : i32
    %99 = arith.addi %4, %c2_i32_81 : i32
    %100 = arith.index_cast %99 : i32 to index
    %c17_82 = arith.constant 17 : index
    %c0_83 = arith.constant 0 : index
    %101 = vector.load %arg10[%100, %c17_82, %c0_83] : memref<10x25x4xbf16, #tpu.memory_space<vmem>>, vector<4x8x4xbf16>
    %102 = arith.extf %101 : vector<4x8x4xbf16> to vector<4x8x4xf32>
    %c8 = arith.constant 8 : index
    %c0_84 = arith.constant 0 : index
    %c0_85 = arith.constant 0 : index
    %103 = vector.load %arg5[%c8, %c0_84, %c0_85] : memref<9x1x4xf32, #tpu.memory_space<vmem>>, vector<1x1x4xf32>
    %104 = vector.shape_cast %103 : vector<1x1x4xf32> to vector<1x4xf32>
    %105 = vector.shape_cast %104 : vector<1x4xf32> to vector<1x1x4xf32>
    %106 = vector.broadcast %105 : vector<1x1x4xf32> to vector<4x8x4xf32>
    %107 = arith.mulf %102, %106 : vector<4x8x4xf32>
    %c0_86 = arith.constant 0 : index
    %c0_87 = arith.constant 0 : index
    %c0_88 = arith.constant 0 : index
    %108 = vector.load %arg11[%c0_86, %c0_87, %c0_88] : memref<4x8x4xf32, #tpu.memory_space<vmem>>, vector<4x8x4xf32>
    %109 = arith.addf %108, %107 : vector<4x8x4xf32>
    %c0_89 = arith.constant 0 : index
    %c0_90 = arith.constant 0 : index
    %c0_91 = arith.constant 0 : index
    %110 = vector.load %arg11[%c0_89, %c0_90, %c0_91] : memref<4x8x4xf32, #tpu.memory_space<vmem>>, vector<4x8x4xf32>
    tpu.vector_store %arg11[%c0_89, %c0_90, %c0_91], %109 {strides = array<i32>} : memref<4x8x4xf32, #tpu.memory_space<vmem>>, vector<4x8x4xf32>,
    %c0_92 = arith.constant 0 : index
    %c0_93 = arith.constant 0 : index
    %c0_94 = arith.constant 0 : index
    %111 = vector.load %arg11[%c0_92, %c0_93, %c0_94] : memref<4x8x4xf32, #tpu.memory_space<vmem>>, vector<4x8x4xf32>
    %112 = vector.shape_cast %111 : vector<4x8x4xf32> to vector<32x4xf32>
    %113 = arith.truncf %112 : vector<32x4xf32> to vector<32x4xbf16>
    %c0_95 = arith.constant 0 : index
    %c0_96 = arith.constant 0 : index
    %114 = vector.load %arg6[%c0_95, %c0_96] : memref<4x8xbf16, #tpu.memory_space<vmem>>, vector<4x8xbf16>
    %cst = arith.constant dense<0.000000e+00> : vector<32x8xf32>
    %115 = tpu.matmul %113, %114, %cst {dimension_numbers = #tpu.dot_dimension_numbers<[1], [0], [0], [1], [0, 0, 1, 1], [], []>} : vector<32x4xbf16>, vector<4x8xbf16>, vector<32x8xf32> -> vector<32x8xf32>
    %c0_97 = arith.constant 0 : index
    %c0_98 = arith.constant 0 : index
    %116 = vector.load %arg12[%c0_97, %c0_98] : memref<32x8xf32, #tpu.memory_space<vmem>>, vector<32x8xf32>
    tpu.vector_store %arg12[%c0_97, %c0_98], %115 {strides = array<i32>} : memref<32x8xf32, #tpu.memory_space<vmem>>, vector<32x8xf32>,
    %c0_99 = arith.constant 0 : index
    %c0_100 = arith.constant 0 : index
    %117 = vector.load %arg12[%c0_99, %c0_100] : memref<32x8xf32, #tpu.memory_space<vmem>>, vector<32x8xf32>
    %118 = arith.truncf %117 : vector<32x8xf32> to vector<32x8xbf16>
    %c0_101 = arith.constant 0 : index
    %c0_102 = arith.constant 0 : index
    %c0_103 = arith.constant 0 : index
    %119 = vector.load %arg7[%c0_101, %c0_102, %c0_103] : memref<1x32x8xbf16, #tpu.memory_space<vmem>>, vector<1x32x8xbf16>
    %120 = vector.shape_cast %119 : vector<1x32x8xbf16> to vector<32x8xbf16>
    %121 = vector.shape_cast %118 : vector<32x8xbf16> to vector<1x32x8xbf16>
    tpu.vector_store %arg7[%c0_101, %c0_102, %c0_103], %121 {strides = array<i32>} : memref<1x32x8xbf16, #tpu.memory_space<vmem>>, vector<1x32x8xbf16>,
    %c0_104 = arith.constant 0 : index
    %c0_105 = arith.constant 0 : index
    %122 = vector.load %arg12[%c0_104, %c0_105] : memref<32x8xf32, #tpu.memory_space<vmem>>, vector<32x8xf32>
    %cst_106 = arith.constant dense<0.000000e+00> : vector<8xf32>
    %123 = vector.multi_reduction <add>, %122, %cst_106 [0] : vector<32x8xf32> to vector<8xf32>
    %c0_107 = arith.constant 0 : index
    %c0_108 = arith.constant 0 : index
    %c0_109 = arith.constant 0 : index
    %c0_110 = arith.constant 0 : index
    %124 = vector.load %arg8[%c0_107, %c0_108, %c0_109, %c0_110] : memref<1x1x1x8xf32, #tpu.memory_space<vmem>>, vector<1x1x1x8xf32>
    %125 = vector.shape_cast %124 : vector<1x1x1x8xf32> to vector<8xf32>
    %126 = vector.shape_cast %123 : vector<8xf32> to vector<1x1x1x8xf32>
    tpu.vector_store %arg8[%c0_107, %c0_108, %c0_109, %c0_110], %126 {strides = array<i32>} : memref<1x1x1x8xf32, #tpu.memory_space<vmem>>, vector<1x1x1x8xf32>,
    %c0_111 = arith.constant 0 : index
    %c0_112 = arith.constant 0 : index
    %127 = vector.load %arg12[%c0_111, %c0_112] : memref<32x8xf32, #tpu.memory_space<vmem>>, vector<32x8xf32>
    %c0_113 = arith.constant 0 : index
    %c0_114 = arith.constant 0 : index
    %128 = vector.load %arg12[%c0_113, %c0_114] : memref<32x8xf32, #tpu.memory_space<vmem>>, vector<32x8xf32>
    %129 = arith.mulf %127, %128 : vector<32x8xf32>
    %cst_115 = arith.constant dense<0.000000e+00> : vector<8xf32>
    %130 = vector.multi_reduction <add>, %129, %cst_115 [0] : vector<32x8xf32> to vector<8xf32>
    %c0_116 = arith.constant 0 : index
    %c0_117 = arith.constant 0 : index
    %c0_118 = arith.constant 0 : index
    %c0_119 = arith.constant 0 : index
    %131 = vector.load %arg9[%c0_116, %c0_117, %c0_118, %c0_119] : memref<1x1x1x8xf32, #tpu.memory_space<vmem>>, vector<1x1x1x8xf32>
    %132 = vector.shape_cast %131 : vector<1x1x1x8xf32> to vector<8xf32>
    %133 = vector.shape_cast %130 : vector<8xf32> to vector<1x1x1x8xf32>
    tpu.vector_store %arg9[%c0_116, %c0_117, %c0_118, %c0_119], %133 {strides = array<i32>} : memref<1x1x1x8xf32, #tpu.memory_space<vmem>>, vector<1x1x1x8xf32>,
    return
  }
  func.func @transform_0(%arg0: i32, %arg1: i32) -> (i32, i32, i32, i32) {
    %c0_i32 = arith.constant 0 : i32
    %c0_i32_0 = arith.constant 0 : i32
    %c0_i32_1 = arith.constant 0 : i32
    %c0_i32_2 = arith.constant 0 : i32
    return %arg0, %c0_i32, %c0_i32_0, %c0_i32_1 : i32, i32, i32, i32
  }
  func.func @transform_1(%arg0: i32, %arg1: i32) -> (i32, i32, i32) {
    %c0_i32 = arith.constant 0 : i32
    %c0_i32_0 = arith.constant 0 : i32
    %c0_i32_1 = arith.constant 0 : i32
    %c0_i32_2 = arith.constant 0 : i32
    return %c0_i32, %c0_i32_0, %c0_i32_1 : i32, i32, i32
  }
  func.func @transform_2(%arg0: i32, %arg1: i32) -> (i32, i32, i32) {
    %c0_i32 = arith.constant 0 : i32
    %c0_i32_0 = arith.constant 0 : i32
    %c0_i32_1 = arith.constant 0 : i32
    %c0_i32_2 = arith.constant 0 : i32
    return %c0_i32, %c0_i32_0, %c0_i32_1 : i32, i32, i32
  }
  func.func @transform_3(%arg0: i32, %arg1: i32) -> (i32, i32, i32) {
    %c0_i32 = arith.constant 0 : i32
    %c0_i32_0 = arith.constant 0 : i32
    %c0_i32_1 = arith.constant 0 : i32
    %c0_i32_2 = arith.constant 0 : i32
    return %c0_i32, %c0_i32_0, %c0_i32_1 : i32, i32, i32
  }
  func.func @transform_4(%arg0: i32, %arg1: i32) -> (i32, i32) {
    %c0_i32 = arith.constant 0 : i32
    %c0_i32_0 = arith.constant 0 : i32
    %c0_i32_1 = arith.constant 0 : i32
    return %c0_i32, %c0_i32_0 : i32, i32
  }
  func.func @transform_5(%arg0: i32, %arg1: i32) -> (i32, i32, i32) {
    %c0_i32 = arith.constant 0 : i32
    %c0_i32_0 = arith.constant 0 : i32
    return %arg0, %arg1, %c0_i32 : i32, i32, i32
  }
  func.func @transform_6(%arg0: i32, %arg1: i32) -> (i32, i32, i32, i32) {
    %c0_i32 = arith.constant 0 : i32
    %c0_i32_0 = arith.constant 0 : i32
    %c0_i32_1 = arith.constant 0 : i32
    return %arg0, %arg1, %c0_i32, %c0_i32_0 : i32, i32, i32, i32
  }
  func.func @transform_7(%arg0: i32, %arg1: i32) -> (i32, i32, i32, i32) {
    %c0_i32 = arith.constant 0 : i32
    %c0_i32_0 = arith.constant 0 : i32
    %c0_i32_1 = arith.constant 0 : i32
    return %arg0, %arg1, %c0_i32, %c0_i32_0 : i32, i32, i32, i32
  }
}

module attributes {stable_mosaic.version = 11 : i64} {
  func.func @bn_apply_kernel(%arg0: i32, %arg1: i32, %arg2: memref<1x64x8xbf16, #tpu.memory_space<vmem>>, %arg3: memref<1x1x8xf32, #tpu.memory_space<vmem>>, %arg4: memref<1x1x8xf32, #tpu.memory_space<vmem>>, %arg5: memref<1x8x64xf32, #tpu.memory_space<vmem>>) attributes {dimension_semantics = [#tpu.dimension_semantics<parallel>, #tpu.dimension_semantics<parallel>], iteration_bounds = array<i64: 2, 1>, scalar_prefetch = 0 : i64, scratch_operands = 0 : i64, tpu.core_type = #tpu.core_type<tc>, window_params = [{transform_indices = @transform_0, window_bounds = array<i64: 1, 64, 8>}, {pipeline_mode = #tpu.pipeline_mode<synchronous>, transform_indices = @transform_1, window_bounds = array<i64: 1, 1, 8>}, {pipeline_mode = #tpu.pipeline_mode<synchronous>, transform_indices = @transform_2, window_bounds = array<i64: 1, 1, 8>}, {transform_indices = @transform_3, window_bounds = array<i64: 1, 8, 64>}]} {
    %c0 = arith.constant 0 : index
    %c0_0 = arith.constant 0 : index
    %c0_1 = arith.constant 0 : index
    %0 = vector.load %arg2[%c0, %c0_0, %c0_1] : memref<1x64x8xbf16, #tpu.memory_space<vmem>>, vector<1x64x8xbf16>
    %1 = vector.shape_cast %0 : vector<1x64x8xbf16> to vector<64x8xbf16>
    %2 = arith.extf %1 : vector<64x8xbf16> to vector<64x8xf32>
    %c0_2 = arith.constant 0 : index
    %c0_3 = arith.constant 0 : index
    %c0_4 = arith.constant 0 : index
    %3 = vector.load %arg3[%c0_2, %c0_3, %c0_4] : memref<1x1x8xf32, #tpu.memory_space<vmem>>, vector<1x1x8xf32>
    %4 = vector.shape_cast %3 : vector<1x1x8xf32> to vector<1x8xf32>
    %5 = vector.broadcast %4 : vector<1x8xf32> to vector<64x8xf32>
    %6 = arith.mulf %2, %5 : vector<64x8xf32>
    %c0_5 = arith.constant 0 : index
    %c0_6 = arith.constant 0 : index
    %c0_7 = arith.constant 0 : index
    %7 = vector.load %arg4[%c0_5, %c0_6, %c0_7] : memref<1x1x8xf32, #tpu.memory_space<vmem>>, vector<1x1x8xf32>
    %8 = vector.shape_cast %7 : vector<1x1x8xf32> to vector<1x8xf32>
    %9 = vector.broadcast %8 : vector<1x8xf32> to vector<64x8xf32>
    %10 = arith.addf %6, %9 : vector<64x8xf32>
    %11 = tpu.transpose %10, [1, 0] : vector<64x8xf32> -> vector<8x64xf32>
    %c0_8 = arith.constant 0 : index
    %c0_9 = arith.constant 0 : index
    %c0_10 = arith.constant 0 : index
    %12 = vector.load %arg5[%c0_8, %c0_9, %c0_10] : memref<1x8x64xf32, #tpu.memory_space<vmem>>, vector<1x8x64xf32>
    %13 = vector.shape_cast %12 : vector<1x8x64xf32> to vector<8x64xf32>
    %14 = vector.shape_cast %11 : vector<8x64xf32> to vector<1x8x64xf32>
    tpu.vector_store %arg5[%c0_8, %c0_9, %c0_10], %14 {strides = array<i32>} : memref<1x8x64xf32, #tpu.memory_space<vmem>>, vector<1x8x64xf32>,
    return
  }
  func.func @transform_0(%arg0: i32, %arg1: i32) -> (i32, i32, i32) {
    %c0_i32 = arith.constant 0 : i32
    %c0_i32_0 = arith.constant 0 : i32
    return %arg0, %arg1, %c0_i32 : i32, i32, i32
  }
  func.func @transform_1(%arg0: i32, %arg1: i32) -> (i32, i32, i32) {
    %c0_i32 = arith.constant 0 : i32
    %c0_i32_0 = arith.constant 0 : i32
    %c0_i32_1 = arith.constant 0 : i32
    %c0_i32_2 = arith.constant 0 : i32
    return %c0_i32, %c0_i32_0, %c0_i32_1 : i32, i32, i32
  }
  func.func @transform_2(%arg0: i32, %arg1: i32) -> (i32, i32, i32) {
    %c0_i32 = arith.constant 0 : i32
    %c0_i32_0 = arith.constant 0 : i32
    %c0_i32_1 = arith.constant 0 : i32
    %c0_i32_2 = arith.constant 0 : i32
    return %c0_i32, %c0_i32_0, %c0_i32_1 : i32, i32, i32
  }
  func.func @transform_3(%arg0: i32, %arg1: i32) -> (i32, i32, i32) {
    %c0_i32 = arith.constant 0 : i32
    %c0_i32_0 = arith.constant 0 : i32
    return %arg0, %c0_i32, %arg1 : i32, i32, i32
  }
}

</mosaic_0001>

<bundles_post_ra>
// kernel: sepconv_forward.5
= control target key start
LH: loop header
LB: loop body
LE: loop exit
PB: predicated region body
PF: predicated region fallthrough
CT: control target
= control target key end

     0   :  { %s463_s12 = smov 0   ;;  %s465_s13 = smov 0   ;;  %s506_s0 = inlined_call_operand.vmem [shape: bf16[2,64,8], index: 0, kind: input, shape index: {}]   ;;  %s507_s1 = inlined_call_operand.vmem [shape: f32[1,1,8], index: 1, kind: input, shape index: {}]   ;;  %s508_s2 = inlined_call_operand.vmem [shape: f32[1,1,8], index: 2, kind: input, shape index: {}]   ;;  %s509_s3 = inlined_call_operand.vmem [shape: f32[2,8,64], index: 3, kind: output, shape index: {}]  }
   0x1   :  { %s467_s14 = smov 0  }
   0x2 LB: > { %s25_s15 = sadd.s32 1, %s437_s13  ;;  %p366_p0 = scmp.ge.s32.totalorder %s441_s14, 1  ;;  %s441_s14 = sphi %s467_s14, %s13_s14   ;;  %s437_s13 = sphi %s465_s13, %s511_s13   ;;  %s433_s12 = sphi %s463_s12, %s510_s12  }
   0x3   : > { %p27_p1 = scmp.ge.s32.totalorder %s25_s15, 2  ;;  %p158_p2 = scmp.lt.s32.totalorder %s441_s14, 3 }
   0x5   : > { %s513_s15 = smov (%p27_p1, %s25_s15), 0  ;;  %p159_p3 = pnand %p366_p0, %p158_p2 }
   0x6   : > { %p189_p4 = scmp.lt.s32.totalorder (!%p159_p3), %s433_s12, 1  ;;  %v370_v1 = vld [vmem:[%s507_s1] ss:$0 sm:$0xff] (!%p159_p3)  ;;  %vm283_vm0 = vcmask (!%p159_p3), 523264  }
   0x7   : > { %162 = sbr.rel (%p159_p3) target bundleno = 154 (0x9a), region = 32  ;;  %v371_v5 = vld [vmem:[%s508_s2] ss:$0 sm:$0xff] (!%p159_p3) }
   0xe   : > { %s515_s12 = smov (!%p189_p4, %s433_s12), 1 }
   0xf   : > { %s374_s16 = sshll.u32 %s515_s12, 5  ;;  %s369_s24 = sshll.u32 %s515_s12, 3 }
  0x10   : > { %s196_s19 = scalar_lea.vmem %s506_s0, %s374_s16  ;;  %s204_s27 = scalar_lea.vmem %s509_s3, %s369_s24 }
  0x11   : > { %v376_v0 = vld [vmem:[%s196_s19] sm:$0xff]   ;;  %v391_v2 = vld [vmem:[%s196_s19 + $0x8] sm:$0xff]   ;;  %v392_v13 = vld [vmem:[%s196_s19 + $0x10] sm:$0xff]  }
  0x12   : > { %v377_v3 = vunpack.c.l.bf16 %v376_v0  ;;  %v378_v4 = vunpack.c.h.bf16 %v376_v0  ;;  %v381_v8 = vunpack.c.l.bf16 %v391_v2  ;;  %v382_v12 = vunpack.c.h.bf16 %v391_v2  ;;  %v393_v20 = vld [vmem:[%s196_s19 + $0x18] sm:$0xff]  }
  0x13   : > { %v385_v16 = vunpack.c.l.bf16 %v392_v13  ;;  %v386_v19 = vunpack.c.h.bf16 %v392_v13  ;;  %v389_v23 = vunpack.c.l.bf16 %v393_v20  ;;  %v390_v26 = vunpack.c.h.bf16 %v393_v20 }
  0x14   : > { %v228_v6 = vmul.f32 %v377_v3, %v370_v1  ;;  %v229_v7 = vmul.f32 %v378_v4, %v370_v1  ;;  %v230_v11 = vmul.f32 %v381_v8, %v370_v1  ;;  %v231_v15 = vmul.f32 %v382_v12, %v370_v1 }
  0x15   : > { %v232_v18 = vmul.f32 %v385_v16, %v370_v1  ;;  %v233_v22 = vmul.f32 %v386_v19, %v370_v1  ;;  %v234_v25 = vmul.f32 %v389_v23, %v370_v1  ;;  %v235_v28 = vmul.f32 %v390_v26, %v370_v1 }
  0x16   : > { %v243_v9 = vadd.f32 %v371_v5, %v228_v6  ;;  %v244_v10 = vadd.f32 %v371_v5, %v229_v7  ;;  %v245_v14 = vadd.f32 %v371_v5, %v230_v11  ;;  %v246_v17 = vadd.f32 %v371_v5, %v231_v15 }
  0x17   : > { %v247_v21 = vadd.f32 %v371_v5, %v232_v18  ;;  %v248_v24 = vadd.f32 %v371_v5, %v233_v22  ;;  %v249_v27 = vadd.f32 %v371_v5, %v234_v25  ;;  %v250_v29 = vadd.f32 %v371_v5, %v235_v28 }
  0x18   : > { %251 = vxpose.xlu0.b32.start [1/8] (short) (narrow) %v243_v9, 8 }
  0x1c   : > { %252 = vxpose.xlu0.b32.cont [2/8] (short) (narrow) %v244_v10, 8 }
  0x20   : > { %253 = vxpose.xlu0.b32.cont [3/8] (short) (narrow) %v245_v14, 8 }
  0x24   : > { %254 = vxpose.xlu0.b32.cont [4/8] (short) (narrow) %v246_v17, 8 }
  0x28   : > { %255 = vxpose.xlu0.b32.cont [5/8] (short) (narrow) %v247_v21, 8 }
  0x2c   : > { %256 = vxpose.xlu0.b32.cont [6/8] (short) (narrow) %v248_v24, 8 }
  0x30   : > { %257 = vxpose.xlu0.b32.cont [7/8] (short) (narrow) %v249_v27, 8 }
  0x34   : > { %258 = vxpose.xlu0.b32.end [8/8] (short) (narrow) %v250_v29, 8 }
  0x98   : > { %v267_v30 = vpop.trf.xlu0 }
  0x99   : > { %284 = vst.msk [vmem:[%s204_s27] sm:$0xff] %vm283_vm0, %v267_v30 }
  0x9a PF: > { %s13_s14 = sadd.s32 1, %s441_s14   ;;  %s510_s12 = smov %s437_s13 }
  0x9b   : > { %p10_p5 = scmp.ge.s32.totalorder %s13_s14, 4   ;;  %s511_s13 = smov %s513_s15 }
  0x9d   :  { %12 = sbr.rel (!%p10_p5) target bundleno = 2 (0x2), region = 62 }

// kernel: sepconv_forward.4
= control target key start
LH: loop header
LB: loop body
LE: loop exit
PB: predicated region body
PF: predicated region fallthrough
CT: control target
= control target key end

     0   :  { %s1535_s24 = smov 0   ;;  %s1537_s25 = smov 0   ;;  %s1939_s0 = inlined_call_operand.vmem [shape: bf16[2,8,8,4], index: 0, kind: input, shape index: {}]   ;;  %s1940_s1 = inlined_call_operand.vmem [shape: f32[1,1,4], index: 1, kind: input, shape index: {}]   ;;  %s1941_s2 = inlined_call_operand.vmem [shape: f32[1,1,4], index: 2, kind: input, shape index: {}]   ;;  %s1942_s3 = inlined_call_operand.vmem [shape: f32[9,1,4], index: 3, kind: input, shape index: {}]   ;;  %s1943_s4 = inlined_call_operand.vmem [shape: bf16[4,8], index: 4, kind: input, shape index: {}]   ;;  %s1944_s5 = inlined_call_operand.vmem [shape: bf16[2,64,8], index: 5, kind: output, shape index: {0}]   ;;  %s1945_s6 = inlined_call_operand.vmem [shape: f32[2,2,1,8], index: 6, kind: output, shape index: {1}]   ;;  %s1946_s7 = inlined_call_operand.vmem [shape: f32[2,2,1,8], index: 7, kind: output, shape index: {2}]  }
   0x1   :  { %s1539_s26 = smov 0   ;;  %s1541_s27 = smov 0  }
   0x2   :  { %s1543_s28 = smov 0  }
   0x3 LB: > { %s27_s29 = sadd.s32 1, %s1484_s26  ;;  %s30_s30 = sadd.s32 1, %s1488_s27  ;;  %s1492_s28 = sphi %s1543_s28, %s18_s28   ;;  %s1488_s27 = sphi %s1541_s27, %s1956_s27   ;;  %s1484_s26 = sphi %s1539_s26, %s1955_s26   ;;  %s1480_s25 = sphi %s1537_s25, %s1954_s25   ;;  %s1476_s24 = sphi %s1535_s24, %s1953_s24  }
   0x4   : > { %p28_p0 = scmp.ge.s32.totalorder %s27_s29, 2  ;;  %p1292_p1 = scmp.ge.s32.totalorder %s1492_s28, 1 }
   0x5   : > { %p260_p2 = scmp.lt.s32.totalorder %s1492_s28, 5 }
   0x6   : > { %s1958_s29 = smov (%p28_p0, %s27_s29), 0  ;;  %s1960_s30 = smov (!%p28_p0, %s30_s30), %s1488_s27 }
   0x7   : > { %p261_p3 = pnand %p1292_p1, %p260_p2  ;;  %p32_p4 = scmp.ge.s32.totalorder %s1960_s30, 2 }
   0x8   : > { %p310_p5 = scmp.lt.s32.totalorder (!%p261_p3), %s1480_s25, 1  ;;  %s1295_s8 = sshll.u32 (!%p261_p3), %s1476_s24, 2 }
   0x9   : > { %s1962_s30 = smov (%p32_p4, %s1960_s30), 0  ;;  %264 = sbr.rel (%p261_p3) target bundleno = 408 (0x198), region = 40 }
   0xa   : > { %1947 = sst [smem:[#allocation5_spill]] %s1962_s30  ;;  %p318_p6 = scmp.lt.s32.totalorder (!%p261_p3), %s1295_s8, 7 }
   0xb   : > { %p327_p7 = scmp.lt.s32.totalorder (!%p261_p3), %s1476_s24, 1  ;;  %p1300_p8 = scmp.ne.s32.totalorder (!%p261_p3), %s1476_s24, 0 }
  0x10   : > { %s1964_s25 = smov (!%p310_p5, %s1480_s25), 1  ;;  %s1966_s8 = smov (!%p318_p6, %s1295_s8), 7 }
  0x11   : > { %s1375_s9 = sshll.u32 %s1964_s25, 5  ;;  %s1296_s10 = sshll.u32 %s1964_s25, 3  ;;  %vm344_vm0 = vcmask (!%p1300_p8), 27648   ;;  %vm348_vm1 = vcmask (!%p1300_p8), 24576   ;;  %vm349_vm2 = vsmask.f32 (!%p1300_p8), 256 }
  0x12   : > { %s1572_s13 = scalar_lea.vmem %s1939_s0, %s1375_s9  ;;  %s321_s14 = sadd.s32 %s1296_s10, %s1966_s8  ;;  %v1494_v0 = vmov (!%p1300_p8), 0   ;;  %vm1597_vm3 = vmand (!%p1300_p8), %vm348_vm1, %vm349_vm2  ;;  %v351_v2 = vld [vmem:[#allocation2 + $0xc] sm:$0x1] (!%p1300_p8)  ;;  %v358_v3 = vld [vmem:[#allocation2 + $0x9c] sm:$0x1] (!%p1300_p8)  ;;  %vm362_vm4 = vcmask (!%p1300_p8), 27651  }
  0x13   : > { %s1297_s15 = sshll.u32 %s321_s14, 2  ;;  %s1298_s19 = sshll.u32 %s1964_s25, 1  ;;  %345 = vst.msk [vmem:[#allocation2] sm:$0xf] (!%p1300_p8), %vm344_vm0, %v1494_v0  ;;  %346 = vst.msk [vmem:[#allocation2 + $0x4] sm:$0xf] (!%p1300_p8), %vm344_vm0, %v1494_v0 }
  0x14   : > { %s1577_s18 = scalar_lea.vmem %s1944_s5, %s1297_s15  ;;  %343 = sbr.rel (%p1300_p8) target bundleno = 50 (0x32), region = 44  ;;  %347 = vst.msk [vmem:[#allocation2 + $0x8] sm:$0xf] (!%p1300_p8), %vm344_vm0, %v1494_v0  ;;  %355 = vst.msk [vmem:[#allocation2 + $0x90] sm:$0xf] (!%p1300_p8), %vm344_vm0, %v1494_v0  ;;  %v352_v4 = vsel (!%p1300_p8), %vm1597_vm3, 0, %v351_v2 }
  0x15   : > { %s328_s20 = scalar_select %p327_p7, %s1476_s24, 1 }
  0x16   : > { %356 = vst.msk [vmem:[#allocation2 + $0x94] sm:$0xf] (!%p1300_p8), %vm344_vm0, %v1494_v0  ;;  %357 = vst.msk [vmem:[#allocation2 + $0x98] sm:$0xf] (!%p1300_p8), %vm344_vm0, %v1494_v0  ;;  %v359_v5 = vsel (!%p1300_p8), %vm1597_vm3, 0, %v358_v3  ;;  %v1606_v7 = vld [vmem:[%s1572_s13] sm:$0xff] (!%p1300_p8)  }
  0x17   : > { %s1580_s21 = sadd.s32 %s1298_s19, %s328_s20  ;;  %vm363_vm5 = vsmask.f32 (!%p1300_p8), 7950  ;;  %v365_v6 = vld [vmem:[#allocation2 + $0x14] sm:$0x8] (!%p1300_p8)  ;;  %353 = vst [vmem:[#allocation2 + $0xc] sm:$0x1] (!%p1300_p8), %v352_v4  ;;  %v1386_v28 = vunpack.c.l.bf16 (!%p1300_p8), %v1606_v7  ;;  %v1387_v29 = vunpack.c.h.bf16 (!%p1300_p8), %v1606_v7 }
  0x18   : > { %s331_s30 = scalar_lea.vmem %s1945_s6, %s1580_s21  ;;  %s338_s8 = scalar_lea.vmem %s1946_s7, %s1580_s21  ;;  %360 = vst [vmem:[#allocation2 + $0x9c] sm:$0x1] (!%p1300_p8), %v359_v5  ;;  %vm1608_vm6 = vmand (!%p1300_p8), %vm362_vm4, %vm363_vm5  ;;  %v368_v9 = vld [vmem:[#allocation2 + $0x24] sm:$0x8] (!%p1300_p8)  ;;  %v371_v10 = vld [vmem:[#allocation2 + $0x34] sm:$0x8] (!%p1300_p8) }
  0x19   : > { %v366_v11 = vsel (!%p1300_p8), %vm1608_vm6, 0, %v365_v6  ;;  %v369_v12 = vsel (!%p1300_p8), %vm1608_vm6, 0, %v368_v9  ;;  %v372_v13 = vsel (!%p1300_p8), %vm1608_vm6, 0, %v371_v10  ;;  %v374_v14 = vld [vmem:[#allocation2 + $0x44] sm:$0x8] (!%p1300_p8)  ;;  %v1400_v15 = vld [vmem:[%s1572_s13 + $0x8] sm:$0xff] (!%p1300_p8)  }
  0x1a   : > { %367 = vst [vmem:[#allocation2 + $0x14] sm:$0x8] (!%p1300_p8), %v366_v11  ;;  %370 = vst [vmem:[#allocation2 + $0x24] sm:$0x8] (!%p1300_p8), %v369_v12  ;;  %v375_v16 = vsel (!%p1300_p8), %vm1608_vm6, 0, %v374_v14  ;;  %v1401_v19 = vld [vmem:[%s1572_s13 + $0x10] sm:$0xff] (!%p1300_p8)   ;;  %v1390_v34 = vunpack.c.l.bf16 (!%p1300_p8), %v1400_v15  ;;  %v1391_v35 = vunpack.c.h.bf16 (!%p1300_p8), %v1400_v15 }
  0x1b   : > { %373 = vst [vmem:[#allocation2 + $0x34] sm:$0x8] %v372_v13  ;;  %v377_v17 = vld [vmem:[#allocation2 + $0x54] sm:$0x8]  ;;  %v380_v18 = vld [vmem:[#allocation2 + $0x64] sm:$0x8]  ;;  %v1394_v40 = vunpack.c.l.bf16 %v1401_v19  ;;  %v1395_v41 = vunpack.c.h.bf16 %v1401_v19 }
  0x1c   : > { %376 = vst [vmem:[#allocation2 + $0x44] sm:$0x8] %v375_v16  ;;  %v378_v20 = vsel %vm1608_vm6, 0, %v377_v17  ;;  %v381_v21 = vsel %vm1608_vm6, 0, %v380_v18  ;;  %v383_v22 = vld [vmem:[#allocation2 + $0x74] sm:$0x8] }
  0x1d   : > { %v386_v23 = vld [vmem:[#allocation2 + $0x84] sm:$0x8]  ;;  %379 = vst [vmem:[#allocation2 + $0x54] sm:$0x8] %v378_v20  ;;  %382 = vst [vmem:[#allocation2 + $0x64] sm:$0x8] %v381_v21 }
  0x1e   : > { %v384_v24 = vsel %vm1608_vm6, 0, %v383_v22  ;;  %v387_v25 = vsel %vm1608_vm6, 0, %v386_v23  ;;  %v389_v26 = vld [vmem:[#allocation2 + $0x1c] sm:$0x1]  ;;  %v392_v27 = vld [vmem:[#allocation2 + $0x2c] sm:$0x1] }
  0x1f   : > { %385 = vst [vmem:[#allocation2 + $0x74] sm:$0x8] %v384_v24  ;;  %388 = vst [vmem:[#allocation2 + $0x84] sm:$0x8] %v387_v25  ;;  %v390_v30 = vsel %vm1597_vm3, 0, %v389_v26  ;;  %v393_v31 = vsel %vm1597_vm3, 0, %v392_v27 }
  0x20   : > { %v395_v32 = vld [vmem:[#allocation2 + $0x3c] sm:$0x1]  ;;  %v398_v33 = vld [vmem:[#allocation2 + $0x4c] sm:$0x1]  ;;  %391 = vst [vmem:[#allocation2 + $0x1c] sm:$0x1] %v390_v30 }
  0x21   : > { %394 = vst [vmem:[#allocation2 + $0x2c] sm:$0x1] %v393_v31  ;;  %v396_v36 = vsel %vm1597_vm3, 0, %v395_v32  ;;  %v399_v37 = vsel %vm1597_vm3, 0, %v398_v33  ;;  %v401_v38 = vld [vmem:[#allocation2 + $0x5c] sm:$0x1] }
  0x22   : > { %v404_v39 = vld [vmem:[#allocation2 + $0x6c] sm:$0x1]  ;;  %397 = vst [vmem:[#allocation2 + $0x3c] sm:$0x1] %v396_v36  ;;  %400 = vst [vmem:[#allocation2 + $0x4c] sm:$0x1] %v399_v37 }
  0x23   : > { %v402_v42 = vsel %vm1597_vm3, 0, %v401_v38  ;;  %v405_v43 = vsel %vm1597_vm3, 0, %v404_v39  ;;  %v407_v44 = vld [vmem:[#allocation2 + $0x7c] sm:$0x1]  ;;  %v410_v45 = vld [vmem:[#allocation2 + $0x8c] sm:$0x1] }
  0x24   : > { %403 = vst [vmem:[#allocation2 + $0x5c] sm:$0x1] %v402_v42  ;;  %406 = vst [vmem:[#allocation2 + $0x6c] sm:$0x1] %v405_v43  ;;  %v408_v46 = vsel %vm1597_vm3, 0, %v407_v44  ;;  %v411_v47 = vsel %vm1597_vm3, 0, %v410_v45 }
  0x25   : > { %v1301_v48 = vld [vmem:[%s1940_s1] ss:$0 sm:$0xff]  ;;  %409 = vst [vmem:[#allocation2 + $0x7c] sm:$0x1] %v408_v46  ;;  %412 = vst [vmem:[#allocation2 + $0x8c] sm:$0x1] %v411_v47 }
  0x26   : > { %v1302_v49 = vld [vmem:[%s1941_s2] ss:$0 sm:$0xff]  ;;  %v436_v50 = vmul.f32 %v1386_v28, %v1301_v48  ;;  %v437_v51 = vmul.f32 %v1387_v29, %v1301_v48  ;;  %v438_v52 = vmul.f32 %v1390_v34, %v1301_v48  ;;  %v439_v53 = vmul.f32 %v1391_v35, %v1301_v48  ;;  %v1402_v54 = vld [vmem:[%s1572_s13 + $0x18] sm:$0xff]  }
  0x27   : > { %v440_v55 = vmul.f32 %v1394_v40, %v1301_v48  ;;  %v441_v56 = vmul.f32 %v1395_v41, %v1301_v48  ;;  %v1398_v57 = vunpack.c.l.bf16 %v1402_v54  ;;  %v1399_v58 = vunpack.c.h.bf16 %v1402_v54 }
  0x28   : > { %v451_v59 = vadd.f32 %v1302_v49, %v436_v50  ;;  %v452_v60 = vadd.f32 %v1302_v49, %v437_v51  ;;  %v453_v61 = vadd.f32 %v1302_v49, %v438_v52  ;;  %v454_v62 = vadd.f32 %v1302_v49, %v439_v53 }
  0x29   : > { %v455_v63 = vadd.f32 %v1302_v49, %v440_v55  ;;  %v456_v0 = vadd.f32 %v1302_v49, %v441_v56  ;;  %v442_v1 = vmul.f32 %v1398_v57, %v1301_v48  ;;  %v443_v2 = vmul.f32 %v1399_v58, %v1301_v48 }
  0x2a   : > { %v459_v3 = vmax.f32 %v451_v59, 0.0  ;;  %v460_v4 = vmax.f32 %v452_v60, 0.0  ;;  %v461_v5 = vmax.f32 %v453_v61, 0.0  ;;  %v462_v6 = vmax.f32 %v454_v62, 0.0 }
  0x2b   : > { %v463_v7 = vmax.f32 %v455_v63, 0.0  ;;  %v464_v8 = vmax.f32 %v456_v0, 0.0  ;;  %v457_v9 = vadd.f32 %v1302_v49, %v442_v1  ;;  %v458_v10 = vadd.f32 %v1302_v49, %v443_v2 }
  0x2c   : > { %v467_v11 = vpack.c.bf16 %v459_v3, %v459_v3  ;;  %v468_v12 = vpack.c.bf16 %v460_v4, %v460_v4  ;;  %v469_v13 = vpack.c.bf16 %v461_v5, %v461_v5  ;;  %v470_v14 = vpack.c.bf16 %v462_v6, %v462_v6 }
  0x2d   : > { %v471_v15 = vpack.c.bf16 %v463_v7, %v463_v7  ;;  %v472_v16 = vpack.c.bf16 %v464_v8, %v464_v8  ;;  %v465_v17 = vmax.f32 %v457_v9, 0.0  ;;  %v466_v18 = vmax.f32 %v458_v10, 0.0 }
  0x2e   : > { %475 = vst.msk [vmem:[#allocation2 + $0x18] sm:$0xf] %vm344_vm0, %v467_v11  ;;  %476 = vst.msk [vmem:[#allocation2 + $0x28] sm:$0xf] %vm344_vm0, %v468_v12 }
  0x2f   : > { %477 = vst.msk [vmem:[#allocation2 + $0x38] sm:$0xf] %vm344_vm0, %v469_v13  ;;  %478 = vst.msk [vmem:[#allocation2 + $0x48] sm:$0xf] %vm344_vm0, %v470_v14  ;;  %v473_v19 = vpack.c.bf16 %v465_v17, %v465_v17  ;;  %v474_v20 = vpack.c.bf16 %v466_v18, %v466_v18 }
  0x30   : > { %479 = vst.msk [vmem:[#allocation2 + $0x58] sm:$0xf] %vm344_vm0, %v471_v15  ;;  %480 = vst.msk [vmem:[#allocation2 + $0x68] sm:$0xf] %vm344_vm0, %v472_v16 }
  0x31   : > { %481 = vst.msk [vmem:[#allocation2 + $0x78] sm:$0xf] %vm344_vm0, %v473_v19  ;;  %482 = vst.msk [vmem:[#allocation2 + $0x88] sm:$0xf] %vm344_vm0, %v474_v20 }
  0x32 PF: > { %v981_v21 = vld [vmem:[%s1943_s4] sm:$0x3]  ;;  %vm988_vm7 = vcmask 1041408   ;;  %s1377_s16 = sshll.u32 %s1476_s24, 6  ;;  %vm518_vm8 = vcmask 31751   ;;  %vm520_vm9 = vcmask 30720  }
  0x33   : > { %1412 = vmatprep.subr.msk.bf16.mxu0 %vm988_vm7, %v981_v21  ;;  %v990_v22 = vsel %vm988_vm7, %v981_v21, 0  ;;  %v1670_v23 = vld [vmem:[%s1942_s3] ss:$0 sm:$0xff]  ;;  %s1672_s20 = scalar_lea.vmem [#allocation2], %s1377_s16  ;;  %v1692_v41 = vld [vmem:[%s1942_s3 + $0x1] ss:$0 sm:$0xff] }
  0x34   : > { %1407 = vmatpush3.bf16.msra.mxu0 %v990_v22  ;;  %v1699_v48 = vld [vmem:[%s1942_s3 + $0x2] ss:$0 sm:$0xff]  ;;  %vm556_vm10 = vcmask 31744   ;;  %vm605_vm11 = vcmask 1046528   ;;  %v1713_v4 = vld [vmem:[%s1942_s3 + $0x3] ss:$0 sm:$0xff] }
  0x35   : > { %vm678_vm12 = vcmask 1040384   ;;  %vm1041_vm13 = vcmask 64512   ;;  %vm1066_vm14 = vcmask 60416   ;;  %vm1088_vm15 = vcmask 57344  }
  0x38   : > { %v487_v24 = vld [vmem:[%s1672_s20 + $0x4] sm:$0x8]  ;;  %v488_v25 = vld [vmem:[%s1672_s20 + $0x8] ss:$16 sps:$4 sm:$0xff]   ;;  %v489_v26 = vld [vmem:[%s1672_s20 + $0x14] sm:$0x8] }
  0x39   : > { %v495_v27 = vunpack.c.l.bf16 %v487_v24  ;;  %v496_v28 = vunpack.c.l.bf16 %v488_v25  ;;  %v497_v29 = vunpack.c.l.bf16 %v489_v26  ;;  %v498_v30 = vunpack.c.h.bf16 %v488_v25  ;;  %v528_v31 = vld [vmem:[%s1672_s20 + $0x8] ss:$16 sps:$4 sm:$0xff]   ;;  %v562_v39 = vld [vmem:[%s1672_s20 + $0xc] sm:$0x1]  ;;  %v564_v40 = vld [vmem:[%s1672_s20 + $0x1c] sm:$0x1] }
  0x3a   : > { %v532_v36 = vunpack.c.l.bf16 %v528_v31  ;;  %v533_v37 = vunpack.c.h.bf16 %v528_v31  ;;  %v561_v38 = vld [vmem:[%s1672_s20 + $0x8] ss:$16 sps:$4 sm:$0xff]   ;;  %v570_v43 = vunpack.c.l.bf16 %v562_v39  ;;  %v572_v45 = vunpack.c.l.bf16 %v564_v40  ;;  %v1313_v57 = vld [vmem:[%s1672_s20 + $0x14] sm:$0x8]  ;;  %v1315_v59 = vld [vmem:[%s1672_s20 + $0x24] sm:$0x8] }
  0x3b   : > { %v510_v32 = vmul.f32 %v1670_v23, %v495_v27  ;;  %v511_v33 = vmul.f32 %v1670_v23, %v496_v28  ;;  %v512_v34 = vmul.f32 %v1670_v23, %v497_v29  ;;  %v513_v35 = vmul.f32 %v1670_v23, %v498_v30  ;;  %v1314_v58 = vld [vmem:[%s1672_s20 + $0x18] ss:$16 sps:$4 sm:$0xff]   ;;  %v491_v5 = vld [vmem:[%s1672_s20 + $0x24] sm:$0x8]  ;;  %v493_v11 = vld [vmem:[%s1672_s20 + $0x34] sm:$0x8] }
  0x3c   : > { %v569_v42 = vunpack.c.l.bf16 %v561_v38  ;;  %v571_v44 = vunpack.c.h.bf16 %v561_v38  ;;  %v544_v46 = vmul.f32 %v1692_v41, %v532_v36  ;;  %v545_v47 = vmul.f32 %v1692_v41, %v533_v37  ;;  %v492_v6 = vld [vmem:[%s1672_s20 + $0x28] ss:$16 sps:$4 sm:$0xff]   ;;  %v568_v36 = vld [vmem:[%s1672_s20 + $0x3c] sm:$0x1] }
  0x3d   : > { %519 = vst.msk [vmem:[#allocation3 - $0x7] sm:$0x80] %vm518_vm8, %v510_v32  ;;  %522 = vst.msk [vmem:[#allocation3 + $0x1] sm:$0x80] %vm518_vm8, %v512_v34  ;;  %v586_v52 = vmul.f32 %v1699_v48, %v570_v43  ;;  %v588_v54 = vmul.f32 %v1699_v48, %v572_v45  ;;  %v642_v0 = vunpack.c.l.bf16 %v1313_v57  ;;  %v643_v1 = vunpack.c.l.bf16 %v1314_v58  ;;  %v530_v22 = vld [vmem:[%s1672_s20 + $0x28] ss:$16 sps:$4 sm:$0xff]  }
  0x3e   : > { %521 = vst.msk [vmem:[#allocation3 + $0x1] sm:$0x7f] %vm520_vm9, %v511_v33  ;;  %523 = vst.msk [vmem:[#allocation3 + $0x9] sm:$0x7f] %vm520_vm9, %v513_v35  ;;  %v585_v51 = vmul.f32 %v1699_v48, %v569_v42  ;;  %v587_v53 = vmul.f32 %v1699_v48, %v571_v44  ;;  %v644_v2 = vunpack.c.l.bf16 %v1315_v59  ;;  %v645_v3 = vunpack.c.h.bf16 %v1314_v58  ;;  %v565_v33 = vld [vmem:[%s1672_s20 + $0x28] ss:$16 sps:$4 sm:$0xff]  }
  0x3f   : > { %v607_v61 = vrot.slane %v586_v52, 1  ;;  %v610_v63 = vrot.slane %v588_v54, 1  ;;  %v658_v9 = vmul.f32 %v1713_v4, %v642_v0  ;;  %v659_v10 = vmul.f32 %v1713_v4, %v643_v1  ;;  %v566_v34 = vld [vmem:[%s1672_s20 + $0x2c] sm:$0x1]  ;;  %v1323_v40 = vld [vmem:[%s1672_s20 + $0x18] ss:$16 sps:$4 sm:$0xff]  }
  0x40   : > { %v606_v60 = vrot.slane %v585_v51, 1  ;;  %v609_v62 = vrot.slane %v587_v53, 1  ;;  %v660_v14 = vmul.f32 %v1713_v4, %v644_v2  ;;  %v661_v15 = vmul.f32 %v1713_v4, %v645_v3  ;;  %v1330_v52 = vld [vmem:[%s1672_s20 + $0x1c] sm:$0x1]  ;;  %v1332_v58 = vld [vmem:[%s1672_s20 + $0x2c] sm:$0x1] }
  0x41   : > { %v499_v16 = vunpack.c.l.bf16 %v491_v5  ;;  %v500_v17 = vunpack.c.l.bf16 %v492_v6  ;;  %v501_v20 = vunpack.c.l.bf16 %v493_v11  ;;  %v502_v21 = vunpack.c.h.bf16 %v492_v6  ;;  %v1760_v1 = vld [vmem:[%s1942_s3 + $0x5] ss:$0 sm:$0xff]  ;;  %v1317_v5 = vld [vmem:[%s1672_s20 + $0x34] sm:$0x8]  ;;  %v1318_v6 = vld [vmem:[%s1672_s20 + $0x38] ss:$16 sps:$4 sm:$0xff]  }
  0x42   : > { %v608_v7 = vsel %vm605_vm11, %v606_v60, %v607_v61  ;;  %v611_v8 = vsel %vm605_vm11, %v609_v62, %v610_v63  ;;  %v679_v24 = vrot.slane %v658_v9, 7  ;;  %v680_v25 = vrot.slane %v659_v10, 7  ;;  %v1768_v10 = vld [vmem:[%s1672_s20 + $0x24] sm:$0x8] }
  0x43   : > { %v514_v26 = vmul.f32 %v1670_v23, %v499_v16  ;;  %v515_v27 = vmul.f32 %v1670_v23, %v500_v17  ;;  %v682_v28 = vrot.slane %v660_v14, 7  ;;  %v683_v29 = vrot.slane %v661_v15, 7  ;;  %v1774_v14 = vld [vmem:[%s1672_s20 + $0x28] ss:$16 sps:$4 sm:$0xff]   ;;  %v1777_v15 = vld [vmem:[%s1672_s20 + $0x34] sm:$0x8] }
  0x44   : > { %v516_v30 = vmul.f32 %v1670_v23, %v501_v20  ;;  %v517_v31 = vmul.f32 %v1670_v23, %v502_v21  ;;  %v534_v32 = vunpack.c.l.bf16 %v530_v22  ;;  %v535_v35 = vunpack.c.h.bf16 %v530_v22 }
  0x45   : > { %v548_v49 = vld [vmem:[#allocation3] sm:$0xff]  ;;  %v549_v50 = vld [vmem:[#allocation3 + $0x8] sm:$0xff]  ;;  %524 = vst.msk [vmem:[#allocation3 + $0x9] sm:$0x80] %vm518_vm8, %v514_v26  ;;  %v681_v37 = vsel %vm678_vm12, %v679_v24, %v680_v25  ;;  %v684_v23 = vsel %vm678_vm12, %v682_v28, %v683_v29  ;;  %v573_v38 = vunpack.c.l.bf16 %v565_v33  ;;  %v574_v39 = vunpack.c.l.bf16 %v566_v34 }
  0x46   : > { %v552_v55 = vadd.f32 %v548_v49, %v544_v46  ;;  %v553_v56 = vadd.f32 %v549_v50, %v545_v47  ;;  %525 = vst.msk [vmem:[#allocation3 + $0x11] sm:$0x7f] %vm520_vm9, %v515_v27  ;;  %527 = vst.msk [vmem:[#allocation3 + $0x19] sm:$0x7f] %vm520_vm9, %v517_v31  ;;  %v546_v42 = vmul.f32 %v1692_v41, %v534_v32  ;;  %v575_v43 = vunpack.c.h.bf16 %v565_v33  ;;  %v1329_v47 = vld [vmem:[%s1672_s20 + $0x18] ss:$16 sps:$4 sm:$0xff]  }
  0x47   : > { %526 = vst.msk [vmem:[#allocation3 + $0x11] sm:$0x80] %vm518_vm8, %v516_v30  ;;  %v576_v44 = vunpack.c.l.bf16 %v568_v36  ;;  %v547_v49 = vmul.f32 %v1692_v41, %v535_v35  ;;  %v707_v53 = vunpack.c.l.bf16 %v1323_v40  ;;  %v708_v54 = vunpack.c.h.bf16 %v1323_v40  ;;  %v1752_v41 = vld [vmem:[%s1942_s3 + $0x4] ss:$0 sm:$0xff]  ;;  %v1361_v26 = vld [vmem:[%s1672_s20 + $0x48] ss:$16 sps:$4 sm:$0xff]  }
  0x48   : > { %557 = vst.msk [vmem:[#allocation3] sm:$0xff] %vm556_vm10, %v552_v55  ;;  %558 = vst.msk [vmem:[#allocation3 + $0x8] sm:$0xff] %vm556_vm10, %v553_v56  ;;  %v589_v56 = vmul.f32 %v1699_v48, %v573_v38  ;;  %v590_v57 = vmul.f32 %v1699_v48, %v574_v39  ;;  %v743_v59 = vunpack.c.l.bf16 %v1329_v47  ;;  %v591_v62 = vmul.f32 %v1699_v48, %v575_v43  ;;  %v1362_v33 = vld [vmem:[%s1672_s20 + $0x4c] sm:$0x1]  ;;  %v1792_v38 = vld [vmem:[%s1942_s3 + $0x8] ss:$0 sm:$0xff] }
  0x49   : > { %v592_v63 = vmul.f32 %v1699_v48, %v576_v44  ;;  %v744_v0 = vunpack.c.l.bf16 %v1330_v52  ;;  %v745_v3 = vunpack.c.h.bf16 %v1329_v47  ;;  %v746_v9 = vunpack.c.l.bf16 %v1332_v58  ;;  %v1364_v44 = vld [vmem:[%s1672_s20 + $0x5c] sm:$0x1] }
  0x4a   : > { %v612_v48 = vrot.slane %v589_v56, 1  ;;  %v613_v11 = vrot.slane %v590_v57, 1  ;;  %v615_v16 = vrot.slane %v591_v62, 1  ;;  %v647_v20 = vunpack.c.l.bf16 %v1318_v6 }
  0x4b   : > { %v616_v17 = vrot.slane %v592_v63, 1  ;;  %v761_v22 = vmul.f32 %v1760_v1, %v745_v3  ;;  %v815_v24 = vunpack.c.l.bf16 %v1768_v10  ;;  %v649_v25 = vunpack.c.h.bf16 %v1318_v6 }
  0x4c   : > { %v762_v29 = vmul.f32 %v1760_v1, %v746_v9  ;;  %v816_v30 = vunpack.c.l.bf16 %v1774_v14  ;;  %v817_v31 = vunpack.c.l.bf16 %v1777_v15  ;;  %v614_v32 = vsel %vm605_vm11, %v612_v48, %v613_v11 }
  0x4d   : > { %v550_v55 = vld [vmem:[#allocation3 + $0x10] sm:$0xff]  ;;  %v665_v47 = vmul.f32 %v1713_v4, %v649_v25  ;;  %v922_v56 = vunpack.c.l.bf16 %v1364_v44 }
  0x4e   : > { %v551_v60 = vld [vmem:[#allocation3 + $0x18] sm:$0xff]  ;;  %v554_v61 = vadd.f32 %v550_v55, %v546_v42  ;;  %v663_v42 = vmul.f32 %v1713_v4, %v647_v20  ;;  %v783_v52 = vrot.slane %v762_v29, 1  ;;  %v818_v55 = vunpack.c.h.bf16 %v1774_v14 }
  0x4f   : > { %v593_v12 = vld [vmem:[#allocation3] sm:$0xff]  ;;  %v594_v13 = vld [vmem:[#allocation3 + $0x8] sm:$0xff]  ;;  %v555_v2 = vadd.f32 %v551_v60, %v547_v49  ;;  %v919_v49 = vunpack.c.l.bf16 %v1361_v26  ;;  %v689_v63 = vrot.slane %v665_v47, 7 }
  0x50   : > { %v622_v18 = vadd.f32 %v608_v7, %v593_v12  ;;  %v623_v19 = vadd.f32 %v611_v8, %v594_v13  ;;  %559 = vst.msk [vmem:[#allocation3 + $0x10] sm:$0xff] %vm556_vm10, %v554_v61  ;;  %v1319_v7 = vld [vmem:[%s1672_s20 + $0x44] sm:$0x8]  ;;  %v719_v8 = vmul.f32 %v1752_v41, %v707_v53  ;;  %v720_v12 = vmul.f32 %v1752_v41, %v708_v54 }
  0x51   : > { %560 = vst.msk [vmem:[#allocation3 + $0x18] sm:$0xff] %vm556_vm10, %v555_v2  ;;  %v759_v13 = vmul.f32 %v1760_v1, %v743_v59  ;;  %v648_v21 = vunpack.c.l.bf16 %v1319_v7  ;;  %v921_v54 = vunpack.c.h.bf16 %v1361_v26  ;;  %v935_v57 = vmul.f32 %v1792_v38, %v919_v49  ;;  %v1808_v59 = vld [vmem:[%s1942_s3 + $0x6] ss:$0 sm:$0xff] }
  0x52   : > { %626 = vst.msk [vmem:[#allocation3] sm:$0xff] %vm556_vm10, %v622_v18  ;;  %627 = vst.msk [vmem:[#allocation3 + $0x8] sm:$0xff] %vm556_vm10, %v623_v19  ;;  %v760_v18 = vmul.f32 %v1760_v1, %v744_v0  ;;  %v646_v19 = vunpack.c.l.bf16 %v1317_v5  ;;  %v686_v60 = vrot.slane %v663_v42, 7  ;;  %v938_v0 = vmul.f32 %v1792_v38, %v922_v56 }
  0x53   : > { %v779_v36 = vrot.slane %v759_v13, 1  ;;  %v664_v43 = vmul.f32 %v1713_v4, %v648_v21  ;;  %v937_v62 = vmul.f32 %v1792_v38, %v921_v54  ;;  %v957_v2 = vrot.slane %v935_v57, 1  ;;  %v1325_v21 = vld [vmem:[%s1672_s20 + $0x38] ss:$16 sps:$4 sm:$0xff]   ;;  %v1360_v57 = vld [vmem:[%s1672_s20 + $0x3c] sm:$0x1] }
  0x54   : > { %v662_v40 = vmul.f32 %v1713_v4, %v646_v19  ;;  %v961_v10 = vrot.slane %v938_v0, 1  ;;  %v833_v13 = vmul.f32 %v1808_v59, %v817_v31  ;;  %v834_v14 = vmul.f32 %v1808_v59, %v818_v55  ;;  %v1333_v31 = vld [vmem:[%s1672_s20 + $0x38] ss:$16 sps:$4 sm:$0xff]  }
  0x55   : > { %v688_v61 = vrot.slane %v664_v43, 7  ;;  %v960_v7 = vrot.slane %v937_v62, 1  ;;  %v749_v42 = vunpack.c.h.bf16 %v1333_v31 }
  0x56   : > { %v685_v4 = vrot.slane %v662_v40, 7 }
  0x57   : > { %v595_v39 = vld [vmem:[#allocation3 + $0x10] sm:$0xff]  ;;  %v1825_v19 = vsel %vm605_vm11, %v960_v7, %v961_v10 }
  0x58   : > { %v687_v15 = vsel %vm678_vm12, %v685_v4, %v686_v60  ;;  %v765_v4 = vmul.f32 %v1760_v1, %v749_v42  ;;  %v1347_v10 = vld [vmem:[%s1672_s20 + $0x54] sm:$0x8] }
  0x59   : > { %v666_v45 = vld [vmem:[#allocation3] sm:$0xff]  ;;  %v667_v46 = vld [vmem:[#allocation3 + $0x8] sm:$0xff] }
  0x5a   : > { %v695_v50 = vadd.f32 %v681_v37, %v666_v45  ;;  %v696_v51 = vadd.f32 %v684_v23, %v667_v46  ;;  %v617_v37 = vsel %vm605_vm11, %v615_v16, %v616_v17  ;;  %v780_v23 = vrot.slane %v760_v18, 1  ;;  %v596_v45 = vld [vmem:[#allocation3 + $0x18] sm:$0xff] }
  0x5b   : > { %v624_v46 = vadd.f32 %v614_v32, %v595_v39  ;;  %v625_v53 = vadd.f32 %v617_v37, %v596_v45  ;;  %v690_v18 = vsel %vm678_vm12, %v688_v61, %v689_v63  ;;  %v1334_v32 = vld [vmem:[%s1672_s20 + $0x3c] sm:$0x1]  ;;  %v747_v37 = vunpack.c.l.bf16 %v1333_v31  ;;  %v1351_v39 = vld [vmem:[%s1672_s20 + $0x28] ss:$16 sps:$4 sm:$0xff]   ;;  %v1852_v61 = vld [vmem:[%s1942_s3 + $0x7] ss:$0 sm:$0xff] }
  0x5c   : > { %699 = vst.msk [vmem:[#allocation3] sm:$0xff] %vm556_vm10, %v695_v50  ;;  %700 = vst.msk [vmem:[#allocation3 + $0x8] sm:$0xff] %vm556_vm10, %v696_v51  ;;  %v920_v50 = vunpack.c.l.bf16 %v1362_v33  ;;  %v782_v51 = vrot.slane %v761_v22, 1  ;;  %v781_v5 = vsel %vm605_vm11, %v779_v36, %v780_v23  ;;  %v710_v33 = vunpack.c.h.bf16 %v1325_v21 }
  0x5d   : > { %628 = vst.msk [vmem:[#allocation3 + $0x10] sm:$0xff] %vm556_vm10, %v624_v46  ;;  %629 = vst.msk [vmem:[#allocation3 + $0x18] sm:$0xff] %vm556_vm10, %v625_v53  ;;  %v748_v23 = vunpack.c.l.bf16 %v1334_v32  ;;  %v763_v54 = vmul.f32 %v1760_v1, %v747_v37  ;;  %v880_v56 = vunpack.c.h.bf16 %v1351_v39 }
  0x5e   : > { %v936_v58 = vmul.f32 %v1792_v38, %v920_v50  ;;  %v784_v6 = vsel %vm605_vm11, %v782_v51, %v783_v52  ;;  %v722_v46 = vmul.f32 %v1752_v41, %v710_v33  ;;  %v879_v50 = vunpack.c.l.bf16 %v1351_v39  ;;  %v1357_v51 = vld [vmem:[%s1672_s20 + $0x28] ss:$16 sps:$4 sm:$0xff]   ;;  %v1358_v52 = vld [vmem:[%s1672_s20 + $0x2c] sm:$0x1] }
  0x5f   : > { %v764_v55 = vmul.f32 %v1760_v1, %v748_v23  ;;  %v915_v63 = vunpack.c.l.bf16 %v1357_v51  ;;  %v916_v0 = vunpack.c.l.bf16 %v1358_v52  ;;  %v785_v7 = vrot.slane %v763_v54, 1  ;;  %v1353_v54 = vld [vmem:[%s1672_s20 + $0x48] ss:$16 sps:$4 sm:$0xff]  }
  0x60   : > { %v958_v3 = vrot.slane %v936_v58, 1 }
  0x62   : > { %v1817_v9 = vsel %vm605_vm11, %v957_v2, %v958_v3  ;;  %v1345_v2 = vld [vmem:[%s1672_s20 + $0x44] sm:$0x8]  ;;  %v1346_v3 = vld [vmem:[%s1672_s20 + $0x48] ss:$16 sps:$4 sm:$0xff]  }
  0x63   : > { %v723_v27 = vld [vmem:[#allocation3] sm:$0xff]  ;;  %v724_v28 = vld [vmem:[#allocation3 + $0x8] sm:$0xff] }
  0x64   : > { %v727_v34 = vadd.f32 %v723_v27, %v719_v8  ;;  %v728_v35 = vadd.f32 %v724_v28, %v720_v12  ;;  %v831_v8 = vmul.f32 %v1808_v59, %v815_v24  ;;  %v832_v12 = vmul.f32 %v1808_v59, %v816_v30  ;;  %v668_v20 = vld [vmem:[#allocation3 + $0x10] sm:$0xff]  ;;  %v669_v24 = vld [vmem:[#allocation3 + $0x18] sm:$0xff] }
  0x65   : > { %v697_v25 = vadd.f32 %v687_v15, %v668_v20  ;;  %v854_v27 = vrot.slane %v833_v13, 7  ;;  %v855_v28 = vrot.slane %v834_v14, 7  ;;  %v698_v29 = vadd.f32 %v690_v18, %v669_v24 }
  0x66   : > { %731 = vst.msk [vmem:[#allocation3] sm:$0xff] %vm556_vm10, %v727_v34  ;;  %732 = vst.msk [vmem:[#allocation3 + $0x8] sm:$0xff] %vm556_vm10, %v728_v35  ;;  %v851_v22 = vrot.slane %v831_v8, 7  ;;  %v852_v26 = vrot.slane %v832_v12, 7  ;;  %v709_v30 = vunpack.c.l.bf16 %v1325_v21  ;;  %v1336_v34 = vld [vmem:[%s1672_s20 + $0x4c] sm:$0x1]  ;;  %v819_v13 = vunpack.c.l.bf16 %v1345_v2 }
  0x67   : > { %701 = vst.msk [vmem:[#allocation3 + $0x10] sm:$0xff] %vm556_vm10, %v697_v25  ;;  %702 = vst.msk [vmem:[#allocation3 + $0x18] sm:$0xff] %vm556_vm10, %v698_v29  ;;  %v856_v36 = vsel %vm678_vm12, %v854_v27, %v855_v28  ;;  %v750_v43 = vunpack.c.l.bf16 %v1336_v34  ;;  %v786_v8 = vrot.slane %v764_v55, 1  ;;  %v820_v14 = vunpack.c.l.bf16 %v1346_v3 }
  0x68   : > { %v853_v35 = vsel %vm678_vm12, %v851_v22, %v852_v26  ;;  %v721_v40 = vmul.f32 %v1752_v41, %v709_v30  ;;  %v931_v15 = vmul.f32 %v1792_v38, %v915_v63  ;;  %v932_v21 = vmul.f32 %v1792_v38, %v916_v0 }
  0x69   : > { %v766_v60 = vmul.f32 %v1760_v1, %v750_v43  ;;  %v891_v1 = vmul.f32 %v1852_v61, %v879_v50  ;;  %v787_v25 = vsel %vm605_vm11, %v785_v7, %v786_v8  ;;  %v835_v30 = vmul.f32 %v1808_v59, %v819_v13 }
  0x6a   : > { %v836_v31 = vmul.f32 %v1808_v59, %v820_v14  ;;  %v951_v32 = vrot.slane %v931_v15, 1 }
  0x6b   : > { %v789_v12 = vrot.slane %v766_v60, 1 }
  0x6c   : > { %v858_v42 = vrot.slane %v836_v31, 7 }
  0x6d   : > { %v767_v48 = vld [vmem:[#allocation3] sm:$0xff]  ;;  %v768_v11 = vld [vmem:[#allocation3 + $0x8] sm:$0xff] }
  0x6e   : > { %v795_v16 = vadd.f32 %v781_v5, %v767_v48  ;;  %v796_v17 = vadd.f32 %v784_v6, %v768_v11  ;;  %v725_v53 = vld [vmem:[#allocation3 + $0x10] sm:$0xff]  ;;  %v726_v58 = vld [vmem:[#allocation3 + $0x18] sm:$0xff]  ;;  %v917_v5 = vunpack.c.h.bf16 %v1357_v51  ;;  %v918_v6 = vunpack.c.l.bf16 %v1360_v57 }
  0x6f   : > { %v729_v41 = vadd.f32 %v725_v53, %v721_v40  ;;  %v730_v62 = vadd.f32 %v726_v58, %v722_v46  ;;  %v892_v48 = vmul.f32 %v1852_v61, %v880_v56  ;;  %v788_v11 = vrot.slane %v765_v4, 1 }
  0x70   : > { %799 = vst.msk [vmem:[#allocation3] sm:$0xff] %vm556_vm10, %v795_v16  ;;  %800 = vst.msk [vmem:[#allocation3 + $0x8] sm:$0xff] %vm556_vm10, %v796_v17  ;;  %v821_v16 = vunpack.c.l.bf16 %v1347_v10  ;;  %v822_v17 = vunpack.c.h.bf16 %v1346_v3  ;;  %v933_v22 = vmul.f32 %v1792_v38, %v917_v5  ;;  %v934_v24 = vmul.f32 %v1792_v38, %v918_v6 }
  0x71   : > { %733 = vst.msk [vmem:[#allocation3 + $0x10] sm:$0xff] %vm556_vm10, %v729_v41  ;;  %734 = vst.msk [vmem:[#allocation3 + $0x18] sm:$0xff] %vm556_vm10, %v730_v62  ;;  %v790_v28 = vsel %vm605_vm11, %v788_v11, %v789_v12  ;;  %v857_v40 = vrot.slane %v835_v30, 7  ;;  %v881_v58 = vunpack.c.l.bf16 %v1353_v54  ;;  %v882_v41 = vunpack.c.h.bf16 %v1353_v54 }
  0x72   : > { %v837_v38 = vmul.f32 %v1808_v59, %v821_v16  ;;  %v954_v37 = vrot.slane %v933_v22, 1  ;;  %v955_v23 = vrot.slane %v934_v24, 1 }
  0x73   : > { %v893_v4 = vmul.f32 %v1852_v61, %v881_v58  ;;  %v894_v63 = vmul.f32 %v1852_v61, %v882_v41 }
  0x74   : > { %v860_v43 = vrot.slane %v837_v38, 7  ;;  %v956_v46 = vsel %vm605_vm11, %v954_v37, %v955_v23 }
  0x77   : > { %v839_v44 = vld [vmem:[#allocation3] sm:$0xff]  ;;  %v840_v45 = vld [vmem:[#allocation3 + $0x8] sm:$0xff] }
  0x78   : > { %v867_v47 = vadd.f32 %v853_v35, %v839_v44  ;;  %v868_v49 = vadd.f32 %v856_v36, %v840_v45  ;;  %v769_v29 = vld [vmem:[#allocation3 + $0x10] sm:$0xff]  ;;  %v770_v33 = vld [vmem:[#allocation3 + $0x18] sm:$0xff]  ;;  %v838_v35 = vmul.f32 %v1808_v59, %v822_v17  ;;  %v952_v36 = vrot.slane %v932_v21, 1 }
  0x79   : > { %v797_v34 = vadd.f32 %v787_v25, %v769_v29  ;;  %v798_v39 = vadd.f32 %v790_v28, %v770_v33  ;;  %v859_v59 = vsel %vm678_vm12, %v857_v40, %v858_v42 }
  0x7a   : > { %871 = vst.msk [vmem:[#allocation3] sm:$0xff] %vm556_vm10, %v867_v47  ;;  %872 = vst.msk [vmem:[#allocation3 + $0x8] sm:$0xff] %vm556_vm10, %v868_v49  ;;  %v861_v44 = vrot.slane %v838_v35, 7  ;;  %v953_v45 = vsel %vm605_vm11, %v951_v32, %v952_v36 }
  0x7b   : > { %801 = vst.msk [vmem:[#allocation3 + $0x10] sm:$0xff] %vm556_vm10, %v797_v34  ;;  %802 = vst.msk [vmem:[#allocation3 + $0x18] sm:$0xff] %vm556_vm10, %v798_v39 }
  0x7c   : > { %v862_v52 = vsel %vm678_vm12, %v860_v43, %v861_v44 }
  0x81   : > { %v895_v18 = vld [vmem:[#allocation3] sm:$0xff]  ;;  %v896_v20 = vld [vmem:[#allocation3 + $0x8] sm:$0xff] }
  0x82   : > { %v899_v26 = vadd.f32 %v895_v18, %v891_v1  ;;  %v900_v27 = vadd.f32 %v896_v20, %v892_v48  ;;  %v841_v53 = vld [vmem:[#allocation3 + $0x10] sm:$0xff]  ;;  %v842_v55 = vld [vmem:[#allocation3 + $0x18] sm:$0xff] }
  0x83   : > { %v869_v56 = vadd.f32 %v859_v59, %v841_v53  ;;  %v870_v57 = vadd.f32 %v862_v52, %v842_v55 }
  0x84   : > { %903 = vst.msk [vmem:[#allocation3] sm:$0xff] %vm556_vm10, %v899_v26  ;;  %904 = vst.msk [vmem:[#allocation3 + $0x8] sm:$0xff] %vm556_vm10, %v900_v27 }
  0x85   : > { %873 = vst.msk [vmem:[#allocation3 + $0x10] sm:$0xff] %vm556_vm10, %v869_v56  ;;  %874 = vst.msk [vmem:[#allocation3 + $0x18] sm:$0xff] %vm556_vm10, %v870_v57 }
  0x8b   : > { %v939_v47 = vld [vmem:[#allocation3] sm:$0xff]  ;;  %v940_v49 = vld [vmem:[#allocation3 + $0x8] sm:$0xff] }
  0x8c   : > { %v967_v50 = vadd.f32 %v953_v45, %v939_v47  ;;  %v968_v51 = vadd.f32 %v956_v46, %v940_v49  ;;  %v897_v2 = vld [vmem:[#allocation3 + $0x10] sm:$0xff]  ;;  %v898_v3 = vld [vmem:[#allocation3 + $0x18] sm:$0xff] }
  0x8d   : > { %v901_v5 = vadd.f32 %v897_v2, %v893_v4  ;;  %v902_v6 = vadd.f32 %v898_v3, %v894_v63 }
  0x8e   : > { %971 = vst.msk [vmem:[#allocation3] sm:$0xff] %vm556_vm10, %v967_v50  ;;  %972 = vst.msk [vmem:[#allocation3 + $0x8] sm:$0xff] %vm556_vm10, %v968_v51 }
  0x8f   : > { %905 = vst.msk [vmem:[#allocation3 + $0x10] sm:$0xff] %vm556_vm10, %v901_v5  ;;  %906 = vst.msk [vmem:[#allocation3 + $0x18] sm:$0xff] %vm556_vm10, %v902_v6 }
  0x95   : > { %v975_v60 = vld [vmem:[#allocation3] sm:$0xff]  ;;  %v976_v62 = vld [vmem:[#allocation3 + $0x8] sm:$0xff] }
  0x96   : > { %v979_v0 = vpack.c.bf16 %v976_v62, %v975_v60  ;;  %v941_v7 = vld [vmem:[#allocation3 + $0x10] sm:$0xff]  ;;  %v942_v8 = vld [vmem:[#allocation3 + $0x18] sm:$0xff] }
  0x97   : > { %v969_v10 = vadd.f32 %v1817_v9, %v941_v7  ;;  %v970_v1 = vadd.f32 %v1825_v19, %v942_v8 }
  0x98   : > { %1408 = vmatprep.mubr.msk.bf16.mxu0 %vm556_vm10, %v979_v0 }
  0x99   : > { %973 = vst.msk [vmem:[#allocation3 + $0x10] sm:$0xff] %vm556_vm10, %v969_v10  ;;  %974 = vst.msk [vmem:[#allocation3 + $0x18] sm:$0xff] %vm556_vm10, %v970_v1 }
  0xa0   : > { %v977_v61 = vld [vmem:[#allocation3 + $0x10] sm:$0xff]  ;;  %v978_v48 = vld [vmem:[#allocation3 + $0x18] sm:$0xff] }
  0xa1   : > { %v980_v11 = vpack.c.bf16 %v978_v48, %v977_v61 }
  0xa3   : > { %1409 = vmatmul.mubr.msk.bf16.vlgmr.msra.gmra.mrb[0].mxu0 %vm556_vm10, %v980_v11 }
 0x176   : > { %v1410_v12 = vpop.f32.mrb[0].mxu0 }
 0x177   : > { %1044 = vst.msk [vmem:[#allocation4 + $0x10] sm:$0xff] %vm1041_vm13, %v1410_v12  ;;  %v1026_v13 = vpop.f32.mrb[1].mxu0 }
 0x178   : > { %1042 = vst.msk [vmem:[#allocation4] sm:$0xff] %vm1041_vm13, %v1026_v13  ;;  %v1411_v9 = vpop.f32.mrb[2].mxu0 }
 0x179   : > { %1045 = vst.msk [vmem:[#allocation4 + $0x18] sm:$0xff] %vm1041_vm13, %v1411_v9  ;;  %v1029_v19 = vpop.f32.mrb[3].mxu0 }
 0x17a   : > { %1043 = vst.msk [vmem:[#allocation4 + $0x8] sm:$0xff] %vm1041_vm13, %v1029_v19 }
 0x17e   : > { %v1048_v14 = vld [vmem:[#allocation4 + $0x10] sm:$0xff] }
 0x17f   : > { %v1382_v15 = vpack.c.bf16 %v1048_v14, %v1048_v14  ;;  %v1046_v16 = vld [vmem:[#allocation4] sm:$0xff]  ;;  %v1096_v21 = vmul.f32 %v1048_v14, %v1048_v14  ;;  %v1078_v30 = vsel %vm1041_vm13, %v1048_v14, 0.0 }
 0x180   : > { %v1380_v17 = vpack.c.bf16 %v1046_v16, %v1046_v16  ;;  %v1094_v18 = vmul.f32 %v1046_v16, %v1046_v16  ;;  %v1049_v20 = vld [vmem:[#allocation4 + $0x18] sm:$0xff]  ;;  %v1075_v25 = vsel %vm1041_vm13, %v1046_v16, 0.0 }
 0x181   : > { %1069 = vst.msk [vmem:[%s1577_s18 + $0x8] sm:$0xf] %vm1066_vm14, %v1382_v15  ;;  %v1383_v22 = vpack.c.bf16 %v1049_v20, %v1049_v20  ;;  %v1047_v24 = vld [vmem:[#allocation4 + $0x8] sm:$0xff]  ;;  %v1097_v32 = vmul.f32 %v1049_v20, %v1049_v20  ;;  %v1101_v35 = vsel %vm1041_vm13, %v1096_v21, 0.0  ;;  %v1080_v36 = vsel %vm1041_vm13, %v1049_v20, 0.0 }
 0x182   : > { %1067 = vst.msk [vmem:[%s1577_s18] sm:$0xf] %vm1066_vm14, %v1380_v17  ;;  %v1381_v26 = vpack.c.bf16 %v1047_v24, %v1047_v24  ;;  %v1076_v27 = vsel %vm1041_vm13, %v1047_v24, 0.0  ;;  %v1095_v28 = vmul.f32 %v1047_v24, %v1047_v24  ;;  %v1098_v31 = vsel %vm1041_vm13, %v1094_v18, 0.0 }
 0x183   : > { %1070 = vst.msk [vmem:[%s1577_s18 + $0xc] sm:$0xf] %vm1066_vm14, %v1383_v22  ;;  %v1077_v29 = vadd.f32 %v1076_v27, %v1075_v25  ;;  %v1103_v39 = vsel %vm1041_vm13, %v1097_v32, 0.0 }
 0x184   : > { %1068 = vst.msk [vmem:[%s1577_s18 + $0x4] sm:$0xf] %vm1066_vm14, %v1381_v26  ;;  %v1099_v33 = vsel %vm1041_vm13, %v1095_v28, 0.0 }
 0x185   : > { %v1079_v34 = vadd.f32 %v1078_v30, %v1077_v29  ;;  %v1100_v38 = vadd.f32 %v1099_v33, %v1098_v31 }
 0x187   : > { %v1081_v37 = vadd.f32 %v1080_v36, %v1079_v34  ;;  %v1102_v23 = vadd.f32 %v1101_v35, %v1100_v38 }
 0x189   : > { %v1082_v40 = vrot.slane %v1081_v37, 4  ;;  %v1104_v42 = vadd.f32 %v1103_v39, %v1102_v23 }
 0x18b   : > { %v1083_v43 = vadd.f32 %v1082_v40, %v1081_v37  ;;  %v1105_v44 = vrot.slane %v1104_v42, 4 }
 0x18d   : > { %v1084_v45 = vrot.slane %v1083_v43, 2  ;;  %v1106_v46 = vadd.f32 %v1105_v44, %v1104_v42 }
 0x18f   : > { %v1085_v47 = vadd.f32 %v1084_v45, %v1083_v43  ;;  %v1107_v49 = vrot.slane %v1106_v46, 2 }
 0x191   : > { %v1086_v59 = vrot.slane %v1085_v47, 1  ;;  %v1108_v50 = vadd.f32 %v1107_v49, %v1106_v46 }
 0x193   : > { %v1087_v51 = vadd.f32 %v1086_v59, %v1085_v47  ;;  %v1109_v52 = vrot.slane %v1108_v50, 1 }
 0x195   : > { %1089 = vst.msk [vmem:[%s331_s30] sm:$0x1] %vm1088_vm15, %v1087_v51  ;;  %v1110_v53 = vadd.f32 %v1109_v52, %v1108_v50 }
 0x197   : > { %1111 = vst.msk [vmem:[%s338_s8] sm:$0x1] %vm1088_vm15, %v1110_v53 }
 0x198 PF: > { %s18_s28 = sadd.s32 1, %s1492_s28   ;;  %s1952_s9 = sld [smem:[#allocation5_spill]] }
 0x199   : > { %p15_p9 = scmp.ge.s32.totalorder %s18_s28, 6   ;;  %s1953_s24 = smov %s1484_s26 }
 0x19a   : > { %s1954_s25 = smov %s1488_s27  ;;  %s1955_s26 = smov %s1958_s29 }
 0x19b   :  { %17 = sbr.rel (!%p15_p9) target bundleno = 3 (0x3), region = 111 }
 0x19e   : > { %s1956_s27 = smov %s1952_s9 }

// kernel: sepconv_forward.3
= control target key start
LH: loop header
LB: loop body
LE: loop exit
PB: predicated region body
PF: predicated region fallthrough
CT: control target
= control target key end

     0   :  { %s2187_s24 = smov 0   ;;  %s2189_s25 = smov 0   ;;  %s2759_s0 = inlined_call_operand.vmem [shape: bf16[2,16,16,4], index: 0, kind: input, shape index: {}]   ;;  %s2760_s1 = inlined_call_operand.vmem [shape: f32[1,1,4], index: 1, kind: input, shape index: {}]   ;;  %s2761_s2 = inlined_call_operand.vmem [shape: f32[1,1,4], index: 2, kind: input, shape index: {}]   ;;  %s2762_s3 = inlined_call_operand.vmem [shape: f32[9,1,4], index: 3, kind: input, shape index: {}]   ;;  %s2763_s4 = inlined_call_operand.vmem [shape: bf16[4,4], index: 4, kind: input, shape index: {}]   ;;  %s2764_s5 = inlined_call_operand.vmem [shape: bf16[2,64,4], index: 5, kind: output, shape index: {0}]   ;;  %s2765_s6 = inlined_call_operand.vmem [shape: f32[2,2,1,4], index: 6, kind: output, shape index: {1}]   ;;  %s2766_s7 = inlined_call_operand.vmem [shape: f32[2,2,1,4], index: 7, kind: output, shape index: {2}]  }
   0x1   :  { %s2191_s26 = smov 0   ;;  %s2193_s27 = smov 0  }
   0x2   :  { %s2195_s28 = smov 0  }
   0x3 LB: > { %s27_s29 = sadd.s32 1, %s2136_s26  ;;  %s30_s30 = sadd.s32 1, %s2140_s27  ;;  %s2144_s28 = sphi %s2195_s28, %s18_s28   ;;  %s2140_s27 = sphi %s2193_s27, %s2776_s27   ;;  %s2136_s26 = sphi %s2191_s26, %s2775_s26   ;;  %s2132_s25 = sphi %s2189_s25, %s2774_s25   ;;  %s2128_s24 = sphi %s2187_s24, %s2773_s24  }
   0x4   : > { %p28_p0 = scmp.ge.s32.totalorder %s27_s29, 2  ;;  %p1845_p1 = scmp.ge.s32.totalorder %s2144_s28, 1 }
   0x5   : > { %p260_p2 = scmp.lt.s32.totalorder %s2144_s28, 5 }
   0x6   : > { %s2778_s29 = smov (%p28_p0, %s27_s29), 0  ;;  %s2780_s30 = smov (!%p28_p0, %s30_s30), %s2140_s27 }
   0x7   : > { %p261_p3 = pnand %p1845_p1, %p260_p2  ;;  %p32_p4 = scmp.ge.s32.totalorder %s2780_s30, 2 }
   0x8   : > { %p310_p5 = scmp.lt.s32.totalorder (!%p261_p3), %s2132_s25, 1  ;;  %s1848_s8 = sshll.u32 (!%p261_p3), %s2128_s24, 2 }
   0x9   : > { %s2782_s30 = smov (%p32_p4, %s2780_s30), 0  ;;  %264 = sbr.rel (%p261_p3) target bundleno = 478 (0x1de), region = 40 }
   0xa   : > { %2767 = sst [smem:[#allocation6_spill]] %s2782_s30  ;;  %p318_p6 = scmp.lt.s32.totalorder (!%p261_p3), %s1848_s8, 7 }
   0xb   : > { %p327_p7 = scmp.lt.s32.totalorder (!%p261_p3), %s2128_s24, 1  ;;  %p1853_p8 = scmp.ne.s32.totalorder (!%p261_p3), %s2128_s24, 0 }
  0x10   : > { %s2784_s25 = smov (!%p310_p5, %s2132_s25), 1  ;;  %s2786_s8 = smov (!%p318_p6, %s1848_s8), 7 }
  0x11   : > { %s1947_s9 = sshll.u32 %s2784_s25, 7  ;;  %s1849_s10 = sshll.u32 %s2784_s25, 3  ;;  %v2247_v1 = vld [vmem:[%s2760_s1] ss:$0 sm:$0xff] (!%p1853_p8)  ;;  %vm518_vm0 = vcmask (!%p1853_p8), 31744   ;;  %vm553_vm1 = vcmask (!%p1853_p8), 24576  }
  0x12   : > { %s2224_s13 = scalar_lea.vmem %s2759_s0, %s1947_s9  ;;  %s321_s14 = sadd.s32 %s1849_s10, %s2786_s8  ;;  %v2255_v7 = vld [vmem:[%s2761_s2] ss:$0 sm:$0xff] (!%p1853_p8)  ;;  %vm554_vm2 = vsmask.f32 (!%p1853_p8), 256  ;;  %vm551_vm4 = vcmask (!%p1853_p8), 27648  }
  0x13   : > { %s1850_s15 = sshll.u32 %s321_s14, 2  ;;  %s1851_s19 = sshll.u32 %s2784_s25, 1  ;;  %v1977_v0 = vld [vmem:[%s2224_s13] sm:$0xff] (!%p1853_p8)   ;;  %v2040_v4 = vld [vmem:[%s2224_s13 + $0x8] sm:$0xff] (!%p1853_p8)   ;;  %v2041_v5 = vld [vmem:[%s2224_s13 + $0x10] sm:$0xff] (!%p1853_p8)  }
  0x14   : > { %s2229_s18 = scalar_lea.vmem %s2764_s5, %s1850_s15  ;;  %343 = sbr.rel (%p1853_p8) target bundleno = 128 (0x80), region = 44  ;;  %v1978_v2 = vunpack.c.l.bf16 (!%p1853_p8), %v1977_v0  ;;  %v1979_v3 = vunpack.c.h.bf16 (!%p1853_p8), %v1977_v0  ;;  %v2042_v6 = vld [vmem:[%s2224_s13 + $0x18] sm:$0xff] (!%p1853_p8)   ;;  %v1982_v8 = vunpack.c.l.bf16 (!%p1853_p8), %v2040_v4  ;;  %v1983_v9 = vunpack.c.h.bf16 (!%p1853_p8), %v2040_v4  ;;  %v2043_v28 = vld [vmem:[%s2224_s13 + $0x20] sm:$0xff] (!%p1853_p8)   ;;  %v2044_v33 = vld [vmem:[%s2224_s13 + $0x28] sm:$0xff] (!%p1853_p8)  }
  0x15   : > { %s328_s20 = scalar_select %p327_p7, %s2128_s24, 1 }
  0x16   : > { %v1986_v10 = vunpack.c.l.bf16 (!%p1853_p8), %v2041_v5  ;;  %v1987_v11 = vunpack.c.h.bf16 (!%p1853_p8), %v2041_v5  ;;  %v415_v12 = vmul.f32 (!%p1853_p8), %v1978_v2, %v2247_v1  ;;  %v416_v13 = vmul.f32 (!%p1853_p8), %v1979_v3, %v2247_v1  ;;  %v2045_v34 = vld [vmem:[%s2224_s13 + $0x30] sm:$0xff] (!%p1853_p8)   ;;  %v2046_v39 = vld [vmem:[%s2224_s13 + $0x38] sm:$0xff] (!%p1853_p8)   ;;  %v2047_v0 = vld [vmem:[%s2224_s13 + $0x40] sm:$0xff] (!%p1853_p8)  }
  0x17   : > { %s2232_s21 = sadd.s32 %s1851_s19, %s328_s20  ;;  %v1990_v14 = vunpack.c.l.bf16 (!%p1853_p8), %v2042_v6  ;;  %v1991_v15 = vunpack.c.h.bf16 (!%p1853_p8), %v2042_v6  ;;  %v417_v16 = vmul.f32 (!%p1853_p8), %v1982_v8, %v2247_v1  ;;  %v418_v17 = vmul.f32 (!%p1853_p8), %v1983_v9, %v2247_v1  ;;  %v2048_v6 = vld [vmem:[%s2224_s13 + $0x48] sm:$0xff] (!%p1853_p8)   ;;  %v2049_v8 = vld [vmem:[%s2224_s13 + $0x50] sm:$0xff] (!%p1853_p8)   ;;  %vm2349_vm3 = vmand (!%p1853_p8), %vm553_vm1, %vm554_vm2 }
  0x18   : > { %s331_s30 = scalar_lea.vmem %s2765_s6, %s2232_s21  ;;  %s338_s8 = scalar_lea.vmem %s2766_s7, %s2232_s21  ;;  %v419_v18 = vmul.f32 (!%p1853_p8), %v1986_v10, %v2247_v1  ;;  %v420_v19 = vmul.f32 (!%p1853_p8), %v1987_v11, %v2247_v1  ;;  %v454_v20 = vadd.f32 (!%p1853_p8), %v2255_v7, %v415_v12  ;;  %v455_v21 = vadd.f32 (!%p1853_p8), %v2255_v7, %v416_v13  ;;  %v2050_v13 = vld [vmem:[%s2224_s13 + $0x58] sm:$0xff] (!%p1853_p8)  }
  0x19   : > { %v421_v22 = vmul.f32 (!%p1853_p8), %v1990_v14, %v2247_v1  ;;  %v422_v23 = vmul.f32 (!%p1853_p8), %v1991_v15, %v2247_v1  ;;  %v456_v24 = vadd.f32 (!%p1853_p8), %v2255_v7, %v417_v16  ;;  %v457_v25 = vadd.f32 (!%p1853_p8), %v2255_v7, %v418_v17 }
  0x1a   : > { %v458_v26 = vadd.f32 (!%p1853_p8), %v2255_v7, %v419_v18  ;;  %v459_v27 = vadd.f32 (!%p1853_p8), %v2255_v7, %v420_v19  ;;  %v486_v29 = vmax.f32 (!%p1853_p8), %v454_v20, 0.0  ;;  %v487_v30 = vmax.f32 (!%p1853_p8), %v455_v21, 0.0 }
  0x1b   : > { %v460_v31 = vadd.f32 %v2255_v7, %v421_v22  ;;  %v461_v32 = vadd.f32 %v2255_v7, %v422_v23  ;;  %v488_v35 = vmax.f32 %v456_v24, 0.0  ;;  %v489_v36 = vmax.f32 %v457_v25, 0.0 }
  0x1c   : > { %v490_v37 = vmax.f32 %v458_v26, 0.0  ;;  %v491_v38 = vmax.f32 %v459_v27, 0.0  ;;  %519 = vst.msk [vmem:[#allocation5] sm:$0xff] %vm518_vm0, %v486_v29  ;;  %520 = vst.msk [vmem:[#allocation5 + $0x8] sm:$0xff] %vm518_vm0, %v487_v30  ;;  %v1994_v42 = vunpack.c.l.bf16 %v2043_v28  ;;  %v1995_v43 = vunpack.c.h.bf16 %v2043_v28 }
  0x1d   : > { %v492_v40 = vmax.f32 %v460_v31, 0.0  ;;  %v493_v41 = vmax.f32 %v461_v32, 0.0  ;;  %521 = vst.msk [vmem:[#allocation5 + $0x10] sm:$0xff] %vm518_vm0, %v488_v35  ;;  %522 = vst.msk [vmem:[#allocation5 + $0x18] sm:$0xff] %vm518_vm0, %v489_v36  ;;  %v1998_v44 = vunpack.c.l.bf16 %v2044_v33  ;;  %v1999_v45 = vunpack.c.h.bf16 %v2044_v33 }
  0x1e   : > { %523 = vst.msk [vmem:[#allocation5 + $0x20] sm:$0xff] %vm518_vm0, %v490_v37  ;;  %524 = vst.msk [vmem:[#allocation5 + $0x28] sm:$0xff] %vm518_vm0, %v491_v38  ;;  %v2002_v46 = vunpack.c.l.bf16 %v2045_v34  ;;  %v2003_v47 = vunpack.c.h.bf16 %v2045_v34  ;;  %v423_v48 = vmul.f32 %v1994_v42, %v2247_v1  ;;  %v424_v49 = vmul.f32 %v1995_v43, %v2247_v1  ;;  %v2051_v38 = vld [vmem:[%s2224_s13 + $0x60] sm:$0xff]   ;;  %v2052_v43 = vld [vmem:[%s2224_s13 + $0x68] sm:$0xff]  }
  0x1f   : > { %525 = vst.msk [vmem:[#allocation5 + $0x30] sm:$0xff] %vm518_vm0, %v492_v40  ;;  %526 = vst.msk [vmem:[#allocation5 + $0x38] sm:$0xff] %vm518_vm0, %v493_v41  ;;  %v2006_v50 = vunpack.c.l.bf16 %v2046_v39  ;;  %v2007_v51 = vunpack.c.h.bf16 %v2046_v39  ;;  %v425_v52 = vmul.f32 %v1998_v44, %v2247_v1  ;;  %v426_v53 = vmul.f32 %v1999_v45, %v2247_v1  ;;  %v2053_v44 = vld [vmem:[%s2224_s13 + $0x70] sm:$0xff]  }
  0x20   : > { %v427_v54 = vmul.f32 %v2002_v46, %v2247_v1  ;;  %v428_v55 = vmul.f32 %v2003_v47, %v2247_v1  ;;  %v462_v56 = vadd.f32 %v2255_v7, %v423_v48  ;;  %v463_v57 = vadd.f32 %v2255_v7, %v424_v49  ;;  %v2054_v49 = vld [vmem:[%s2224_s13 + $0x78] sm:$0xff]  }
  0x21   : > { %v429_v58 = vmul.f32 %v2006_v50, %v2247_v1  ;;  %v430_v59 = vmul.f32 %v2007_v51, %v2247_v1  ;;  %v464_v60 = vadd.f32 %v2255_v7, %v425_v52  ;;  %v465_v61 = vadd.f32 %v2255_v7, %v426_v53 }
  0x22   : > { %v466_v62 = vadd.f32 %v2255_v7, %v427_v54  ;;  %v467_v63 = vadd.f32 %v2255_v7, %v428_v55  ;;  %v494_v2 = vmax.f32 %v462_v56, 0.0  ;;  %v495_v3 = vmax.f32 %v463_v57, 0.0 }
  0x23   : > { %v468_v4 = vadd.f32 %v2255_v7, %v429_v58  ;;  %v469_v5 = vadd.f32 %v2255_v7, %v430_v59  ;;  %v496_v9 = vmax.f32 %v464_v60, 0.0  ;;  %v497_v10 = vmax.f32 %v465_v61, 0.0 }
  0x24   : > { %v498_v11 = vmax.f32 %v466_v62, 0.0  ;;  %v499_v12 = vmax.f32 %v467_v63, 0.0  ;;  %527 = vst.msk [vmem:[#allocation5 + $0x40] sm:$0xff] %vm518_vm0, %v494_v2  ;;  %528 = vst.msk [vmem:[#allocation5 + $0x48] sm:$0xff] %vm518_vm0, %v495_v3  ;;  %v2010_v16 = vunpack.c.l.bf16 %v2047_v0  ;;  %v2011_v17 = vunpack.c.h.bf16 %v2047_v0 }
  0x25   : > { %v500_v14 = vmax.f32 %v468_v4, 0.0  ;;  %v501_v15 = vmax.f32 %v469_v5, 0.0  ;;  %529 = vst.msk [vmem:[#allocation5 + $0x50] sm:$0xff] %vm518_vm0, %v496_v9  ;;  %530 = vst.msk [vmem:[#allocation5 + $0x58] sm:$0xff] %vm518_vm0, %v497_v10  ;;  %v2014_v18 = vunpack.c.l.bf16 %v2048_v6  ;;  %v2015_v19 = vunpack.c.h.bf16 %v2048_v6  ;;  %v560_v4 = vld [vmem:[#allocation2 + $0x8] sm:$0x1] }
  0x26   : > { %531 = vst.msk [vmem:[#allocation5 + $0x60] sm:$0xff] %vm518_vm0, %v498_v11  ;;  %532 = vst.msk [vmem:[#allocation5 + $0x68] sm:$0xff] %vm518_vm0, %v499_v12  ;;  %v2018_v20 = vunpack.c.l.bf16 %v2049_v8  ;;  %v2019_v21 = vunpack.c.h.bf16 %v2049_v8  ;;  %v431_v22 = vmul.f32 %v2010_v16, %v2247_v1  ;;  %v432_v23 = vmul.f32 %v2011_v17, %v2247_v1  ;;  %v563_v5 = vld [vmem:[#allocation2 + $0x10] sm:$0x1]  ;;  %v566_v11 = vld [vmem:[#allocation2 + $0x18] sm:$0x1] }
  0x27   : > { %533 = vst.msk [vmem:[#allocation5 + $0x70] sm:$0xff] %vm518_vm0, %v500_v14  ;;  %534 = vst.msk [vmem:[#allocation5 + $0x78] sm:$0xff] %vm518_vm0, %v501_v15  ;;  %v2022_v24 = vunpack.c.l.bf16 %v2050_v13  ;;  %v2023_v25 = vunpack.c.h.bf16 %v2050_v13  ;;  %v433_v26 = vmul.f32 %v2014_v18, %v2247_v1  ;;  %v434_v27 = vmul.f32 %v2015_v19, %v2247_v1  ;;  %v569_v12 = vld [vmem:[#allocation2 + $0x20] sm:$0x1]  ;;  %v572_v13 = vld [vmem:[#allocation2 + $0x28] sm:$0x1] }
  0x28   : > { %v435_v28 = vmul.f32 %v2018_v20, %v2247_v1  ;;  %v436_v29 = vmul.f32 %v2019_v21, %v2247_v1  ;;  %v470_v30 = vadd.f32 %v2255_v7, %v431_v22  ;;  %v471_v31 = vadd.f32 %v2255_v7, %v432_v23  ;;  %v575_v14 = vld [vmem:[#allocation2 + $0x30] sm:$0x1]  ;;  %v578_v19 = vld [vmem:[#allocation2 + $0x38] sm:$0x1]  ;;  %v581_v20 = vld [vmem:[#allocation2 + $0x40] sm:$0x1] }
  0x29   : > { %v437_v32 = vmul.f32 %v2022_v24, %v2247_v1  ;;  %v438_v33 = vmul.f32 %v2023_v25, %v2247_v1  ;;  %v472_v34 = vadd.f32 %v2255_v7, %v433_v26  ;;  %v473_v35 = vadd.f32 %v2255_v7, %v434_v27  ;;  %v831_v21 = vld [vmem:[#allocation2 + $0x90] sm:$0x1]  ;;  %v834_v22 = vld [vmem:[#allocation2 + $0x98] sm:$0x1]  ;;  %v837_v26 = vld [vmem:[#allocation2 + $0xa0] sm:$0x1] }
  0x2a   : > { %v474_v36 = vadd.f32 %v2255_v7, %v435_v28  ;;  %v475_v37 = vadd.f32 %v2255_v7, %v436_v29  ;;  %v502_v39 = vmax.f32 %v470_v30, 0.0  ;;  %v503_v40 = vmax.f32 %v471_v31, 0.0  ;;  %v840_v27 = vld [vmem:[#allocation2 + $0xa8] sm:$0x1]  ;;  %v843_v28 = vld [vmem:[#allocation2 + $0xb0] sm:$0x1] }
  0x2b   : > { %v476_v41 = vadd.f32 %v2255_v7, %v437_v32  ;;  %v477_v42 = vadd.f32 %v2255_v7, %v438_v33  ;;  %v504_v45 = vmax.f32 %v472_v34, 0.0  ;;  %v505_v46 = vmax.f32 %v473_v35, 0.0  ;;  %v846_v29 = vld [vmem:[#allocation2 + $0xb8] sm:$0x1]  ;;  %v849_v34 = vld [vmem:[#allocation2 + $0xc0] sm:$0x1] }
  0x2c   : > { %v506_v47 = vmax.f32 %v474_v36, 0.0  ;;  %v507_v48 = vmax.f32 %v475_v37, 0.0  ;;  %535 = vst.msk [vmem:[#allocation5 + $0x80] sm:$0xff] %vm518_vm0, %v502_v39  ;;  %536 = vst.msk [vmem:[#allocation5 + $0x88] sm:$0xff] %vm518_vm0, %v503_v40  ;;  %v2026_v52 = vunpack.c.l.bf16 %v2051_v38  ;;  %v2027_v53 = vunpack.c.h.bf16 %v2051_v38  ;;  %v852_v35 = vld [vmem:[#allocation2 + $0xc8] sm:$0x1] }
  0x2d   : > { %v508_v50 = vmax.f32 %v476_v41, 0.0  ;;  %v509_v51 = vmax.f32 %v477_v42, 0.0  ;;  %537 = vst.msk [vmem:[#allocation5 + $0x90] sm:$0xff] %vm518_vm0, %v504_v45  ;;  %538 = vst.msk [vmem:[#allocation5 + $0x98] sm:$0xff] %vm518_vm0, %v505_v46  ;;  %v2030_v54 = vunpack.c.l.bf16 %v2052_v43  ;;  %v2031_v55 = vunpack.c.h.bf16 %v2052_v43  ;;  %v2363_v36 = vld [vmem:[#allocation5 + $0x10] ss:$2 sm:$0xff] }
  0x2e   : > { %539 = vst.msk [vmem:[#allocation5 + $0xa0] sm:$0xff] %vm518_vm0, %v506_v47  ;;  %540 = vst.msk [vmem:[#allocation5 + $0xa8] sm:$0xff] %vm518_vm0, %v507_v48  ;;  %v2034_v56 = vunpack.c.l.bf16 %v2053_v44  ;;  %v2035_v57 = vunpack.c.h.bf16 %v2053_v44  ;;  %v439_v58 = vmul.f32 %v2026_v52, %v2247_v1  ;;  %v440_v59 = vmul.f32 %v2027_v53, %v2247_v1  ;;  %v2371_v40 = vld [vmem:[#allocation5 + $0x30] ss:$2 sm:$0xff]  ;;  %v1061_v47 = vld [vmem:[#allocation5] ss:$2 sm:$0xff] }
  0x2f   : > { %541 = vst.msk [vmem:[#allocation5 + $0xb0] sm:$0xff] %vm518_vm0, %v508_v50  ;;  %542 = vst.msk [vmem:[#allocation5 + $0xb8] sm:$0xff] %vm518_vm0, %v509_v51  ;;  %v2038_v60 = vunpack.c.l.bf16 %v2054_v49  ;;  %v2039_v61 = vunpack.c.h.bf16 %v2054_v49  ;;  %v441_v62 = vmul.f32 %v2030_v54, %v2247_v1  ;;  %v442_v63 = vmul.f32 %v2031_v55, %v2247_v1  ;;  %v2373_v41 = vld [vmem:[#allocation5 + $0x50] ss:$2 sm:$0xff]  ;;  %v1063_v48 = vld [vmem:[#allocation5 + $0x20] ss:$2 sm:$0xff] }
  0x30   : > { %v443_v0 = vmul.f32 %v2034_v56, %v2247_v1  ;;  %v444_v2 = vmul.f32 %v2035_v57, %v2247_v1  ;;  %v478_v6 = vadd.f32 %v2255_v7, %v439_v58  ;;  %v479_v8 = vadd.f32 %v2255_v7, %v440_v59  ;;  %v800_v46 = vld [vmem:[#allocation5 + $0x70] ss:$2 sm:$0xff]  ;;  %v1065_v49 = vld [vmem:[#allocation5 + $0x40] ss:$2 sm:$0xff] }
  0x31   : > { %v445_v9 = vmul.f32 %v2038_v60, %v2247_v1  ;;  %v446_v10 = vmul.f32 %v2039_v61, %v2247_v1  ;;  %v480_v15 = vadd.f32 %v2255_v7, %v441_v62  ;;  %v481_v16 = vadd.f32 %v2255_v7, %v442_v63  ;;  %v2397_v55 = vld [vmem:[#allocation5 + $0x60] ss:$2 sm:$0xff] }
  0x32   : > { %v482_v17 = vadd.f32 %v2255_v7, %v443_v0  ;;  %v483_v18 = vadd.f32 %v2255_v7, %v444_v2  ;;  %v510_v23 = vmax.f32 %v478_v6, 0.0  ;;  %v511_v24 = vmax.f32 %v479_v8, 0.0 }
  0x33   : > { %v484_v1 = vadd.f32 %v2255_v7, %v445_v9  ;;  %v485_v25 = vadd.f32 %v2255_v7, %v446_v10  ;;  %v512_v30 = vmax.f32 %v480_v15, 0.0  ;;  %v513_v31 = vmax.f32 %v481_v16, 0.0  ;;  %v2399_v56 = vld [vmem:[#allocation5 + $0x80] ss:$2 sm:$0xff]  ;;  %v586_v10 = vld [vmem:[#allocation5 + $0x11] ss:$2 sm:$0xff] }
  0x34   : > { %v514_v32 = vmax.f32 %v482_v17, 0.0  ;;  %v515_v33 = vmax.f32 %v483_v18, 0.0  ;;  %543 = vst.msk [vmem:[#allocation5 + $0xc0] sm:$0xff] %vm518_vm0, %v510_v23  ;;  %544 = vst.msk [vmem:[#allocation5 + $0xc8] sm:$0xff] %vm518_vm0, %v511_v24  ;;  %v561_v7 = vsel %vm2349_vm3, 0, %v560_v4  ;;  %v564_v39 = vsel %vm2349_vm3, 0, %v563_v5 }
  0x35   : > { %v516_v37 = vmax.f32 %v484_v1, 0.0  ;;  %v517_v38 = vmax.f32 %v485_v25, 0.0  ;;  %545 = vst.msk [vmem:[#allocation5 + $0xd0] sm:$0xff] %vm518_vm0, %v512_v30  ;;  %546 = vst.msk [vmem:[#allocation5 + $0xd8] sm:$0xff] %vm518_vm0, %v513_v31  ;;  %v567_v42 = vsel %vm2349_vm3, 0, %v566_v11  ;;  %v570_v43 = vsel %vm2349_vm3, 0, %v569_v12 }
  0x36   : > { %547 = vst.msk [vmem:[#allocation5 + $0xe0] sm:$0xff] %vm518_vm0, %v514_v32  ;;  %548 = vst.msk [vmem:[#allocation5 + $0xe8] sm:$0xff] %vm518_vm0, %v515_v33  ;;  %v573_v44 = vsel %vm2349_vm3, 0, %v572_v13  ;;  %v576_v45 = vsel %vm2349_vm3, 0, %v575_v14  ;;  %v579_v50 = vsel %vm2349_vm3, 0, %v578_v19  ;;  %v582_v51 = vsel %vm2349_vm3, 0, %v581_v20 }
  0x37   : > { %562 = vst [vmem:[#allocation2 + $0x8] sm:$0x1] %v561_v7  ;;  %565 = vst [vmem:[#allocation2 + $0x10] sm:$0x1] %v564_v39  ;;  %v832_v52 = vsel %vm2349_vm3, 0, %v831_v21  ;;  %v835_v53 = vsel %vm2349_vm3, 0, %v834_v22  ;;  %v809_v0 = vpack.c.bf16 %v2363_v36, %v2363_v36  ;;  %v810_v4 = vpack.c.bf16 %v2371_v40, %v2371_v40 }
  0x38   : > { %549 = vst.msk [vmem:[#allocation5 + $0xf0] sm:$0xff] %vm518_vm0, %v516_v37  ;;  %550 = vst.msk [vmem:[#allocation5 + $0xf8] sm:$0xff] %vm518_vm0, %v517_v38  ;;  %v802_v54 = vld [vmem:[#allocation5 + $0x90] ss:$2 sm:$0xff]  ;;  %v838_v57 = vsel %vm2349_vm3, 0, %v837_v26  ;;  %v841_v58 = vsel %vm2349_vm3, 0, %v840_v27  ;;  %v811_v5 = vpack.c.bf16 %v2373_v41, %v2373_v41  ;;  %v812_v6 = vpack.c.bf16 %v800_v46, %v800_v46 }
  0x39   : > { %568 = vst [vmem:[#allocation2 + $0x18] sm:$0x1] %v567_v42  ;;  %571 = vst [vmem:[#allocation2 + $0x20] sm:$0x1] %v570_v43  ;;  %v844_v59 = vsel %vm2349_vm3, 0, %v843_v28  ;;  %v847_v60 = vsel %vm2349_vm3, 0, %v846_v29  ;;  %v813_v8 = vpack.c.bf16 %v802_v54, %v802_v54  ;;  %v1076_v13 = vpack.c.bf16 %v1061_v47, %v1061_v47 }
  0x3a   : > { %574 = vst [vmem:[#allocation2 + $0x28] sm:$0x1] %v573_v44  ;;  %577 = vst [vmem:[#allocation2 + $0x30] sm:$0x1] %v576_v45  ;;  %v804_v61 = vld [vmem:[#allocation5 + $0xb0] ss:$2 sm:$0xff]  ;;  %v1077_v14 = vpack.c.bf16 %v1063_v48, %v1063_v48  ;;  %v1078_v15 = vpack.c.bf16 %v1065_v49, %v1065_v49  ;;  %v1079_v18 = vpack.c.bf16 %v2397_v55, %v2397_v55 }
  0x3b   : > { %580 = vst [vmem:[#allocation2 + $0x38] sm:$0x1] %v579_v50  ;;  %583 = vst [vmem:[#allocation2 + $0x40] sm:$0x1] %v582_v51  ;;  %v850_v62 = vsel %vm2349_vm3, 0, %v849_v34  ;;  %v853_v63 = vsel %vm2349_vm3, 0, %v852_v35  ;;  %v814_v12 = vpack.c.bf16 %v804_v61, %v804_v61  ;;  %v1080_v19 = vpack.c.bf16 %v2399_v56, %v2399_v56 }
  0x3c   : > { %833 = vst [vmem:[#allocation2 + $0x90] sm:$0x1] %v832_v52  ;;  %836 = vst [vmem:[#allocation2 + $0x98] sm:$0x1] %v835_v53  ;;  %v1071_v2 = vld [vmem:[#allocation5 + $0xa0] ss:$2 sm:$0xff]  ;;  %v1948_v27 = vpack.c.bf16 %v586_v10, %v586_v10 }
  0x3d   : > { %839 = vst [vmem:[#allocation2 + $0xa0] sm:$0x1] %v838_v57  ;;  %842 = vst [vmem:[#allocation2 + $0xa8] sm:$0x1] %v841_v58  ;;  %v556_v9 = vld [vmem:[#allocation2 + $0x4] sm:$0x1]  ;;  %v1081_v20 = vpack.c.bf16 %v1071_v2, %v1071_v2 }
  0x3e   : > { %845 = vst [vmem:[#allocation2 + $0xb0] sm:$0x1] %v844_v59  ;;  %848 = vst [vmem:[#allocation2 + $0xb8] sm:$0x1] %v847_v60  ;;  %v588_v11 = vld [vmem:[#allocation5 + $0x31] ss:$2 sm:$0xff] }
  0x3f   : > { %851 = vst [vmem:[#allocation2 + $0xc0] sm:$0x1] %v850_v62  ;;  %854 = vst [vmem:[#allocation2 + $0xc8] sm:$0x1] %v853_v63  ;;  %v590_v16 = vld [vmem:[#allocation5 + $0x51] ss:$2 sm:$0xff]  ;;  %v1949_v28 = vpack.c.bf16 %v588_v11, %v588_v11 }
  0x40   : > { %817 = vst.msk [vmem:[#allocation2 + $0x50] sm:$0xf] %vm551_vm4, %v809_v0  ;;  %v592_v17 = vld [vmem:[#allocation5 + $0x71] ss:$2 sm:$0xff]  ;;  %818 = vst.msk [vmem:[#allocation2 + $0x58] sm:$0xf] %vm551_vm4, %v810_v4  ;;  %v1950_v32 = vpack.c.bf16 %v590_v16, %v590_v16 }
  0x41   : > { %819 = vst.msk [vmem:[#allocation2 + $0x60] sm:$0xf] %vm551_vm4, %v811_v5  ;;  %820 = vst.msk [vmem:[#allocation2 + $0x68] sm:$0xf] %vm551_vm4, %v812_v6  ;;  %v1073_v21 = vld [vmem:[#allocation5 + $0xc0] ss:$2 sm:$0xff]  ;;  %v1951_v42 = vpack.c.bf16 %v592_v17, %v592_v17 }
  0x42   : > { %821 = vst.msk [vmem:[#allocation2 + $0x70] sm:$0xf] %vm551_vm4, %v813_v8  ;;  %v594_v22 = vld [vmem:[#allocation5 + $0x91] ss:$2 sm:$0xff]  ;;  %822 = vst.msk [vmem:[#allocation2 + $0x78] sm:$0xf] %vm551_vm4, %v814_v12  ;;  %v1082_v24 = vpack.c.bf16 %v1073_v21, %v1073_v21 }
  0x43   : > { %v806_v23 = vld [vmem:[#allocation5 + $0xd0] ss:$2 sm:$0xff]  ;;  %1084 = vst.msk [vmem:[#allocation2 + $0xd8] sm:$0xf] %vm551_vm4, %v1076_v13  ;;  %1085 = vst.msk [vmem:[#allocation2 + $0xe0] sm:$0xf] %vm551_vm4, %v1077_v14  ;;  %v1952_v47 = vpack.c.bf16 %v594_v22, %v594_v22 }
  0x44   : > { %1086 = vst.msk [vmem:[#allocation2 + $0xe8] sm:$0xf] %vm551_vm4, %v1078_v15  ;;  %v1075_v1 = vld [vmem:[#allocation5 + $0xe0] ss:$2 sm:$0xff]  ;;  %v2146_v25 = vmov 0   ;;  %v557_v26 = vsel %vm2349_vm3, 0, %v556_v9  ;;  %v815_v29 = vpack.c.bf16 %v806_v23, %v806_v23 }
  0x45   : > { %552 = vst.msk [vmem:[#allocation2] sm:$0xf] %vm551_vm4, %v2146_v25  ;;  %765 = vst.msk [vmem:[#allocation2 + $0x48] sm:$0xf] %vm551_vm4, %v2146_v25  ;;  %v808_v30 = vld [vmem:[#allocation5 + $0xf0] ss:$2 sm:$0xff]  ;;  %v1083_v31 = vpack.c.bf16 %v1075_v1, %v1075_v1 }
  0x46   : > { %826 = vst.msk [vmem:[#allocation2 + $0xd0] sm:$0xf] %vm551_vm4, %v2146_v25  ;;  %1032 = vst.msk [vmem:[#allocation2 + $0x118] sm:$0xf] %vm551_vm4, %v2146_v25  ;;  %vm714_vm5 = vsmask.f32 7938  ;;  %v816_v34 = vpack.c.bf16 %v808_v30, %v808_v30 }
  0x47   : > { %1087 = vst.msk [vmem:[#allocation2 + $0xf0] sm:$0xf] %vm551_vm4, %v1079_v18  ;;  %1088 = vst.msk [vmem:[#allocation2 + $0xf8] sm:$0xf] %vm551_vm4, %v1080_v19  ;;  %v596_v33 = vld [vmem:[#allocation5 + $0xb1] ss:$2 sm:$0xff] }
  0x48   : > { %1089 = vst.msk [vmem:[#allocation2 + $0x100] sm:$0xf] %vm551_vm4, %v1081_v20  ;;  %558 = vst [vmem:[#allocation2 + $0x4] sm:$0x1] %v557_v26  ;;  %v634_v35 = vshrl.u32 %v1948_v27, 16  ;;  %v637_v36 = vshll.u32 %v1948_v27, 16  ;;  %v2445_v48 = vpack.c.bf16 %v596_v33, %v596_v33 }
  0x49   : > { %1090 = vst.msk [vmem:[#allocation2 + $0x108] sm:$0xf] %vm551_vm4, %v1082_v24  ;;  %v642_v37 = vshrl.u32 %v1949_v28, 16  ;;  %v766_v38 = vld [vmem:[#allocation2 + $0x4c] sm:$0x1]  ;;  %v645_v39 = vshll.u32 %v1949_v28, 16  ;;  %vm2449_vm6 = vmand %vm551_vm4, %vm714_vm5 }
  0x4a   : > { %823 = vst.msk [vmem:[#allocation2 + $0x80] sm:$0xf] %vm551_vm4, %v815_v29  ;;  %1091 = vst.msk [vmem:[#allocation2 + $0x110] sm:$0xf] %vm551_vm4, %v1083_v31  ;;  %v719_v7 = vld [vmem:[#allocation2 + $0xc] sm:$0x1] }
  0x4b   : > { %v650_v40 = vshrl.u32 %v1950_v32, 16  ;;  %v653_v41 = vshll.u32 %v1950_v32, 16  ;;  %824 = vst.msk [vmem:[#allocation2 + $0x88] sm:$0xf] %vm551_vm4, %v816_v34  ;;  %v636_v43 = vrot.slane %v634_v35, 7  ;;  %v644_v45 = vrot.slane %v642_v37, 7 }
  0x4c   : > { %v716_v44 = vld [vmem:[#allocation2 + $0x8] sm:$0xf]  ;;  %v725_v46 = vld [vmem:[#allocation2 + $0x14] sm:$0x1]  ;;  %v722_v50 = vld [vmem:[#allocation2 + $0x10] sm:$0xf] }
  0x4d   : > { %v652_v51 = vrot.slane %v650_v40, 7  ;;  %v658_v52 = vshrl.u32 %v1951_v42, 16  ;;  %v661_v53 = vshll.u32 %v1951_v42, 16  ;;  %v767_v54 = vsel %vm2349_vm3, 0, %v766_v38  ;;  %v728_v59 = vld [vmem:[#allocation2 + $0x18] sm:$0xf] }
  0x4e   : > { %v639_v55 = vor.u32 %v637_v36, %v636_v43  ;;  %v640_v56 = vrot.slane %v636_v43, 4  ;;  %v647_v57 = vor.u32 %v645_v39, %v644_v45  ;;  %v648_v58 = vrot.slane %v644_v45, 4  ;;  %v731_v60 = vld [vmem:[#allocation2 + $0x1c] sm:$0x1]  ;;  %768 = vst [vmem:[#allocation2 + $0x4c] sm:$0x1] %v767_v54 }
  0x4f   : > { %v655_v61 = vor.u32 %v653_v41, %v652_v51  ;;  %v656_v62 = vrot.slane %v652_v51, 4  ;;  %v660_v63 = vrot.slane %v658_v52, 7  ;;  %v737_v0 = vld [vmem:[#allocation2 + $0x24] sm:$0x1]  ;;  %v666_v2 = vshrl.u32 %v1952_v47, 16 }
  0x50   : > { %v717_v4 = vsel %vm2449_vm6, %v639_v55, %v716_v44  ;;  %v720_v5 = vsel %vm2349_vm3, %v640_v56, %v719_v7  ;;  %v723_v6 = vsel %vm2449_vm6, %v647_v57, %v722_v50  ;;  %v726_v8 = vsel %vm2349_vm3, %v648_v58, %v725_v46  ;;  %v734_v9 = vld [vmem:[#allocation2 + $0x20] sm:$0xf]  ;;  %v598_v10 = vld [vmem:[#allocation5 + $0xd1] ss:$2 sm:$0xff]  ;;  %v743_v16 = vld [vmem:[#allocation2 + $0x2c] sm:$0x1] }
  0x51   : > { %v600_v11 = vld [vmem:[#allocation5 + $0xf1] ss:$2 sm:$0xff]  ;;  %718 = vst [vmem:[#allocation2 + $0x8] sm:$0xf] %v717_v4  ;;  %721 = vst [vmem:[#allocation2 + $0xc] sm:$0x1] %v720_v5  ;;  %v729_v12 = vsel %vm2449_vm6, %v655_v61, %v728_v59  ;;  %v732_v13 = vsel %vm2349_vm3, %v656_v62, %v731_v60  ;;  %v663_v14 = vor.u32 %v661_v53, %v660_v63 }
  0x52   : > { %724 = vst [vmem:[#allocation2 + $0x10] sm:$0xf] %v723_v6  ;;  %727 = vst [vmem:[#allocation2 + $0x14] sm:$0x1] %v726_v8  ;;  %v664_v15 = vrot.slane %v660_v63, 4  ;;  %v668_v18 = vrot.slane %v666_v2, 7  ;;  %v1954_v26 = vpack.c.bf16 %v598_v10, %v598_v10  ;;  %v1955_v27 = vpack.c.bf16 %v600_v11, %v600_v11 }
  0x53   : > { %v770_v17 = vld [vmem:[#allocation2 + $0x54] sm:$0x1]  ;;  %730 = vst [vmem:[#allocation2 + $0x18] sm:$0xf] %v729_v12  ;;  %733 = vst [vmem:[#allocation2 + $0x1c] sm:$0x1] %v732_v13  ;;  %v735_v23 = vsel %vm2449_vm6, %v663_v14, %v734_v9 }
  0x54   : > { %v669_v19 = vshll.u32 %v1952_v47, 16  ;;  %v674_v20 = vshrl.u32 %v2445_v48, 16  ;;  %v677_v21 = vshll.u32 %v2445_v48, 16  ;;  %v773_v22 = vld [vmem:[#allocation2 + $0x5c] sm:$0x1]  ;;  %v738_v24 = vsel %vm2349_vm3, %v664_v15, %v737_v0 }
  0x55   : > { %v740_v1 = vld [vmem:[#allocation2 + $0x28] sm:$0xf]  ;;  %v749_v25 = vld [vmem:[#allocation2 + $0x34] sm:$0x1]  ;;  %v776_v28 = vld [vmem:[#allocation2 + $0x64] sm:$0x1] }
  0x56   : > { %v779_v29 = vld [vmem:[#allocation2 + $0x6c] sm:$0x1]  ;;  %736 = vst [vmem:[#allocation2 + $0x20] sm:$0xf] %v735_v23  ;;  %739 = vst [vmem:[#allocation2 + $0x24] sm:$0x1] %v738_v24  ;;  %v671_v30 = vor.u32 %v669_v19, %v668_v18 }
  0x57   : > { %v672_v31 = vrot.slane %v668_v18, 4  ;;  %v676_v32 = vrot.slane %v674_v20, 7  ;;  %v771_v33 = vsel %vm2349_vm3, 0, %v770_v17  ;;  %v782_v34 = vld [vmem:[#allocation2 + $0x74] sm:$0x1]  ;;  %v682_v36 = vshrl.u32 %v1954_v26, 16 }
  0x58   : > { %v746_v35 = vld [vmem:[#allocation2 + $0x30] sm:$0xf]  ;;  %v685_v37 = vshll.u32 %v1954_v26, 16  ;;  %v690_v38 = vshrl.u32 %v1955_v27, 16  ;;  %v693_v7 = vshll.u32 %v1955_v27, 16  ;;  %v741_v41 = vsel %vm2449_vm6, %v671_v30, %v740_v1 }
  0x59   : > { %772 = vst [vmem:[#allocation2 + $0x54] sm:$0x1] %v771_v33  ;;  %v785_v39 = vld [vmem:[#allocation2 + $0x7c] sm:$0x1]  ;;  %v788_v40 = vld [vmem:[#allocation2 + $0x84] sm:$0x1]  ;;  %v744_v42 = vsel %vm2349_vm3, %v672_v31, %v743_v16  ;;  %v679_v43 = vor.u32 %v677_v21, %v676_v32 }
  0x5a   : > { %v680_v44 = vrot.slane %v676_v32, 4  ;;  %v755_v45 = vld [vmem:[#allocation2 + $0x3c] sm:$0x1]  ;;  %v761_v46 = vld [vmem:[#allocation2 + $0x44] sm:$0x1]  ;;  %v684_v50 = vrot.slane %v682_v36, 7 }
  0x5b   : > { %v791_v47 = vld [vmem:[#allocation2 + $0x8c] sm:$0x1]  ;;  %v827_v48 = vld [vmem:[#allocation2 + $0xd4] sm:$0x1]  ;;  %742 = vst [vmem:[#allocation2 + $0x28] sm:$0xf] %v741_v41  ;;  %v747_v58 = vsel %vm2449_vm6, %v679_v43, %v746_v35 }
  0x5c   : > { %745 = vst [vmem:[#allocation2 + $0x2c] sm:$0x1] %v744_v42  ;;  %v692_v51 = vrot.slane %v690_v38, 7  ;;  %v774_v52 = vsel %vm2349_vm3, 0, %v773_v22  ;;  %v777_v53 = vsel %vm2349_vm3, 0, %v776_v28  ;;  %v750_v59 = vsel %vm2349_vm3, %v680_v44, %v749_v25 }
  0x5d   : > { %v856_v54 = vld [vmem:[#allocation5 + $0x1] ss:$2 sm:$0xff]  ;;  %v752_v60 = vld [vmem:[#allocation2 + $0x38] sm:$0xf]  ;;  %775 = vst [vmem:[#allocation2 + $0x5c] sm:$0x1] %v774_v52  ;;  %v687_v2 = vor.u32 %v685_v37, %v684_v50 }
  0x5e   : > { %v858_v55 = vld [vmem:[#allocation5 + $0x21] ss:$2 sm:$0xff]  ;;  %778 = vst [vmem:[#allocation2 + $0x64] sm:$0x1] %v777_v53  ;;  %v780_v62 = vsel %vm2349_vm3, 0, %v779_v29  ;;  %v783_v63 = vsel %vm2349_vm3, 0, %v782_v34  ;;  %v695_v5 = vor.u32 %v693_v7, %v692_v51  ;;  %v1956_v19 = vpack.c.bf16 %v856_v54, %v856_v54 }
  0x5f   : > { %v860_v56 = vld [vmem:[#allocation5 + $0x41] ss:$2 sm:$0xff]  ;;  %748 = vst [vmem:[#allocation2 + $0x30] sm:$0xf] %v747_v58  ;;  %751 = vst [vmem:[#allocation2 + $0x34] sm:$0x1] %v750_v59  ;;  %v753_v15 = vsel %vm2449_vm6, %v687_v2, %v752_v60  ;;  %v1957_v20 = vpack.c.bf16 %v858_v55, %v858_v55 }
  0x60   : > { %v862_v57 = vld [vmem:[#allocation5 + $0x61] ss:$2 sm:$0xff]  ;;  %v688_v4 = vrot.slane %v684_v50, 4  ;;  %v696_v6 = vrot.slane %v692_v51, 4  ;;  %781 = vst [vmem:[#allocation2 + $0x6c] sm:$0x1] %v780_v62  ;;  %v1958_v21 = vpack.c.bf16 %v860_v56, %v860_v56 }
  0x61   : > { %v758_v61 = vld [vmem:[#allocation2 + $0x40] sm:$0xf]  ;;  %784 = vst [vmem:[#allocation2 + $0x74] sm:$0x1] %v783_v63  ;;  %v786_v10 = vsel %vm2349_vm3, 0, %v785_v39  ;;  %v789_v11 = vsel %vm2349_vm3, 0, %v788_v40  ;;  %v1959_v22 = vpack.c.bf16 %v862_v57, %v862_v57 }
  0x62   : > { %v864_v0 = vld [vmem:[#allocation5 + $0x81] ss:$2 sm:$0xff]  ;;  %v792_v12 = vsel %vm2349_vm3, 0, %v791_v47  ;;  %v828_v13 = vsel %vm2349_vm3, 0, %v827_v48  ;;  %v756_v16 = vsel %vm2349_vm3, %v688_v4, %v755_v45  ;;  %v759_v17 = vsel %vm2449_vm6, %v695_v5, %v758_v61  ;;  %787 = vst [vmem:[#allocation2 + $0x7c] sm:$0x1] %v786_v10 }
  0x63   : > { %v866_v8 = vld [vmem:[#allocation5 + $0xa1] ss:$2 sm:$0xff]  ;;  %v762_v18 = vsel %vm2349_vm3, %v696_v6, %v761_v46  ;;  %790 = vst [vmem:[#allocation2 + $0x84] sm:$0x1] %v789_v11  ;;  %793 = vst [vmem:[#allocation2 + $0x8c] sm:$0x1] %v792_v12  ;;  %v2507_v23 = vpack.c.bf16 %v864_v0, %v864_v0 }
  0x64   : > { %v868_v9 = vld [vmem:[#allocation5 + $0xc1] ss:$2 sm:$0xff]  ;;  %829 = vst [vmem:[#allocation2 + $0xd4] sm:$0x1] %v828_v13  ;;  %754 = vst [vmem:[#allocation2 + $0x38] sm:$0xf] %v753_v15  ;;  %v2509_v24 = vpack.c.bf16 %v866_v8, %v866_v8 }
  0x65   : > { %v870_v14 = vld [vmem:[#allocation5 + $0xe1] ss:$2 sm:$0xff]  ;;  %757 = vst [vmem:[#allocation2 + $0x3c] sm:$0x1] %v756_v16  ;;  %760 = vst [vmem:[#allocation2 + $0x40] sm:$0xf] %v759_v17  ;;  %v2511_v1 = vpack.c.bf16 %v868_v9, %v868_v9 }
  0x66   : > { %763 = vst [vmem:[#allocation2 + $0x44] sm:$0x1] %v762_v18  ;;  %v2513_v25 = vpack.c.bf16 %v870_v14, %v870_v14  ;;  %v904_v26 = vshrl.u32 %v1956_v19, 16  ;;  %v907_v27 = vshll.u32 %v1956_v19, 16  ;;  %v912_v28 = vshrl.u32 %v1957_v20, 16 }
  0x67   : > { %v915_v29 = vshll.u32 %v1957_v20, 16  ;;  %v986_v30 = vld [vmem:[#allocation2 + $0x94] sm:$0x1]  ;;  %v992_v31 = vld [vmem:[#allocation2 + $0x9c] sm:$0x1]  ;;  %v920_v32 = vshrl.u32 %v1958_v21, 16 }
  0x68   : > { %v923_v33 = vshll.u32 %v1958_v21, 16  ;;  %v928_v34 = vshrl.u32 %v1959_v22, 16  ;;  %v931_v35 = vshll.u32 %v1959_v22, 16  ;;  %v906_v36 = vrot.slane %v904_v26, 7  ;;  %v983_v37 = vld [vmem:[#allocation2 + $0x90] sm:$0xf] }
  0x69   : > { %v914_v38 = vrot.slane %v912_v28, 7  ;;  %v998_v7 = vld [vmem:[#allocation2 + $0xa4] sm:$0x1]  ;;  %v1004_v39 = vld [vmem:[#allocation2 + $0xac] sm:$0x1]  ;;  %v936_v40 = vshrl.u32 %v2507_v23, 16 }
  0x6a   : > { %v939_v41 = vshll.u32 %v2507_v23, 16  ;;  %v989_v42 = vld [vmem:[#allocation2 + $0x98] sm:$0xf]  ;;  %v922_v43 = vrot.slane %v920_v32, 7  ;;  %v930_v44 = vrot.slane %v928_v34, 7  ;;  %v944_v45 = vshrl.u32 %v2509_v24, 16 }
  0x6b   : > { %v947_v46 = vshll.u32 %v2509_v24, 16  ;;  %v909_v47 = vor.u32 %v907_v27, %v906_v36  ;;  %v910_v48 = vrot.slane %v906_v36, 4  ;;  %v917_v50 = vor.u32 %v915_v29, %v914_v38  ;;  %v995_v52 = vld [vmem:[#allocation2 + $0xa0] sm:$0xf]  ;;  %v1001_v53 = vld [vmem:[#allocation2 + $0xa8] sm:$0xf] }
  0x6c   : > { %v918_v51 = vrot.slane %v914_v38, 4  ;;  %v925_v54 = vor.u32 %v923_v33, %v922_v43  ;;  %v926_v55 = vrot.slane %v922_v43, 4  ;;  %v933_v56 = vor.u32 %v931_v35, %v930_v44  ;;  %v1033_v62 = vld [vmem:[#allocation2 + $0x11c] sm:$0x1]  ;;  %v1010_v6 = vld [vmem:[#allocation2 + $0xb4] sm:$0x1] }
  0x6d   : > { %v934_v57 = vrot.slane %v930_v44, 4  ;;  %v984_v58 = vsel %vm2449_vm6, %v909_v47, %v983_v37  ;;  %v987_v59 = vsel %vm2349_vm3, %v910_v48, %v986_v30  ;;  %v990_v60 = vsel %vm2449_vm6, %v917_v50, %v989_v42  ;;  %v1037_v63 = vld [vmem:[#allocation2 + $0xdc] sm:$0x1]  ;;  %v1040_v9 = vld [vmem:[#allocation2 + $0xe4] sm:$0x1] }
  0x6e   : > { %v993_v61 = vsel %vm2349_vm3, %v918_v51, %v992_v31  ;;  %985 = vst [vmem:[#allocation2 + $0x90] sm:$0xf] %v984_v58  ;;  %988 = vst [vmem:[#allocation2 + $0x94] sm:$0x1] %v987_v59  ;;  %v996_v0 = vsel %vm2449_vm6, %v925_v54, %v995_v52  ;;  %v999_v2 = vsel %vm2349_vm3, %v926_v55, %v998_v7  ;;  %v1016_v8 = vld [vmem:[#allocation2 + $0xbc] sm:$0x1] }
  0x6f   : > { %991 = vst [vmem:[#allocation2 + $0x98] sm:$0xf] %v990_v60  ;;  %994 = vst [vmem:[#allocation2 + $0x9c] sm:$0x1] %v993_v61  ;;  %v1002_v4 = vsel %vm2449_vm6, %v933_v56, %v1001_v53  ;;  %v1005_v5 = vsel %vm2349_vm3, %v934_v57, %v1004_v39  ;;  %v1043_v10 = vld [vmem:[#allocation2 + $0xec] sm:$0x1] }
  0x70   : > { %997 = vst [vmem:[#allocation2 + $0xa0] sm:$0xf] %v996_v0  ;;  %1000 = vst [vmem:[#allocation2 + $0xa4] sm:$0x1] %v999_v2  ;;  %v938_v11 = vrot.slane %v936_v40, 7  ;;  %v946_v13 = vrot.slane %v944_v45, 7 }
  0x71   : > { %1003 = vst [vmem:[#allocation2 + $0xa8] sm:$0xf] %v1002_v4  ;;  %1006 = vst [vmem:[#allocation2 + $0xac] sm:$0x1] %v1005_v5  ;;  %v1007_v12 = vld [vmem:[#allocation2 + $0xb0] sm:$0xf] }
  0x72   : > { %v952_v14 = vshrl.u32 %v2511_v1, 16  ;;  %v955_v15 = vshll.u32 %v2511_v1, 16  ;;  %v1013_v16 = vld [vmem:[#allocation2 + $0xb8] sm:$0xf]  ;;  %v960_v17 = vshrl.u32 %v2513_v25, 16  ;;  %v963_v18 = vshll.u32 %v2513_v25, 16 }
  0x73   : > { %v1034_v19 = vsel %vm2349_vm3, 0, %v1033_v62  ;;  %v1038_v20 = vsel %vm2349_vm3, 0, %v1037_v63  ;;  %v1046_v21 = vld [vmem:[#allocation2 + $0xf4] sm:$0x1]  ;;  %v941_v22 = vor.u32 %v939_v41, %v938_v11  ;;  %v942_v23 = vrot.slane %v938_v11, 4 }
  0x74   : > { %v949_v24 = vor.u32 %v947_v46, %v946_v13  ;;  %v950_v26 = vrot.slane %v946_v13, 4  ;;  %v1022_v27 = vld [vmem:[#allocation2 + $0xc4] sm:$0x1]  ;;  %1035 = vst [vmem:[#allocation2 + $0x11c] sm:$0x1] %v1034_v19  ;;  %v954_v29 = vrot.slane %v952_v14, 7 }
  0x75   : > { %1039 = vst [vmem:[#allocation2 + $0xdc] sm:$0x1] %v1038_v20  ;;  %v1049_v1 = vld [vmem:[#allocation2 + $0xfc] sm:$0x1]  ;;  %v1052_v28 = vld [vmem:[#allocation2 + $0x104] sm:$0x1]  ;;  %v1008_v33 = vsel %vm2449_vm6, %v941_v22, %v1007_v12  ;;  %v1011_v34 = vsel %vm2349_vm3, %v942_v23, %v1010_v6 }
  0x76   : > { %v962_v30 = vrot.slane %v960_v17, 7  ;;  %v1041_v25 = vsel %vm2349_vm3, 0, %v1040_v9  ;;  %v1044_v31 = vsel %vm2349_vm3, 0, %v1043_v10  ;;  %v1055_v32 = vld [vmem:[#allocation2 + $0x10c] sm:$0x1]  ;;  %v1014_v35 = vsel %vm2449_vm6, %v949_v24, %v1013_v16 }
  0x77   : > { %v1017_v36 = vsel %vm2349_vm3, %v950_v26, %v1016_v8  ;;  %v1019_v37 = vld [vmem:[#allocation2 + $0xc0] sm:$0xf]  ;;  %v1025_v38 = vld [vmem:[#allocation2 + $0xc8] sm:$0xf]  ;;  %v1028_v7 = vld [vmem:[#allocation2 + $0xcc] sm:$0x1]  ;;  %v957_v39 = vor.u32 %v955_v15, %v954_v29 }
  0x78   : > { %1042 = vst [vmem:[#allocation2 + $0xe4] sm:$0x1] %v1041_v25  ;;  %1045 = vst [vmem:[#allocation2 + $0xec] sm:$0x1] %v1044_v31  ;;  %v958_v40 = vrot.slane %v954_v29, 4  ;;  %v965_v41 = vor.u32 %v963_v18, %v962_v30  ;;  %v966_v42 = vrot.slane %v962_v30, 4 }
  0x79   : > { %1009 = vst [vmem:[#allocation2 + $0xb0] sm:$0xf] %v1008_v33  ;;  %1012 = vst [vmem:[#allocation2 + $0xb4] sm:$0x1] %v1011_v34  ;;  %v1058_v43 = vld [vmem:[#allocation2 + $0x114] sm:$0x1]  ;;  %v1020_v48 = vsel %vm2449_vm6, %v957_v39, %v1019_v37 }
  0x7a   : > { %1015 = vst [vmem:[#allocation2 + $0xb8] sm:$0xf] %v1014_v35  ;;  %1018 = vst [vmem:[#allocation2 + $0xbc] sm:$0x1] %v1017_v36  ;;  %v1047_v44 = vsel %vm2349_vm3, 0, %v1046_v21  ;;  %v1050_v45 = vsel %vm2349_vm3, 0, %v1049_v1  ;;  %v1023_v50 = vsel %vm2349_vm3, %v958_v40, %v1022_v27  ;;  %v1026_v51 = vsel %vm2449_vm6, %v965_v41, %v1025_v38 }
  0x7b   : > { %v1053_v46 = vsel %vm2349_vm3, 0, %v1052_v28  ;;  %v1056_v47 = vsel %vm2349_vm3, 0, %v1055_v32  ;;  %v1029_v52 = vsel %vm2349_vm3, %v966_v42, %v1028_v7  ;;  %1048 = vst [vmem:[#allocation2 + $0xf4] sm:$0x1] %v1047_v44  ;;  %1051 = vst [vmem:[#allocation2 + $0xfc] sm:$0x1] %v1050_v45 }
  0x7c   : > { %1054 = vst [vmem:[#allocation2 + $0x104] sm:$0x1] %v1053_v46  ;;  %1057 = vst [vmem:[#allocation2 + $0x10c] sm:$0x1] %v1056_v47  ;;  %v1059_v53 = vsel %vm2349_vm3, 0, %v1058_v43 }
  0x7d   : > { %1021 = vst [vmem:[#allocation2 + $0xc0] sm:$0xf] %v1020_v48  ;;  %1024 = vst [vmem:[#allocation2 + $0xc4] sm:$0x1] %v1023_v50 }
  0x7e   : > { %1027 = vst [vmem:[#allocation2 + $0xc8] sm:$0xf] %v1026_v51  ;;  %1030 = vst [vmem:[#allocation2 + $0xcc] sm:$0x1] %v1029_v52 }
  0x7f   : > { %1060 = vst [vmem:[#allocation2 + $0x114] sm:$0x1] %v1059_v53 }
  0x80 PF: > { %v1507_v49 = vld [vmem:[%s2763_s4] sm:$0x3]  ;;  %vm1514_vm7 = vcmask 1041408   ;;  %s1965_s16 = sshll.u32 %s2128_s24, 5  ;;  %vm1115_vm8 = vcmask 31744   ;;  %vm1199_vm9 = vcmask 1046528  }
  0x81   : > { %2064 = vmatprep.subr.msk.bf16.mxu0 %vm1514_vm7, %v1507_v49  ;;  %v1516_v54 = vsel %vm1514_vm7, %v1507_v49, 0  ;;  %s2577_s17 = scalar_lea.vmem [#allocation2], %s1965_s16  ;;  %v1875_v55 = vld [vmem:[%s2762_s3] ss:$0 sm:$0xff]  ;;  %v1883_v4 = vld [vmem:[%s2762_s3 + $0x1] ss:$0 sm:$0xff] }
  0x82   : > { %2059 = vmatpush3.bf16.msra.mxu0 %v1516_v54  ;;  %v1885_v12 = vld [vmem:[%s2762_s3 + $0x2] ss:$0 sm:$0xff]  ;;  %v2612_v52 = vld [vmem:[%s2762_s3 + $0x3] ss:$0 sm:$0xff]  ;;  %vm1591_vm10 = vcmask 27648   ;;  %vm1613_vm11 = vcmask 24576  }
  0x86   : > { %v1096_v3 = vld [vmem:[%s2577_s17] ss:$8 sps:$4 sm:$0xff]   ;;  %v1156_v0 = vld [vmem:[%s2577_s17 + $0x4] sm:$0x1]  ;;  %v1158_v2 = vld [vmem:[%s2577_s17 + $0xc] sm:$0x1] }
  0x87   : > { %v1100_v56 = vunpack.c.l.bf16 %v1096_v3  ;;  %v1101_v57 = vunpack.c.h.bf16 %v1096_v3  ;;  %v1878_v58 = vld [vmem:[%s2577_s17 + $0x48] ss:$8 sps:$4 sm:$0xff]   ;;  %v1164_v6 = vunpack.c.l.bf16 %v1156_v0  ;;  %v1166_v9 = vunpack.c.l.bf16 %v1158_v2  ;;  %v1880_v28 = vld [vmem:[%s2577_s17 + $0x58] ss:$8 sps:$4 sm:$0xff]   ;;  %v1160_v31 = vld [vmem:[%s2577_s17 + $0x14] sm:$0x1] }
  0x88   : > { %v1127_v61 = vunpack.c.l.bf16 %v1878_v58  ;;  %v1128_v62 = vunpack.c.h.bf16 %v1878_v58  ;;  %v1155_v63 = vld [vmem:[%s2577_s17] ss:$8 sps:$4 sm:$0xff]   ;;  %v1098_v19 = vld [vmem:[%s2577_s17 + $0x10] ss:$8 sps:$4 sm:$0xff]   ;;  %v1129_v32 = vunpack.c.l.bf16 %v1880_v28  ;;  %v1130_v33 = vunpack.c.h.bf16 %v1880_v28  ;;  %v1162_v34 = vld [vmem:[%s2577_s17 + $0x1c] sm:$0x1] }
  0x89   : > { %v1111_v59 = vmul.f32 %v1875_v55, %v1100_v56  ;;  %v1112_v60 = vmul.f32 %v1875_v55, %v1101_v57  ;;  %v1163_v5 = vunpack.c.l.bf16 %v1155_v63  ;;  %v1165_v8 = vunpack.c.h.bf16 %v1155_v63  ;;  %v1159_v25 = vld [vmem:[%s2577_s17 + $0x10] ss:$8 sps:$4 sm:$0xff]   ;;  %v1936_v63 = vld [vmem:[%s2577_s17 + $0x24] sm:$0x1]  ;;  %v2624_v0 = vld [vmem:[%s2762_s3 + $0x8] ss:$0 sm:$0xff] }
  0x8a   : > { %v1139_v10 = vmul.f32 %v1883_v4, %v1127_v61  ;;  %v1140_v11 = vmul.f32 %v1883_v4, %v1128_v62  ;;  %v1180_v16 = vmul.f32 %v1885_v12, %v1164_v6  ;;  %v1182_v18 = vmul.f32 %v1885_v12, %v1166_v9  ;;  %v1888_v40 = vld [vmem:[%s2577_s17 + $0x90] ss:$8 sps:$4 sm:$0xff]   ;;  %v1934_v62 = vld [vmem:[%s2577_s17 + $0x1c] sm:$0x1] }
  0x8b   : > { %1116 = vst.msk [vmem:[#allocation3] sm:$0xff] %vm1115_vm8, %v1111_v59  ;;  %1117 = vst.msk [vmem:[#allocation3 + $0x8] sm:$0xff] %vm1115_vm8, %v1112_v60  ;;  %v1179_v15 = vmul.f32 %v1885_v12, %v1163_v5  ;;  %v1181_v17 = vmul.f32 %v1885_v12, %v1165_v8  ;;  %v1102_v22 = vunpack.c.l.bf16 %v1098_v19  ;;  %v1103_v23 = vunpack.c.h.bf16 %v1098_v19  ;;  %v1933_v57 = vld [vmem:[%s2577_s17 + $0x18] ss:$8 sps:$4 sm:$0xff]   ;;  %v1903_v19 = vld [vmem:[%s2577_s17 + $0x94] sm:$0x1] }
  0x8c   : > { %v1201_v26 = vrot.slane %v1180_v16, 1  ;;  %v1204_v1 = vrot.slane %v1182_v18, 1  ;;  %v1167_v37 = vunpack.c.l.bf16 %v1159_v25  ;;  %v1168_v38 = vunpack.c.l.bf16 %v1160_v31  ;;  %v1896_v9 = vld [vmem:[%s2577_s17 + $0xd8] ss:$8 sps:$4 sm:$0xff]  }
  0x8d   : > { %v1200_v24 = vrot.slane %v1179_v15, 1  ;;  %v1203_v27 = vrot.slane %v1181_v17, 1  ;;  %v1113_v29 = vmul.f32 %v1875_v55, %v1102_v22  ;;  %v1114_v30 = vmul.f32 %v1875_v55, %v1103_v23  ;;  %v2632_v17 = vld [vmem:[%s2762_s3 + $0x4] ss:$0 sm:$0xff]  ;;  %v1902_v18 = vld [vmem:[%s2577_s17 + $0x90] ss:$8 sps:$4 sm:$0xff]  }
  0x8e   : > { %v1169_v41 = vunpack.c.h.bf16 %v1159_v25  ;;  %v1170_v42 = vunpack.c.l.bf16 %v1162_v34  ;;  %v1141_v45 = vmul.f32 %v1883_v4, %v1129_v32  ;;  %v1142_v46 = vmul.f32 %v1883_v4, %v1130_v33 }
  0x8f   : > { %1118 = vst.msk [vmem:[#allocation3 + $0x10] sm:$0xff] %vm1115_vm8, %v1113_v29  ;;  %1119 = vst.msk [vmem:[#allocation3 + $0x18] sm:$0xff] %vm1115_vm8, %v1114_v30  ;;  %v1202_v35 = vsel %vm1199_vm9, %v1200_v24, %v1201_v26  ;;  %v1205_v36 = vsel %vm1199_vm9, %v1203_v27, %v1204_v1  ;;  %v1231_v47 = vunpack.c.l.bf16 %v1888_v40  ;;  %v1232_v48 = vunpack.c.h.bf16 %v1888_v40  ;;  %v1905_v27 = vld [vmem:[%s2577_s17 + $0x9c] sm:$0x1]  ;;  %v1890_v1 = vld [vmem:[%s2577_s17 + $0xa0] ss:$8 sps:$4 sm:$0xff]  }
  0x90   : > { %v1183_v50 = vmul.f32 %v1885_v12, %v1167_v37  ;;  %v1184_v51 = vmul.f32 %v1885_v12, %v1168_v38  ;;  %v1185_v54 = vmul.f32 %v1885_v12, %v1169_v41  ;;  %v1186_v3 = vmul.f32 %v1885_v12, %v1170_v42  ;;  %v1911_v42 = vld [vmem:[%s2762_s3 + $0x5] ss:$0 sm:$0xff] }
  0x91   : > { %v1243_v58 = vmul.f32 %v2612_v52, %v1231_v47  ;;  %v1244_v59 = vmul.f32 %v2612_v52, %v1232_v48  ;;  %v1445_v5 = vunpack.c.l.bf16 %v1933_v57  ;;  %v1448_v12 = vunpack.c.l.bf16 %v1936_v63 }
  0x92   : > { %v1143_v13 = vld [vmem:[#allocation3] sm:$0xff]  ;;  %v1144_v14 = vld [vmem:[#allocation3 + $0x8] sm:$0xff]  ;;  %v1206_v60 = vrot.slane %v1183_v50, 1  ;;  %v1207_v61 = vrot.slane %v1184_v51, 1  ;;  %v1209_v2 = vrot.slane %v1185_v54, 1  ;;  %v1210_v4 = vrot.slane %v1186_v3, 1 }
  0x93   : > { %v1147_v20 = vadd.f32 %v1143_v13, %v1139_v10  ;;  %v1148_v21 = vadd.f32 %v1144_v14, %v1140_v11  ;;  %v1446_v10 = vunpack.c.l.bf16 %v1934_v62  ;;  %v1447_v11 = vunpack.c.h.bf16 %v1933_v57 }
  0x94   : > { %v1208_v15 = vsel %vm1199_vm9, %v1206_v60, %v1207_v61  ;;  %v1461_v16 = vmul.f32 %v2624_v0, %v1445_v5  ;;  %v1464_v23 = vmul.f32 %v2624_v0, %v1448_v12  ;;  %v1266_v24 = vunpack.c.l.bf16 %v1896_v9  ;;  %v1907_v5 = vld [vmem:[%s2577_s17 + $0xa4] sm:$0x1]  ;;  %v1914_v12 = vld [vmem:[%s2577_s17 + $0x8] ss:$8 sps:$4 sm:$0xff]  }
  0x95   : > { %1151 = vst.msk [vmem:[#allocation3] sm:$0xff] %vm1115_vm8, %v1147_v20  ;;  %1152 = vst.msk [vmem:[#allocation3 + $0x8] sm:$0xff] %vm1115_vm8, %v1148_v21  ;;  %v1211_v20 = vsel %vm1199_vm9, %v1209_v2, %v1210_v4  ;;  %v1462_v21 = vmul.f32 %v2624_v0, %v1446_v10  ;;  %v1463_v22 = vmul.f32 %v2624_v0, %v1447_v11  ;;  %v1267_v26 = vunpack.c.h.bf16 %v1896_v9  ;;  %v1906_v4 = vld [vmem:[%s2577_s17 + $0xa0] ss:$8 sps:$4 sm:$0xff]  }
  0x96   : > { %v1145_v53 = vld [vmem:[#allocation3 + $0x10] sm:$0xff]  ;;  %v1146_v49 = vld [vmem:[#allocation3 + $0x18] sm:$0xff]  ;;  %v1483_v28 = vrot.slane %v1461_v16, 1  ;;  %v1487_v32 = vrot.slane %v1464_v23, 1  ;;  %v1302_v33 = vunpack.c.l.bf16 %v1902_v18  ;;  %v1303_v34 = vunpack.c.l.bf16 %v1903_v19 }
  0x97   : > { %v1149_v55 = vadd.f32 %v1145_v53, %v1141_v45  ;;  %v1150_v56 = vadd.f32 %v1146_v49, %v1142_v46  ;;  %v1484_v25 = vrot.slane %v1462_v21, 1  ;;  %v1486_v31 = vrot.slane %v1463_v22, 1 }
  0x98   : > { %v1304_v37 = vunpack.c.h.bf16 %v1902_v18  ;;  %v1305_v38 = vunpack.c.l.bf16 %v1905_v27  ;;  %v1278_v40 = vmul.f32 %v2632_v17, %v1266_v24  ;;  %v1279_v41 = vmul.f32 %v2632_v17, %v1267_v26  ;;  %v1919_v24 = vld [vmem:[%s2762_s3 + $0x6] ss:$0 sm:$0xff] }
  0x99   : > { %1153 = vst.msk [vmem:[#allocation3 + $0x10] sm:$0xff] %vm1115_vm8, %v1149_v55  ;;  %1154 = vst.msk [vmem:[#allocation3 + $0x18] sm:$0xff] %vm1115_vm8, %v1150_v56  ;;  %v1318_v47 = vmul.f32 %v1911_v42, %v1302_v33  ;;  %v1319_v48 = vmul.f32 %v1911_v42, %v1303_v34  ;;  %v1898_v55 = vld [vmem:[%s2577_s17 + $0xe8] ss:$8 sps:$4 sm:$0xff]   ;;  %v1370_v22 = vunpack.c.l.bf16 %v1914_v12  ;;  %v1371_v23 = vunpack.c.h.bf16 %v1914_v12 }
  0x9a   : > { %v1320_v50 = vmul.f32 %v1911_v42, %v1304_v37  ;;  %v1321_v51 = vmul.f32 %v1911_v42, %v1305_v38  ;;  %v1269_v2 = vunpack.c.h.bf16 %v1898_v55 }
  0x9b   : > { %v1338_v56 = vrot.slane %v1318_v47, 1  ;;  %v1339_v57 = vrot.slane %v1319_v48, 1  ;;  %v1929_v48 = vld [vmem:[%s2577_s17 + $0x8] ss:$8 sps:$4 sm:$0xff]  }
  0x9c   : > { %v1187_v7 = vld [vmem:[#allocation3] sm:$0xff]  ;;  %v1188_v39 = vld [vmem:[#allocation3 + $0x8] sm:$0xff]  ;;  %v1281_v21 = vmul.f32 %v2632_v17, %v1269_v2 }
  0x9d   : > { %v1216_v43 = vadd.f32 %v1202_v35, %v1187_v7  ;;  %v1217_v44 = vadd.f32 %v1205_v36, %v1188_v39  ;;  %v2645_v7 = vsel %vm1199_vm9, %v1483_v28, %v1484_v25  ;;  %v2648_v39 = vsel %vm1199_vm9, %v1486_v31, %v1487_v32 }
  0x9e   : > { %v1383_v32 = vmul.f32 %v1919_v24, %v1371_v23 }
  0x9f   : > { %1220 = vst.msk [vmem:[#allocation3] sm:$0xff] %vm1115_vm8, %v1216_v43  ;;  %1221 = vst.msk [vmem:[#allocation3 + $0x8] sm:$0xff] %vm1115_vm8, %v1217_v44  ;;  %v1233_v43 = vunpack.c.l.bf16 %v1890_v1  ;;  %v1234_v44 = vunpack.c.h.bf16 %v1890_v1 }
  0xa0   : > { %v1189_v29 = vld [vmem:[#allocation3 + $0x10] sm:$0xff]  ;;  %v1190_v30 = vld [vmem:[#allocation3 + $0x18] sm:$0xff] }
  0xa1   : > { %v1218_v35 = vadd.f32 %v1208_v15, %v1189_v29  ;;  %v1219_v36 = vadd.f32 %v1211_v20, %v1190_v30  ;;  %v1245_v54 = vmul.f32 %v2612_v52, %v1233_v43  ;;  %v1246_v3 = vmul.f32 %v2612_v52, %v1234_v44  ;;  %v1928_v43 = vld [vmem:[%s2762_s3 + $0x7] ss:$0 sm:$0xff] }
  0xa2   : > { %v1268_v52 = vunpack.c.l.bf16 %v1898_v55  ;;  %v1308_v15 = vunpack.c.h.bf16 %v1906_v4 }
  0xa3   : > { %1222 = vst.msk [vmem:[#allocation3 + $0x10] sm:$0xff] %vm1115_vm8, %v1218_v35  ;;  %1223 = vst.msk [vmem:[#allocation3 + $0x18] sm:$0xff] %vm1115_vm8, %v1219_v36 }
  0xa4   : > { %v1280_v20 = vmul.f32 %v2632_v17, %v1268_v52  ;;  %v1324_v29 = vmul.f32 %v1911_v42, %v1308_v15  ;;  %v1382_v17 = vmul.f32 %v1919_v24, %v1370_v22 }
  0xa6   : > { %v1247_v6 = vld [vmem:[#allocation3] sm:$0xff]  ;;  %v1248_v8 = vld [vmem:[#allocation3 + $0x8] sm:$0xff]  ;;  %v1347_v35 = vrot.slane %v1324_v29, 1 }
  0xa7   : > { %v1251_v13 = vadd.f32 %v1247_v6, %v1243_v58  ;;  %v1252_v14 = vadd.f32 %v1248_v8, %v1244_v59  ;;  %v1341_v58 = vrot.slane %v1320_v50, 1  ;;  %v1342_v59 = vrot.slane %v1321_v51, 1  ;;  %v1909_v6 = vld [vmem:[%s2577_s17 + $0xac] sm:$0x1]  ;;  %v1932_v51 = vld [vmem:[%s2577_s17 + $0x14] sm:$0x1] }
  0xa8   : > { %v1340_v8 = vsel %vm1199_vm9, %v1338_v56, %v1339_v57  ;;  %v1309_v16 = vunpack.c.l.bf16 %v1909_v6  ;;  %v1930_v50 = vld [vmem:[%s2577_s17 + $0xc] sm:$0x1]  ;;  %v1441_v56 = vunpack.c.l.bf16 %v1929_v48 }
  0xa9   : > { %1255 = vst.msk [vmem:[#allocation3] sm:$0xff] %vm1115_vm8, %v1251_v13  ;;  %1256 = vst.msk [vmem:[#allocation3 + $0x8] sm:$0xff] %vm1115_vm8, %v1252_v14  ;;  %v1343_v9 = vsel %vm1199_vm9, %v1341_v58, %v1342_v59  ;;  %v1306_v13 = vunpack.c.l.bf16 %v1906_v4  ;;  %v1307_v14 = vunpack.c.l.bf16 %v1907_v5  ;;  %v1442_v57 = vunpack.c.l.bf16 %v1930_v50 }
  0xaa   : > { %v1249_v60 = vld [vmem:[#allocation3 + $0x10] sm:$0xff]  ;;  %v1250_v61 = vld [vmem:[#allocation3 + $0x18] sm:$0xff]  ;;  %v1325_v30 = vmul.f32 %v1911_v42, %v1309_v16  ;;  %v1443_v58 = vunpack.c.h.bf16 %v1929_v48  ;;  %v1444_v59 = vunpack.c.l.bf16 %v1932_v51  ;;  %v1457_v4 = vmul.f32 %v2624_v0, %v1441_v56 }
  0xab   : > { %v1253_v62 = vadd.f32 %v1249_v60, %v1245_v54  ;;  %v1254_v63 = vadd.f32 %v1250_v61, %v1246_v3  ;;  %v1322_v1 = vmul.f32 %v1911_v42, %v1306_v13  ;;  %v1323_v28 = vmul.f32 %v1911_v42, %v1307_v14  ;;  %v1916_v54 = vld [vmem:[%s2577_s17 + $0x18] ss:$8 sps:$4 sm:$0xff]  }
  0xac   : > { %v1348_v36 = vrot.slane %v1325_v30, 1  ;;  %v1458_v5 = vmul.f32 %v2624_v0, %v1442_v57  ;;  %v1459_v6 = vmul.f32 %v2624_v0, %v1443_v58  ;;  %v1925_v13 = vld [vmem:[%s2577_s17 + $0x60] ss:$8 sps:$4 sm:$0xff]   ;;  %v1477_v14 = vrot.slane %v1457_v4, 1 }
  0xad   : > { %1257 = vst.msk [vmem:[#allocation3 + $0x10] sm:$0xff] %vm1115_vm8, %v1253_v62  ;;  %1258 = vst.msk [vmem:[#allocation3 + $0x18] sm:$0xff] %vm1115_vm8, %v1254_v63  ;;  %v1344_v33 = vrot.slane %v1322_v1, 1  ;;  %v1345_v34 = vrot.slane %v1323_v28, 1  ;;  %v1372_v62 = vunpack.c.l.bf16 %v1916_v54  ;;  %v1373_v63 = vunpack.c.h.bf16 %v1916_v54 }
  0xae   : > { %v1478_v15 = vrot.slane %v1458_v5, 1  ;;  %v1480_v16 = vrot.slane %v1459_v6, 1  ;;  %v1408_v23 = vunpack.c.h.bf16 %v1925_v13 }
  0xaf   : > { %v1346_v44 = vsel %vm1199_vm9, %v1344_v33, %v1345_v34  ;;  %v1385_v12 = vmul.f32 %v1919_v24, %v1373_v63 }
  0xb0   : > { %v1282_v45 = vld [vmem:[#allocation3] sm:$0xff]  ;;  %v1283_v46 = vld [vmem:[#allocation3 + $0x8] sm:$0xff] }
  0xb1   : > { %v1286_v53 = vadd.f32 %v1282_v45, %v1278_v40  ;;  %v1287_v49 = vadd.f32 %v1283_v46, %v1279_v41  ;;  %v1923_v40 = vld [vmem:[%s2577_s17 + $0x50] ss:$8 sps:$4 sm:$0xff]   ;;  %v1349_v45 = vsel %vm1199_vm9, %v1347_v35, %v1348_v36 }
  0xb2   : > { %v1405_v46 = vunpack.c.l.bf16 %v1923_v40  ;;  %v1406_v47 = vunpack.c.h.bf16 %v1923_v40 }
  0xb3   : > { %1290 = vst.msk [vmem:[#allocation3] sm:$0xff] %vm1115_vm8, %v1286_v53  ;;  %1291 = vst.msk [vmem:[#allocation3 + $0x8] sm:$0xff] %vm1115_vm8, %v1287_v49 }
  0xb4   : > { %v1284_v26 = vld [vmem:[#allocation3 + $0x10] sm:$0xff]  ;;  %v1285_v27 = vld [vmem:[#allocation3 + $0x18] sm:$0xff]  ;;  %v1417_v60 = vmul.f32 %v1928_v43, %v1405_v46  ;;  %v1418_v61 = vmul.f32 %v1928_v43, %v1406_v47 }
  0xb5   : > { %v1288_v25 = vadd.f32 %v1284_v26, %v1280_v20  ;;  %v1289_v31 = vadd.f32 %v1285_v27, %v1281_v21 }
  0xb7   : > { %1292 = vst.msk [vmem:[#allocation3 + $0x10] sm:$0xff] %vm1115_vm8, %v1288_v25  ;;  %1293 = vst.msk [vmem:[#allocation3 + $0x18] sm:$0xff] %vm1115_vm8, %v1289_v31  ;;  %v1420_v25 = vmul.f32 %v1928_v43, %v1408_v23 }
  0xba   : > { %v1326_v10 = vld [vmem:[#allocation3] sm:$0xff]  ;;  %v1327_v11 = vld [vmem:[#allocation3 + $0x8] sm:$0xff] }
  0xbb   : > { %v1354_v18 = vadd.f32 %v1340_v8, %v1326_v10  ;;  %v1355_v19 = vadd.f32 %v1343_v9, %v1327_v11  ;;  %v1460_v8 = vmul.f32 %v2624_v0, %v1444_v59  ;;  %v1384_v11 = vmul.f32 %v1919_v24, %v1372_v62 }
  0xbc   : > { %v1407_v0 = vunpack.c.l.bf16 %v1925_v13  ;;  %v1479_v24 = vsel %vm1199_vm9, %v1477_v14, %v1478_v15 }
  0xbd   : > { %1358 = vst.msk [vmem:[#allocation3] sm:$0xff] %vm1115_vm8, %v1354_v18  ;;  %1359 = vst.msk [vmem:[#allocation3 + $0x8] sm:$0xff] %vm1115_vm8, %v1355_v19  ;;  %v1481_v18 = vrot.slane %v1460_v8, 1 }
  0xbe   : > { %v1328_v53 = vld [vmem:[#allocation3 + $0x10] sm:$0xff]  ;;  %v1329_v49 = vld [vmem:[#allocation3 + $0x18] sm:$0xff]  ;;  %v1419_v30 = vmul.f32 %v1928_v43, %v1407_v0 }
  0xbf   : > { %v1356_v3 = vadd.f32 %v1346_v44, %v1328_v53  ;;  %v1357_v55 = vadd.f32 %v1349_v45, %v1329_v49  ;;  %v1482_v26 = vsel %vm1199_vm9, %v1480_v16, %v1481_v18 }
  0xc1   : > { %1360 = vst.msk [vmem:[#allocation3 + $0x10] sm:$0xff] %vm1115_vm8, %v1356_v3  ;;  %1361 = vst.msk [vmem:[#allocation3 + $0x18] sm:$0xff] %vm1115_vm8, %v1357_v55 }
  0xc4   : > { %v1386_v37 = vld [vmem:[#allocation3] sm:$0xff]  ;;  %v1387_v38 = vld [vmem:[#allocation3 + $0x8] sm:$0xff] }
  0xc5   : > { %v1390_v41 = vadd.f32 %v1386_v37, %v1382_v17  ;;  %v1391_v42 = vadd.f32 %v1387_v38, %v1383_v32 }
  0xc7   : > { %1394 = vst.msk [vmem:[#allocation3] sm:$0xff] %vm1115_vm8, %v1390_v41  ;;  %1395 = vst.msk [vmem:[#allocation3 + $0x8] sm:$0xff] %vm1115_vm8, %v1391_v42 }
  0xc8   : > { %v1388_v19 = vld [vmem:[#allocation3 + $0x10] sm:$0xff]  ;;  %v1389_v20 = vld [vmem:[#allocation3 + $0x18] sm:$0xff] }
  0xc9   : > { %v1392_v21 = vadd.f32 %v1388_v19, %v1384_v11  ;;  %v1393_v22 = vadd.f32 %v1389_v20, %v1385_v12 }
  0xcb   : > { %1396 = vst.msk [vmem:[#allocation3 + $0x10] sm:$0xff] %vm1115_vm8, %v1392_v21  ;;  %1397 = vst.msk [vmem:[#allocation3 + $0x18] sm:$0xff] %vm1115_vm8, %v1393_v22 }
  0xce   : > { %v1421_v52 = vld [vmem:[#allocation3] sm:$0xff]  ;;  %v1422_v2 = vld [vmem:[#allocation3 + $0x8] sm:$0xff] }
  0xcf   : > { %v1425_v9 = vadd.f32 %v1421_v52, %v1417_v60  ;;  %v1426_v10 = vadd.f32 %v1422_v2, %v1418_v61 }
  0xd1   : > { %1429 = vst.msk [vmem:[#allocation3] sm:$0xff] %vm1115_vm8, %v1425_v9  ;;  %1430 = vst.msk [vmem:[#allocation3 + $0x8] sm:$0xff] %vm1115_vm8, %v1426_v10 }
  0xd2   : > { %v1423_v31 = vld [vmem:[#allocation3 + $0x10] sm:$0xff]  ;;  %v1424_v17 = vld [vmem:[#allocation3 + $0x18] sm:$0xff] }
  0xd3   : > { %v1427_v32 = vadd.f32 %v1423_v31, %v1419_v30  ;;  %v1428_v33 = vadd.f32 %v1424_v17, %v1420_v25 }
  0xd5   : > { %1431 = vst.msk [vmem:[#allocation3 + $0x10] sm:$0xff] %vm1115_vm8, %v1427_v32  ;;  %1432 = vst.msk [vmem:[#allocation3 + $0x18] sm:$0xff] %vm1115_vm8, %v1428_v33 }
  0xd8   : > { %v1465_v27 = vld [vmem:[#allocation3] sm:$0xff]  ;;  %v1466_v1 = vld [vmem:[#allocation3 + $0x8] sm:$0xff] }
  0xd9   : > { %v1493_v28 = vadd.f32 %v1479_v24, %v1465_v27  ;;  %v1494_v29 = vadd.f32 %v1482_v26, %v1466_v1 }
  0xdb   : > { %1497 = vst.msk [vmem:[#allocation3] sm:$0xff] %vm1115_vm8, %v1493_v28  ;;  %1498 = vst.msk [vmem:[#allocation3 + $0x8] sm:$0xff] %vm1115_vm8, %v1494_v29 }
  0xdc   : > { %v1467_v37 = vld [vmem:[#allocation3 + $0x10] sm:$0xff]  ;;  %v1468_v38 = vld [vmem:[#allocation3 + $0x18] sm:$0xff] }
  0xdd   : > { %v1495_v40 = vadd.f32 %v2645_v7, %v1467_v37  ;;  %v1496_v41 = vadd.f32 %v2648_v39, %v1468_v38 }
  0xdf   : > { %1499 = vst.msk [vmem:[#allocation3 + $0x10] sm:$0xff] %vm1115_vm8, %v1495_v40  ;;  %1500 = vst.msk [vmem:[#allocation3 + $0x18] sm:$0xff] %vm1115_vm8, %v1496_v41 }
  0xe2   : > { %v1501_v34 = vld [vmem:[#allocation3] sm:$0xff]  ;;  %v1502_v35 = vld [vmem:[#allocation3 + $0x8] sm:$0xff] }
  0xe3   : > { %v1505_v36 = vpack.c.bf16 %v1502_v35, %v1501_v34 }
  0xe5   : > { %2060 = vmatprep.mubr.msk.bf16.mxu0 %vm1115_vm8, %v1505_v36 }
  0xe6   : > { %v1503_v42 = vld [vmem:[#allocation3 + $0x10] sm:$0xff]  ;;  %v1504_v43 = vld [vmem:[#allocation3 + $0x18] sm:$0xff] }
  0xe7   : > { %v1506_v44 = vpack.c.bf16 %v1504_v43, %v1503_v42 }
  0xe9   : > { %2061 = vmatmul.mubr.msk.bf16.vlgmr.msra.gmra.mrb[0].mxu0 %vm1115_vm8, %v1506_v44 }
 0x1bc   : > { %v2062_v45 = vpop.f32.mrb[0].mxu0 }
 0x1bd   : > { %1569 = vst.msk [vmem:[#allocation4 + $0x10] sm:$0xff] %vm1115_vm8, %v2062_v45  ;;  %v1552_v46 = vpop.f32.mrb[1].mxu0 }
 0x1be   : > { %1567 = vst.msk [vmem:[#allocation4] sm:$0xff] %vm1115_vm8, %v1552_v46  ;;  %v2063_v7 = vpop.f32.mrb[2].mxu0 }
 0x1bf   : > { %1570 = vst.msk [vmem:[#allocation4 + $0x18] sm:$0xff] %vm1115_vm8, %v2063_v7  ;;  %v1555_v39 = vpop.f32.mrb[3].mxu0 }
 0x1c0   : > { %1568 = vst.msk [vmem:[#allocation4 + $0x8] sm:$0xff] %vm1115_vm8, %v1555_v39 }
 0x1c4   : > { %v1573_v47 = vld [vmem:[#allocation4 + $0x10] sm:$0xff] }
 0x1c5   : > { %v1974_v48 = vpack.c.bf16 %v1573_v47, %v1573_v47  ;;  %v1571_v50 = vld [vmem:[#allocation4] sm:$0xff]  ;;  %v1621_v54 = vmul.f32 %v1573_v47, %v1573_v47  ;;  %v1603_v61 = vsel %vm1115_vm8, %v1573_v47, 0.0 }
 0x1c6   : > { %v1972_v51 = vpack.c.bf16 %v1571_v50, %v1571_v50  ;;  %v1619_v53 = vmul.f32 %v1571_v50, %v1571_v50  ;;  %v1574_v49 = vld [vmem:[#allocation4 + $0x18] sm:$0xff]  ;;  %v1600_v56 = vsel %vm1115_vm8, %v1571_v50, 0.0 }
 0x1c7   : > { %1594 = vst.msk [vmem:[%s2229_s18 + $0x8] sm:$0xf] %vm1591_vm10, %v1974_v48  ;;  %v1975_v3 = vpack.c.bf16 %v1574_v49, %v1574_v49  ;;  %v1572_v55 = vld [vmem:[#allocation4 + $0x8] sm:$0xff]  ;;  %v1622_v63 = vmul.f32 %v1574_v49, %v1574_v49  ;;  %v1626_v5 = vsel %vm1115_vm8, %v1621_v54, 0.0  ;;  %v1605_v6 = vsel %vm1115_vm8, %v1574_v49, 0.0 }
 0x1c8   : > { %1592 = vst.msk [vmem:[%s2229_s18] sm:$0xf] %vm1591_vm10, %v1972_v51  ;;  %v1973_v57 = vpack.c.bf16 %v1572_v55, %v1572_v55  ;;  %v1601_v58 = vsel %vm1115_vm8, %v1572_v55, 0.0  ;;  %v1620_v59 = vmul.f32 %v1572_v55, %v1572_v55  ;;  %v1623_v62 = vsel %vm1115_vm8, %v1619_v53, 0.0 }
 0x1c9   : > { %1595 = vst.msk [vmem:[%s2229_s18 + $0xc] sm:$0xf] %vm1591_vm10, %v1975_v3  ;;  %v1602_v60 = vadd.f32 %v1601_v58, %v1600_v56  ;;  %v1628_v10 = vsel %vm1115_vm8, %v1622_v63, 0.0 }
 0x1ca   : > { %1593 = vst.msk [vmem:[%s2229_s18 + $0x4] sm:$0xf] %vm1591_vm10, %v1973_v57  ;;  %v1624_v52 = vsel %vm1115_vm8, %v1620_v59, 0.0 }
 0x1cb   : > { %v1604_v2 = vadd.f32 %v1603_v61, %v1602_v60  ;;  %v1625_v4 = vadd.f32 %v1624_v52, %v1623_v62 }
 0x1cd   : > { %v1606_v8 = vadd.f32 %v1605_v6, %v1604_v2  ;;  %v1627_v9 = vadd.f32 %v1626_v5, %v1625_v4 }
 0x1cf   : > { %v1607_v11 = vrot.slane %v1606_v8, 4  ;;  %v1629_v12 = vadd.f32 %v1628_v10, %v1627_v9 }
 0x1d1   : > { %v1608_v13 = vadd.f32 %v1607_v11, %v1606_v8  ;;  %v1630_v14 = vrot.slane %v1629_v12, 4 }
 0x1d3   : > { %v1609_v15 = vrot.slane %v1608_v13, 2  ;;  %v1631_v16 = vadd.f32 %v1630_v14, %v1629_v12 }
 0x1d5   : > { %v1610_v18 = vadd.f32 %v1609_v15, %v1608_v13  ;;  %v1632_v19 = vrot.slane %v1631_v16, 2 }
 0x1d7   : > { %v1611_v20 = vrot.slane %v1610_v18, 1  ;;  %v1633_v21 = vadd.f32 %v1632_v19, %v1631_v16 }
 0x1d9   : > { %v1612_v22 = vadd.f32 %v1611_v20, %v1610_v18  ;;  %v1634_v0 = vrot.slane %v1633_v21, 1 }
 0x1db   : > { %1614 = vst.msk [vmem:[%s331_s30] sm:$0x1] %vm1613_vm11, %v1612_v22  ;;  %v1635_v23 = vadd.f32 %v1634_v0, %v1633_v21 }
 0x1dd   : > { %1636 = vst.msk [vmem:[%s338_s8] sm:$0x1] %vm1613_vm11, %v1635_v23 }
 0x1de PF: > { %s18_s28 = sadd.s32 1, %s2144_s28   ;;  %s2772_s9 = sld [smem:[#allocation6_spill]] }
 0x1df   : > { %p15_p9 = scmp.ge.s32.totalorder %s18_s28, 6   ;;  %s2773_s24 = smov %s2136_s26 }
 0x1e0   : > { %s2774_s25 = smov %s2140_s27  ;;  %s2775_s26 = smov %s2778_s29 }
 0x1e1   :  { %17 = sbr.rel (!%p15_p9) target bundleno = 3 (0x3), region = 150 }
 0x1e4   : > { %s2776_s27 = smov %s2772_s9 }

</bundles_post_ra>
